<compile_context>
chip_gen: v7x
topology: tpu7x:2x2x1
jax: 0.10.0
libtpu: 0.0.40
codegen_flags: <defaults>
</compile_context>

<pallas_src>
import functools

import numpy as np
import jax
import jax.numpy as jnp
from jax import lax
from jax.experimental import pallas as pl
from jax.experimental.pallas import tpu as pltpu

_K = 5      # conv kernel size
_PAD = 2    # conv padding ("same"-style for k=5)


# ---------------------------------------------------------------------------
# In-kernel helpers
# ---------------------------------------------------------------------------
def _sigmoid(x):
    # sigmoid(x) = 0.5 * (1 + tanh(x/2)); tanh runs on the EUP slot (no VALU
    # divide) and lowers robustly in Mosaic.
    return 0.5 * jnp.tanh(0.5 * x) + 0.5


# ---------------------------------------------------------------------------
# The fused Pallas kernel (conv1..conv4 + flatten + FC for one batch block)
# ---------------------------------------------------------------------------
def _lenet_kernel(xph_ref, m1_ref, b1_ref, m2_ref, b2_ref, m3_ref, b3_ref,
                  m4_ref, b4_ref, wfc_ref, bfc_ref, out_ref):
    nb = out_ref.shape[0]
    f32 = jnp.float32

    # ---- layer 1: 3 -> 12, stride 2, 32x32 -> 16x16 --------------------------
    # xph rows are phase-ordered: position 9*p + j holds padded input row
    # 4*j + p (p in 0..3).  For kernel row kh, the even output rows (oh = 2j)
    # read padded rows kh + 4j and the odd output rows read kh + 2 + 4j, so
    # both LHS blocks are contiguous 8-row slices of xph.
    acc_e = acc_o = None
    for kh in range(_K):
        sa = 9 * (kh % 4) + kh // 4            # rows kh + 4j   -> even oh
        sb = 9 * ((kh + 2) % 4) + (kh + 2) // 4  # rows kh+2+4j -> odd oh
        lhs_e = xph_ref[:, sa:sa + 8, :].reshape(nb * 8, 96)
        lhs_o = xph_ref[:, sb:sb + 8, :].reshape(nb * 8, 96)
        m = m1_ref[kh]                         # (96, 192)
        te = jnp.dot(lhs_e, m, preferred_element_type=f32)
        to = jnp.dot(lhs_o, m, preferred_element_type=f32)
        acc_e = te if acc_e is None else acc_e + te
        acc_o = to if acc_o is None else acc_o + to
    y1e = _sigmoid(acc_e + b1_ref[...]).reshape(nb, 8, 192)   # oh = 0,2,...,14
    y1o = _sigmoid(acc_o + b1_ref[...]).reshape(nb, 8, 192)   # oh = 1,3,...,15

    # ---- layer 2: 12 -> 12, stride 2, 16x16 -> 8x8 ----------------------------
    # Padded rows of layer-2's input split by parity are exactly [0, y1e, 0]
    # and [0, y1o, 0]; every per-kh LHS is again a contiguous 8-row slice.
    z1 = jnp.zeros((nb, 1, 192), f32)
    ph_e = jnp.concatenate([z1, y1e, z1], axis=1)   # (nb, 10, 192)
    ph_o = jnp.concatenate([z1, y1o, z1], axis=1)   # (nb, 10, 192)
    acc = None
    for kh in range(_K):
        src = ph_e if kh % 2 == 0 else ph_o
        lhs = src[:, kh // 2: kh // 2 + 8, :].reshape(nb * 8, 192)
        t = jnp.dot(lhs, m2_ref[kh], preferred_element_type=f32)
        acc = t if acc is None else acc + t
    y2 = _sigmoid(acc + b2_ref[...]).reshape(nb, 8, 96)

    # ---- layers 3 & 4: 12 -> 12, stride 1, 8x8 -> 8x8 -------------------------
    def conv_s1(y, m_ref, b_ref):
        z2 = jnp.zeros((nb, _PAD, 96), f32)
        yp = jnp.concatenate([z2, y, z2], axis=1)   # (nb, 12, 96)
        a = None
        for kh in range(_K):
            lhs = yp[:, kh: kh + 8, :].reshape(nb * 8, 96)
            t = jnp.dot(lhs, m_ref[kh], preferred_element_type=f32)
            a = t if a is None else a + t
        return _sigmoid(a + b_ref[...]).reshape(nb, 8, 96)

    y3 = conv_s1(y2, m3_ref, b3_ref)
    y4 = conv_s1(y3, m4_ref, b4_ref)                # (nb, 8, 96), lanes = w*12+c

    # ---- fused FC -------------------------------------------------------------
    # feat[n, h*96 + w*12 + c] = y4[n, h, w*12 + c]; FC weight rows were
    # permuted in the wrapper to that (h, w, c) order and split per h, so the
    # FC is an accumulation over 8 matmuls (avoids a sublane->lane reshape).
    fc = None
    for hh in range(8):
        t = jnp.dot(y4[:, hh, :], wfc_ref[hh], preferred_element_type=f32)
        fc = t if fc is None else fc + t
    out_ref[...] = fc + bfc_ref[...]                # (nb, 128) lane-dense store


# ---------------------------------------------------------------------------
# Wrapper-side weight / input preparation (pure layout plumbing, one-time)
# ---------------------------------------------------------------------------
def _toeplitz_weights(w, stride, wi, wo):
    """(Cout, Cin, 5, 5) torch conv weight -> (5, Wi*Cin, Wo*Cout).

    M[kh, iw*Cin+ci, ow*Cout+co] = w[co, ci, kh, iw - (ow*stride - PAD)]
    (zero when the tap index falls outside [0, 5), i.e. W-padding is folded
    into the matrix)."""
    cout, cin, k, _ = w.shape
    place = np.zeros((k, wi, wo), np.float32)          # [kw, iw, ow]
    for kw in range(k):
        for ow in range(wo):
            iw = ow * stride - _PAD + kw
            if 0 <= iw < wi:
                place[kw, iw, ow] = 1.0
    wt = jnp.transpose(w, (2, 3, 1, 0))                # (kh, kw, cin, cout)
    m = jnp.einsum('bwo,abic->awioc', jnp.asarray(place), wt,
                   precision=lax.Precision.HIGHEST)    # exact 0/1 placement
    return m.reshape(k, wi * cin, wo * cout)


def _bias_row(b, wo):
    # lane index ow*Cout + co -> b[co]
    return jnp.tile(b, (wo,)).reshape(1, -1)


_PHASE_PERM = np.concatenate([np.arange(p, 36, 4) for p in range(4)])


def _prep_input(x_nchw, n_pad):
    """NCHW (N,3,32,32) -> phase-ordered, H-padded (n_pad, 36, 96) layout."""
    n = x_nchw.shape[0]
    x = jnp.transpose(x_nchw, (0, 2, 3, 1)).reshape(n, 32, 96)   # (n, H, W*C)
    if n_pad != n:
        x = jnp.concatenate(
            [x, jnp.zeros((n_pad - n, 32, 96), x.dtype)], axis=0)
    xp = jnp.pad(x, ((0, 0), (_PAD, _PAD), (0, 0)))              # (n_pad, 36, 96)
    return xp[:, _PHASE_PERM, :]                                 # phase-major rows


# ---------------------------------------------------------------------------
# Forward pass (PyTorch-compatible NCHW in, (N, 100) out)
# ---------------------------------------------------------------------------
@functools.partial(jax.jit, static_argnames=("block_n",))
def lenet_forward(x_nchw, params, block_n=8):
    n, c, h, w = x_nchw.shape
    assert (c, h, w) == (3, 32, 32), "LeNet FC expects 3x32x32 inputs"
    x_nchw = x_nchw.astype(jnp.float32)

    if n <= block_n:
        nb, n_pad = n, n
    else:
        nb = block_n                                 # multiple of 8
        n_pad = ((n + nb - 1) // nb) * nb

    xph = _prep_input(x_nchw, n_pad)

    m1 = _toeplitz_weights(params["conv1_w"], 2, 32, 16)
    b1 = _bias_row(params["conv1_b"], 16)
    m2 = _toeplitz_weights(params["conv2_w"], 2, 16, 8)
    b2 = _bias_row(params["conv2_b"], 8)
    m3 = _toeplitz_weights(params["conv3_w"], 1, 8, 8)
    b3 = _bias_row(params["conv3_b"], 8)
    m4 = _toeplitz_weights(params["conv4_w"], 1, 8, 8)
    b4 = _bias_row(params["conv4_b"], 8)

    # FC weight rows permuted from PyTorch's (c, h, w) flatten order to the
    # kernel's (h, w, c) order, columns zero-padded 100 -> 128 (lane dense),
    # and split per h for the in-kernel accumulation.
    wfc = jnp.transpose(params["fc_w"].reshape(100, 12, 8, 8), (2, 3, 1, 0))
    wfc = jnp.pad(wfc.reshape(768, 100), ((0, 0), (0, 28))).reshape(8, 96, 128)
    bfc = jnp.pad(params["fc_b"], (0, 28)).reshape(1, 128)

    out = pl.pallas_call(
        _lenet_kernel,
        out_shape=jax.ShapeDtypeStruct((n_pad, 128), jnp.float32),
        grid=(n_pad // nb,),
        in_specs=[
            pl.BlockSpec((nb, 36, 96), lambda i: (i, 0, 0)),
            pl.BlockSpec(m1.shape, lambda i: (0, 0, 0)),
            pl.BlockSpec(b1.shape, lambda i: (0, 0)),
            pl.BlockSpec(m2.shape, lambda i: (0, 0, 0)),
            pl.BlockSpec(b2.shape, lambda i: (0, 0)),
            pl.BlockSpec(m3.shape, lambda i: (0, 0, 0)),
            pl.BlockSpec(b3.shape, lambda i: (0, 0)),
            pl.BlockSpec(m4.shape, lambda i: (0, 0, 0)),
            pl.BlockSpec(b4.shape, lambda i: (0, 0)),
            pl.BlockSpec(wfc.shape, lambda i: (0, 0, 0)),
            pl.BlockSpec(bfc.shape, lambda i: (0, 0)),
        ],
        out_specs=pl.BlockSpec((nb, 128), lambda i: (i, 0)),
        compiler_params=pltpu.CompilerParams(
            dimension_semantics=("parallel",)),
    )(xph, m1, b1, m2, b2, m3, b3, m4, b4, wfc, bfc)

    return out[:n, :100]


# ---------------------------------------------------------------------------
# Pure-JAX reference (f32, HIGHEST precision)
# ---------------------------------------------------------------------------
def _reference(x_nchw, params):
    y = x_nchw.astype(jnp.float32)
    for name, s in (("conv1", 2), ("conv2", 2), ("conv3", 1), ("conv4", 1)):
        y = lax.conv_general_dilated(
            y, params[f"{name}_w"], window_strides=(s, s),
            padding=((_PAD, _PAD), (_PAD, _PAD)),
            dimension_numbers=("NCHW", "OIHW", "NCHW"),
            precision=lax.Precision.HIGHEST)
        y = jax.nn.sigmoid(y + params[f"{name}_b"].reshape(1, -1, 1, 1))
    feat = y.reshape(y.shape[0], -1)
    return jnp.dot(feat, params["fc_w"].T,
                   precision=lax.Precision.HIGHEST) + params["fc_b"].reshape(1, -1)


# ---------------------------------------------------------------------------
# Parameter init (PyTorch-shaped tensors, deterministic)
# ---------------------------------------------------------------------------
def init_params(key):
    ks = jax.random.split(key, 5)

    def conv_init(k, cout, cin):
        kw, kb = jax.random.split(k)
        bound = (1.0 / (cin * _K * _K)) ** 0.5
        w = jax.random.uniform(kw, (cout, cin, _K, _K), jnp.float32, -bound, bound)
        b = jax.random.uniform(kb, (cout,), jnp.float32, -bound, bound)
        return w, b

    def fc_init(k, dout, din):
        kw, kb = jax.random.split(k)
        bound = (1.0 / din) ** 0.5
        w = jax.random.uniform(kw, (dout, din), jnp.float32, -bound, bound)
        b = jax.random.uniform(kb, (dout,), jnp.float32, -bound, bound)
        return w, b

    p = {}
    p["conv1_w"], p["conv1_b"] = conv_init(ks[0], 12, 3)
    p["conv2_w"], p["conv2_b"] = conv_init(ks[1], 12, 12)
    p["conv3_w"], p["conv3_b"] = conv_init(ks[2], 12, 12)
    p["conv4_w"], p["conv4_b"] = conv_init(ks[3], 12, 12)
    p["fc_w"], p["fc_b"] = fc_init(ks[4], 100, 768)
    return p


if __name__ == "__main__":
    key = jax.random.PRNGKey(0)
    k_x, k_p = jax.random.split(key)

    N = 2
    x = jax.random.normal(k_x, (N, 3, 32, 32), jnp.float32)   # NCHW like torch
    params = init_params(k_p)

    out = jax.block_until_ready(lenet_forward(x, params))
    ref = jax.block_until_ready(_reference(x, params))

    assert out.shape == (N, 100)
    err = float(jnp.max(jnp.abs(out - ref)))
    # Kernel matmuls run at default MXU precision (per the perf review) while
    # the reference uses HIGHEST f32, so allow a few e-3 of drift.
    assert err < 5e-3, f"mismatch vs reference, max abs err = {err}"
    print("KERNEL_OK")
</pallas_src>

<mosaic_0001>
module attributes {stable_mosaic.version = 11 : i64} {
  func.func @_lenet_kernel(%arg0: i32, %arg1: memref<2x36x96xf32, #tpu.memory_space<vmem>>, %arg2: memref<5x96x192xf32, #tpu.memory_space<vmem>>, %arg3: memref<1x192xf32, #tpu.memory_space<vmem>>, %arg4: memref<5x192x96xf32, #tpu.memory_space<vmem>>, %arg5: memref<1x96xf32, #tpu.memory_space<vmem>>, %arg6: memref<5x96x96xf32, #tpu.memory_space<vmem>>, %arg7: memref<1x96xf32, #tpu.memory_space<vmem>>, %arg8: memref<5x96x96xf32, #tpu.memory_space<vmem>>, %arg9: memref<1x96xf32, #tpu.memory_space<vmem>>, %arg10: memref<8x96x128xf32, #tpu.memory_space<vmem>>, %arg11: memref<1x128xf32, #tpu.memory_space<vmem>>, %arg12: memref<2x128xf32, #tpu.memory_space<vmem>>) attributes {dimension_semantics = [#tpu.dimension_semantics<parallel>], iteration_bounds = array<i64: 1>, scalar_prefetch = 0 : i64, scratch_operands = 0 : i64, tpu.core_type = #tpu.core_type<tc>, window_params = [{transform_indices = @transform_0, window_bounds = array<i64: 2, 36, 96>}, {pipeline_mode = #tpu.pipeline_mode<synchronous>, transform_indices = @transform_1, window_bounds = array<i64: 5, 96, 192>}, {pipeline_mode = #tpu.pipeline_mode<synchronous>, transform_indices = @transform_2, window_bounds = array<i64: 1, 192>}, {pipeline_mode = #tpu.pipeline_mode<synchronous>, transform_indices = @transform_3, window_bounds = array<i64: 5, 192, 96>}, {pipeline_mode = #tpu.pipeline_mode<synchronous>, transform_indices = @transform_4, window_bounds = array<i64: 1, 96>}, {pipeline_mode = #tpu.pipeline_mode<synchronous>, transform_indices = @transform_5, window_bounds = array<i64: 5, 96, 96>}, {pipeline_mode = #tpu.pipeline_mode<synchronous>, transform_indices = @transform_6, window_bounds = array<i64: 1, 96>}, {pipeline_mode = #tpu.pipeline_mode<synchronous>, transform_indices = @transform_7, window_bounds = array<i64: 5, 96, 96>}, {pipeline_mode = #tpu.pipeline_mode<synchronous>, transform_indices = @transform_8, window_bounds = array<i64: 1, 96>}, {pipeline_mode = #tpu.pipeline_mode<synchronous>, transform_indices = @transform_9, window_bounds = array<i64: 8, 96, 128>}, {pipeline_mode = #tpu.pipeline_mode<synchronous>, transform_indices = @transform_10, window_bounds = array<i64: 1, 128>}, {transform_indices = @transform_11, window_bounds = array<i64: 2, 128>}]} {
    %c0 = arith.constant 0 : index
    %c0_0 = arith.constant 0 : index
    %c0_1 = arith.constant 0 : index
    %0 = vector.load %arg1[%c0, %c0_0, %c0_1] : memref<2x36x96xf32, #tpu.memory_space<vmem>>, vector<2x8x96xf32>
    %1 = vector.shape_cast %0 : vector<2x8x96xf32> to vector<16x96xf32>
    %c0_2 = arith.constant 0 : index
    %c18 = arith.constant 18 : index
    %c0_3 = arith.constant 0 : index
    %2 = vector.load %arg1[%c0_2, %c18, %c0_3] : memref<2x36x96xf32, #tpu.memory_space<vmem>>, vector<2x8x96xf32>
    %3 = vector.shape_cast %2 : vector<2x8x96xf32> to vector<16x96xf32>
    %c0_4 = arith.constant 0 : index
    %c0_5 = arith.constant 0 : index
    %c0_6 = arith.constant 0 : index
    %4 = vector.load %arg2[%c0_4, %c0_5, %c0_6] : memref<5x96x192xf32, #tpu.memory_space<vmem>>, vector<1x96x192xf32>
    %5 = vector.shape_cast %4 : vector<1x96x192xf32> to vector<96x192xf32>
    %cst = arith.constant dense<0.000000e+00> : vector<16x192xf32>
    %6 = tpu.matmul %1, %5, %cst {dimension_numbers = #tpu.dot_dimension_numbers<[1], [0], [0], [1], [0, 0, 1, 1], [], []>} : vector<16x96xf32>, vector<96x192xf32>, vector<16x192xf32> -> vector<16x192xf32>
    %cst_7 = arith.constant dense<0.000000e+00> : vector<16x192xf32>
    %7 = tpu.matmul %3, %5, %cst_7 {dimension_numbers = #tpu.dot_dimension_numbers<[1], [0], [0], [1], [0, 0, 1, 1], [], []>} : vector<16x96xf32>, vector<96x192xf32>, vector<16x192xf32> -> vector<16x192xf32>
    %c0_8 = arith.constant 0 : index
    %c9 = arith.constant 9 : index
    %c0_9 = arith.constant 0 : index
    %8 = vector.load %arg1[%c0_8, %c9, %c0_9] : memref<2x36x96xf32, #tpu.memory_space<vmem>>, vector<2x8x96xf32>
    %9 = vector.shape_cast %8 : vector<2x8x96xf32> to vector<16x96xf32>
    %c0_10 = arith.constant 0 : index
    %c27 = arith.constant 27 : index
    %c0_11 = arith.constant 0 : index
    %10 = vector.load %arg1[%c0_10, %c27, %c0_11] : memref<2x36x96xf32, #tpu.memory_space<vmem>>, vector<2x8x96xf32>
    %11 = vector.shape_cast %10 : vector<2x8x96xf32> to vector<16x96xf32>
    %c1 = arith.constant 1 : index
    %c0_12 = arith.constant 0 : index
    %c0_13 = arith.constant 0 : index
    %12 = vector.load %arg2[%c1, %c0_12, %c0_13] : memref<5x96x192xf32, #tpu.memory_space<vmem>>, vector<1x96x192xf32>
    %13 = vector.shape_cast %12 : vector<1x96x192xf32> to vector<96x192xf32>
    %cst_14 = arith.constant dense<0.000000e+00> : vector<16x192xf32>
    %14 = tpu.matmul %9, %13, %cst_14 {dimension_numbers = #tpu.dot_dimension_numbers<[1], [0], [0], [1], [0, 0, 1, 1], [], []>} : vector<16x96xf32>, vector<96x192xf32>, vector<16x192xf32> -> vector<16x192xf32>
    %cst_15 = arith.constant dense<0.000000e+00> : vector<16x192xf32>
    %15 = tpu.matmul %11, %13, %cst_15 {dimension_numbers = #tpu.dot_dimension_numbers<[1], [0], [0], [1], [0, 0, 1, 1], [], []>} : vector<16x96xf32>, vector<96x192xf32>, vector<16x192xf32> -> vector<16x192xf32>
    %16 = arith.addf %6, %14 : vector<16x192xf32>
    %17 = arith.addf %7, %15 : vector<16x192xf32>
    %c0_16 = arith.constant 0 : index
    %c18_17 = arith.constant 18 : index
    %c0_18 = arith.constant 0 : index
    %18 = vector.load %arg1[%c0_16, %c18_17, %c0_18] : memref<2x36x96xf32, #tpu.memory_space<vmem>>, vector<2x8x96xf32>
    %19 = vector.shape_cast %18 : vector<2x8x96xf32> to vector<16x96xf32>
    %c0_19 = arith.constant 0 : index
    %c1_20 = arith.constant 1 : index
    %c0_21 = arith.constant 0 : index
    %20 = vector.load %arg1[%c0_19, %c1_20, %c0_21] : memref<2x36x96xf32, #tpu.memory_space<vmem>>, vector<2x8x96xf32>
    %21 = vector.shape_cast %20 : vector<2x8x96xf32> to vector<16x96xf32>
    %c2 = arith.constant 2 : index
    %c0_22 = arith.constant 0 : index
    %c0_23 = arith.constant 0 : index
    %22 = vector.load %arg2[%c2, %c0_22, %c0_23] : memref<5x96x192xf32, #tpu.memory_space<vmem>>, vector<1x96x192xf32>
    %23 = vector.shape_cast %22 : vector<1x96x192xf32> to vector<96x192xf32>
    %cst_24 = arith.constant dense<0.000000e+00> : vector<16x192xf32>
    %24 = tpu.matmul %19, %23, %cst_24 {dimension_numbers = #tpu.dot_dimension_numbers<[1], [0], [0], [1], [0, 0, 1, 1], [], []>} : vector<16x96xf32>, vector<96x192xf32>, vector<16x192xf32> -> vector<16x192xf32>
    %cst_25 = arith.constant dense<0.000000e+00> : vector<16x192xf32>
    %25 = tpu.matmul %21, %23, %cst_25 {dimension_numbers = #tpu.dot_dimension_numbers<[1], [0], [0], [1], [0, 0, 1, 1], [], []>} : vector<16x96xf32>, vector<96x192xf32>, vector<16x192xf32> -> vector<16x192xf32>
    %26 = arith.addf %16, %24 : vector<16x192xf32>
    %27 = arith.addf %17, %25 : vector<16x192xf32>
    %c0_26 = arith.constant 0 : index
    %c27_27 = arith.constant 27 : index
    %c0_28 = arith.constant 0 : index
    %28 = vector.load %arg1[%c0_26, %c27_27, %c0_28] : memref<2x36x96xf32, #tpu.memory_space<vmem>>, vector<2x8x96xf32>
    %29 = vector.shape_cast %28 : vector<2x8x96xf32> to vector<16x96xf32>
    %c0_29 = arith.constant 0 : index
    %c10 = arith.constant 10 : index
    %c0_30 = arith.constant 0 : index
    %30 = vector.load %arg1[%c0_29, %c10, %c0_30] : memref<2x36x96xf32, #tpu.memory_space<vmem>>, vector<2x8x96xf32>
    %31 = vector.shape_cast %30 : vector<2x8x96xf32> to vector<16x96xf32>
    %c3 = arith.constant 3 : index
    %c0_31 = arith.constant 0 : index
    %c0_32 = arith.constant 0 : index
    %32 = vector.load %arg2[%c3, %c0_31, %c0_32] : memref<5x96x192xf32, #tpu.memory_space<vmem>>, vector<1x96x192xf32>
    %33 = vector.shape_cast %32 : vector<1x96x192xf32> to vector<96x192xf32>
    %cst_33 = arith.constant dense<0.000000e+00> : vector<16x192xf32>
    %34 = tpu.matmul %29, %33, %cst_33 {dimension_numbers = #tpu.dot_dimension_numbers<[1], [0], [0], [1], [0, 0, 1, 1], [], []>} : vector<16x96xf32>, vector<96x192xf32>, vector<16x192xf32> -> vector<16x192xf32>
    %cst_34 = arith.constant dense<0.000000e+00> : vector<16x192xf32>
    %35 = tpu.matmul %31, %33, %cst_34 {dimension_numbers = #tpu.dot_dimension_numbers<[1], [0], [0], [1], [0, 0, 1, 1], [], []>} : vector<16x96xf32>, vector<96x192xf32>, vector<16x192xf32> -> vector<16x192xf32>
    %36 = arith.addf %26, %34 : vector<16x192xf32>
    %37 = arith.addf %27, %35 : vector<16x192xf32>
    %c0_35 = arith.constant 0 : index
    %c1_36 = arith.constant 1 : index
    %c0_37 = arith.constant 0 : index
    %38 = vector.load %arg1[%c0_35, %c1_36, %c0_37] : memref<2x36x96xf32, #tpu.memory_space<vmem>>, vector<2x8x96xf32>
    %39 = vector.shape_cast %38 : vector<2x8x96xf32> to vector<16x96xf32>
    %c0_38 = arith.constant 0 : index
    %c19 = arith.constant 19 : index
    %c0_39 = arith.constant 0 : index
    %40 = vector.load %arg1[%c0_38, %c19, %c0_39] : memref<2x36x96xf32, #tpu.memory_space<vmem>>, vector<2x8x96xf32>
    %41 = vector.shape_cast %40 : vector<2x8x96xf32> to vector<16x96xf32>
    %c4 = arith.constant 4 : index
    %c0_40 = arith.constant 0 : index
    %c0_41 = arith.constant 0 : index
    %42 = vector.load %arg2[%c4, %c0_40, %c0_41] : memref<5x96x192xf32, #tpu.memory_space<vmem>>, vector<1x96x192xf32>
    %43 = vector.shape_cast %42 : vector<1x96x192xf32> to vector<96x192xf32>
    %cst_42 = arith.constant dense<0.000000e+00> : vector<16x192xf32>
    %44 = tpu.matmul %39, %43, %cst_42 {dimension_numbers = #tpu.dot_dimension_numbers<[1], [0], [0], [1], [0, 0, 1, 1], [], []>} : vector<16x96xf32>, vector<96x192xf32>, vector<16x192xf32> -> vector<16x192xf32>
    %cst_43 = arith.constant dense<0.000000e+00> : vector<16x192xf32>
    %45 = tpu.matmul %41, %43, %cst_43 {dimension_numbers = #tpu.dot_dimension_numbers<[1], [0], [0], [1], [0, 0, 1, 1], [], []>} : vector<16x96xf32>, vector<96x192xf32>, vector<16x192xf32> -> vector<16x192xf32>
    %46 = arith.addf %36, %44 : vector<16x192xf32>
    %47 = arith.addf %37, %45 : vector<16x192xf32>
    %c0_44 = arith.constant 0 : index
    %c0_45 = arith.constant 0 : index
    %48 = vector.load %arg3[%c0_44, %c0_45] : memref<1x192xf32, #tpu.memory_space<vmem>>, vector<1x192xf32>
    %49 = vector.broadcast %48 : vector<1x192xf32> to vector<16x192xf32>
    %50 = arith.addf %46, %49 : vector<16x192xf32>
    %cst_46 = arith.constant 5.000000e-01 : f32
    %51 = vector.broadcast %cst_46 : f32 to vector<16x192xf32>
    %52 = arith.mulf %51, %50 : vector<16x192xf32>
    %53 = math.tanh %52 : vector<16x192xf32>
    %cst_47 = arith.constant 5.000000e-01 : f32
    %54 = vector.broadcast %cst_47 : f32 to vector<16x192xf32>
    %55 = arith.mulf %54, %53 : vector<16x192xf32>
    %cst_48 = arith.constant 5.000000e-01 : f32
    %56 = vector.broadcast %cst_48 : f32 to vector<16x192xf32>
    %57 = arith.addf %55, %56 : vector<16x192xf32>
    %58 = vector.shape_cast %57 : vector<16x192xf32> to vector<2x8x192xf32>
    %c0_49 = arith.constant 0 : index
    %c0_50 = arith.constant 0 : index
    %59 = vector.load %arg3[%c0_49, %c0_50] : memref<1x192xf32, #tpu.memory_space<vmem>>, vector<1x192xf32>
    %60 = vector.broadcast %59 : vector<1x192xf32> to vector<16x192xf32>
    %61 = arith.addf %47, %60 : vector<16x192xf32>
    %cst_51 = arith.constant 5.000000e-01 : f32
    %62 = vector.broadcast %cst_51 : f32 to vector<16x192xf32>
    %63 = arith.mulf %62, %61 : vector<16x192xf32>
    %64 = math.tanh %63 : vector<16x192xf32>
    %cst_52 = arith.constant 5.000000e-01 : f32
    %65 = vector.broadcast %cst_52 : f32 to vector<16x192xf32>
    %66 = arith.mulf %65, %64 : vector<16x192xf32>
    %cst_53 = arith.constant 5.000000e-01 : f32
    %67 = vector.broadcast %cst_53 : f32 to vector<16x192xf32>
    %68 = arith.addf %66, %67 : vector<16x192xf32>
    %69 = vector.shape_cast %68 : vector<16x192xf32> to vector<2x8x192xf32>
    %cst_54 = arith.constant 0.000000e+00 : f32
    %70 = vector.broadcast %cst_54 : f32 to vector<2x1x192xf32>
    %71 = tpu.concatenate %70, %58, %70 in 1 : vector<2x1x192xf32>, vector<2x8x192xf32>, vector<2x1x192xf32> -> vector<2x10x192xf32>
    %72 = tpu.concatenate %70, %69, %70 in 1 : vector<2x1x192xf32>, vector<2x8x192xf32>, vector<2x1x192xf32> -> vector<2x10x192xf32>
    %73 = vector.extract_strided_slice %71 {offsets = [0, 0, 0], sizes = [2, 8, 192], strides = [1, 1, 1]} : vector<2x10x192xf32> to vector<2x8x192xf32>
    %74 = vector.shape_cast %73 : vector<2x8x192xf32> to vector<16x192xf32>
    %c0_55 = arith.constant 0 : index
    %c0_56 = arith.constant 0 : index
    %c0_57 = arith.constant 0 : index
    %75 = vector.load %arg4[%c0_55, %c0_56, %c0_57] : memref<5x192x96xf32, #tpu.memory_space<vmem>>, vector<1x192x96xf32>
    %76 = vector.shape_cast %75 : vector<1x192x96xf32> to vector<192x96xf32>
    %cst_58 = arith.constant dense<0.000000e+00> : vector<16x96xf32>
    %77 = tpu.matmul %74, %76, %cst_58 {dimension_numbers = #tpu.dot_dimension_numbers<[1], [0], [0], [1], [0, 0, 1, 1], [], []>} : vector<16x192xf32>, vector<192x96xf32>, vector<16x96xf32> -> vector<16x96xf32>
    %78 = vector.extract_strided_slice %72 {offsets = [0, 0, 0], sizes = [2, 8, 192], strides = [1, 1, 1]} : vector<2x10x192xf32> to vector<2x8x192xf32>
    %79 = vector.shape_cast %78 : vector<2x8x192xf32> to vector<16x192xf32>
    %c1_59 = arith.constant 1 : index
    %c0_60 = arith.constant 0 : index
    %c0_61 = arith.constant 0 : index
    %80 = vector.load %arg4[%c1_59, %c0_60, %c0_61] : memref<5x192x96xf32, #tpu.memory_space<vmem>>, vector<1x192x96xf32>
    %81 = vector.shape_cast %80 : vector<1x192x96xf32> to vector<192x96xf32>
    %cst_62 = arith.constant dense<0.000000e+00> : vector<16x96xf32>
    %82 = tpu.matmul %79, %81, %cst_62 {dimension_numbers = #tpu.dot_dimension_numbers<[1], [0], [0], [1], [0, 0, 1, 1], [], []>} : vector<16x192xf32>, vector<192x96xf32>, vector<16x96xf32> -> vector<16x96xf32>
    %83 = arith.addf %77, %82 : vector<16x96xf32>
    %84 = vector.extract_strided_slice %71 {offsets = [0, 1, 0], sizes = [2, 8, 192], strides = [1, 1, 1]} : vector<2x10x192xf32> to vector<2x8x192xf32>
    %85 = vector.shape_cast %84 : vector<2x8x192xf32> to vector<16x192xf32>
    %c2_63 = arith.constant 2 : index
    %c0_64 = arith.constant 0 : index
    %c0_65 = arith.constant 0 : index
    %86 = vector.load %arg4[%c2_63, %c0_64, %c0_65] : memref<5x192x96xf32, #tpu.memory_space<vmem>>, vector<1x192x96xf32>
    %87 = vector.shape_cast %86 : vector<1x192x96xf32> to vector<192x96xf32>
    %cst_66 = arith.constant dense<0.000000e+00> : vector<16x96xf32>
    %88 = tpu.matmul %85, %87, %cst_66 {dimension_numbers = #tpu.dot_dimension_numbers<[1], [0], [0], [1], [0, 0, 1, 1], [], []>} : vector<16x192xf32>, vector<192x96xf32>, vector<16x96xf32> -> vector<16x96xf32>
    %89 = arith.addf %83, %88 : vector<16x96xf32>
    %90 = vector.extract_strided_slice %72 {offsets = [0, 1, 0], sizes = [2, 8, 192], strides = [1, 1, 1]} : vector<2x10x192xf32> to vector<2x8x192xf32>
    %91 = vector.shape_cast %90 : vector<2x8x192xf32> to vector<16x192xf32>
    %c3_67 = arith.constant 3 : index
    %c0_68 = arith.constant 0 : index
    %c0_69 = arith.constant 0 : index
    %92 = vector.load %arg4[%c3_67, %c0_68, %c0_69] : memref<5x192x96xf32, #tpu.memory_space<vmem>>, vector<1x192x96xf32>
    %93 = vector.shape_cast %92 : vector<1x192x96xf32> to vector<192x96xf32>
    %cst_70 = arith.constant dense<0.000000e+00> : vector<16x96xf32>
    %94 = tpu.matmul %91, %93, %cst_70 {dimension_numbers = #tpu.dot_dimension_numbers<[1], [0], [0], [1], [0, 0, 1, 1], [], []>} : vector<16x192xf32>, vector<192x96xf32>, vector<16x96xf32> -> vector<16x96xf32>
    %95 = arith.addf %89, %94 : vector<16x96xf32>
    %96 = vector.extract_strided_slice %71 {offsets = [0, 2, 0], sizes = [2, 8, 192], strides = [1, 1, 1]} : vector<2x10x192xf32> to vector<2x8x192xf32>
    %97 = vector.shape_cast %96 : vector<2x8x192xf32> to vector<16x192xf32>
    %c4_71 = arith.constant 4 : index
    %c0_72 = arith.constant 0 : index
    %c0_73 = arith.constant 0 : index
    %98 = vector.load %arg4[%c4_71, %c0_72, %c0_73] : memref<5x192x96xf32, #tpu.memory_space<vmem>>, vector<1x192x96xf32>
    %99 = vector.shape_cast %98 : vector<1x192x96xf32> to vector<192x96xf32>
    %cst_74 = arith.constant dense<0.000000e+00> : vector<16x96xf32>
    %100 = tpu.matmul %97, %99, %cst_74 {dimension_numbers = #tpu.dot_dimension_numbers<[1], [0], [0], [1], [0, 0, 1, 1], [], []>} : vector<16x192xf32>, vector<192x96xf32>, vector<16x96xf32> -> vector<16x96xf32>
    %101 = arith.addf %95, %100 : vector<16x96xf32>
    %c0_75 = arith.constant 0 : index
    %c0_76 = arith.constant 0 : index
    %102 = vector.load %arg5[%c0_75, %c0_76] : memref<1x96xf32, #tpu.memory_space<vmem>>, vector<1x96xf32>
    %103 = vector.broadcast %102 : vector<1x96xf32> to vector<16x96xf32>
    %104 = arith.addf %101, %103 : vector<16x96xf32>
    %cst_77 = arith.constant 5.000000e-01 : f32
    %105 = vector.broadcast %cst_77 : f32 to vector<16x96xf32>
    %106 = arith.mulf %105, %104 : vector<16x96xf32>
    %107 = math.tanh %106 : vector<16x96xf32>
    %cst_78 = arith.constant 5.000000e-01 : f32
    %108 = vector.broadcast %cst_78 : f32 to vector<16x96xf32>
    %109 = arith.mulf %108, %107 : vector<16x96xf32>
    %cst_79 = arith.constant 5.000000e-01 : f32
    %110 = vector.broadcast %cst_79 : f32 to vector<16x96xf32>
    %111 = arith.addf %109, %110 : vector<16x96xf32>
    %112 = vector.shape_cast %111 : vector<16x96xf32> to vector<2x8x96xf32>
    %cst_80 = arith.constant 0.000000e+00 : f32
    %113 = vector.broadcast %cst_80 : f32 to vector<2x2x96xf32>
    %114 = tpu.concatenate %113, %112, %113 in 1 : vector<2x2x96xf32>, vector<2x8x96xf32>, vector<2x2x96xf32> -> vector<2x12x96xf32>
    %115 = vector.extract_strided_slice %114 {offsets = [0, 0, 0], sizes = [2, 8, 96], strides = [1, 1, 1]} : vector<2x12x96xf32> to vector<2x8x96xf32>
    %116 = vector.shape_cast %115 : vector<2x8x96xf32> to vector<16x96xf32>
    %c0_81 = arith.constant 0 : index
    %c0_82 = arith.constant 0 : index
    %c0_83 = arith.constant 0 : index
    %117 = vector.load %arg6[%c0_81, %c0_82, %c0_83] : memref<5x96x96xf32, #tpu.memory_space<vmem>>, vector<1x96x96xf32>
    %118 = vector.shape_cast %117 : vector<1x96x96xf32> to vector<96x96xf32>
    %cst_84 = arith.constant dense<0.000000e+00> : vector<16x96xf32>
    %119 = tpu.matmul %116, %118, %cst_84 {dimension_numbers = #tpu.dot_dimension_numbers<[1], [0], [0], [1], [0, 0, 1, 1], [], []>} : vector<16x96xf32>, vector<96x96xf32>, vector<16x96xf32> -> vector<16x96xf32>
    %120 = vector.extract_strided_slice %114 {offsets = [0, 1, 0], sizes = [2, 8, 96], strides = [1, 1, 1]} : vector<2x12x96xf32> to vector<2x8x96xf32>
    %121 = vector.shape_cast %120 : vector<2x8x96xf32> to vector<16x96xf32>
    %c1_85 = arith.constant 1 : index
    %c0_86 = arith.constant 0 : index
    %c0_87 = arith.constant 0 : index
    %122 = vector.load %arg6[%c1_85, %c0_86, %c0_87] : memref<5x96x96xf32, #tpu.memory_space<vmem>>, vector<1x96x96xf32>
    %123 = vector.shape_cast %122 : vector<1x96x96xf32> to vector<96x96xf32>
    %cst_88 = arith.constant dense<0.000000e+00> : vector<16x96xf32>
    %124 = tpu.matmul %121, %123, %cst_88 {dimension_numbers = #tpu.dot_dimension_numbers<[1], [0], [0], [1], [0, 0, 1, 1], [], []>} : vector<16x96xf32>, vector<96x96xf32>, vector<16x96xf32> -> vector<16x96xf32>
    %125 = arith.addf %119, %124 : vector<16x96xf32>
    %126 = vector.extract_strided_slice %114 {offsets = [0, 2, 0], sizes = [2, 8, 96], strides = [1, 1, 1]} : vector<2x12x96xf32> to vector<2x8x96xf32>
    %127 = vector.shape_cast %126 : vector<2x8x96xf32> to vector<16x96xf32>
    %c2_89 = arith.constant 2 : index
    %c0_90 = arith.constant 0 : index
    %c0_91 = arith.constant 0 : index
    %128 = vector.load %arg6[%c2_89, %c0_90, %c0_91] : memref<5x96x96xf32, #tpu.memory_space<vmem>>, vector<1x96x96xf32>
    %129 = vector.shape_cast %128 : vector<1x96x96xf32> to vector<96x96xf32>
    %cst_92 = arith.constant dense<0.000000e+00> : vector<16x96xf32>
    %130 = tpu.matmul %127, %129, %cst_92 {dimension_numbers = #tpu.dot_dimension_numbers<[1], [0], [0], [1], [0, 0, 1, 1], [], []>} : vector<16x96xf32>, vector<96x96xf32>, vector<16x96xf32> -> vector<16x96xf32>
    %131 = arith.addf %125, %130 : vector<16x96xf32>
    %132 = vector.extract_strided_slice %114 {offsets = [0, 3, 0], sizes = [2, 8, 96], strides = [1, 1, 1]} : vector<2x12x96xf32> to vector<2x8x96xf32>
    %133 = vector.shape_cast %132 : vector<2x8x96xf32> to vector<16x96xf32>
    %c3_93 = arith.constant 3 : index
    %c0_94 = arith.constant 0 : index
    %c0_95 = arith.constant 0 : index
    %134 = vector.load %arg6[%c3_93, %c0_94, %c0_95] : memref<5x96x96xf32, #tpu.memory_space<vmem>>, vector<1x96x96xf32>
    %135 = vector.shape_cast %134 : vector<1x96x96xf32> to vector<96x96xf32>
    %cst_96 = arith.constant dense<0.000000e+00> : vector<16x96xf32>
    %136 = tpu.matmul %133, %135, %cst_96 {dimension_numbers = #tpu.dot_dimension_numbers<[1], [0], [0], [1], [0, 0, 1, 1], [], []>} : vector<16x96xf32>, vector<96x96xf32>, vector<16x96xf32> -> vector<16x96xf32>
    %137 = arith.addf %131, %136 : vector<16x96xf32>
    %138 = vector.extract_strided_slice %114 {offsets = [0, 4, 0], sizes = [2, 8, 96], strides = [1, 1, 1]} : vector<2x12x96xf32> to vector<2x8x96xf32>
    %139 = vector.shape_cast %138 : vector<2x8x96xf32> to vector<16x96xf32>
    %c4_97 = arith.constant 4 : index
    %c0_98 = arith.constant 0 : index
    %c0_99 = arith.constant 0 : index
    %140 = vector.load %arg6[%c4_97, %c0_98, %c0_99] : memref<5x96x96xf32, #tpu.memory_space<vmem>>, vector<1x96x96xf32>
    %141 = vector.shape_cast %140 : vector<1x96x96xf32> to vector<96x96xf32>
    %cst_100 = arith.constant dense<0.000000e+00> : vector<16x96xf32>
    %142 = tpu.matmul %139, %141, %cst_100 {dimension_numbers = #tpu.dot_dimension_numbers<[1], [0], [0], [1], [0, 0, 1, 1], [], []>} : vector<16x96xf32>, vector<96x96xf32>, vector<16x96xf32> -> vector<16x96xf32>
    %143 = arith.addf %137, %142 : vector<16x96xf32>
    %c0_101 = arith.constant 0 : index
    %c0_102 = arith.constant 0 : index
    %144 = vector.load %arg7[%c0_101, %c0_102] : memref<1x96xf32, #tpu.memory_space<vmem>>, vector<1x96xf32>
    %145 = vector.broadcast %144 : vector<1x96xf32> to vector<16x96xf32>
    %146 = arith.addf %143, %145 : vector<16x96xf32>
    %cst_103 = arith.constant 5.000000e-01 : f32
    %147 = vector.broadcast %cst_103 : f32 to vector<16x96xf32>
    %148 = arith.mulf %147, %146 : vector<16x96xf32>
    %149 = math.tanh %148 : vector<16x96xf32>
    %cst_104 = arith.constant 5.000000e-01 : f32
    %150 = vector.broadcast %cst_104 : f32 to vector<16x96xf32>
    %151 = arith.mulf %150, %149 : vector<16x96xf32>
    %cst_105 = arith.constant 5.000000e-01 : f32
    %152 = vector.broadcast %cst_105 : f32 to vector<16x96xf32>
    %153 = arith.addf %151, %152 : vector<16x96xf32>
    %154 = vector.shape_cast %153 : vector<16x96xf32> to vector<2x8x96xf32>
    %cst_106 = arith.constant 0.000000e+00 : f32
    %155 = vector.broadcast %cst_106 : f32 to vector<2x2x96xf32>
    %156 = tpu.concatenate %155, %154, %155 in 1 : vector<2x2x96xf32>, vector<2x8x96xf32>, vector<2x2x96xf32> -> vector<2x12x96xf32>
    %157 = vector.extract_strided_slice %156 {offsets = [0, 0, 0], sizes = [2, 8, 96], strides = [1, 1, 1]} : vector<2x12x96xf32> to vector<2x8x96xf32>
    %158 = vector.shape_cast %157 : vector<2x8x96xf32> to vector<16x96xf32>
    %c0_107 = arith.constant 0 : index
    %c0_108 = arith.constant 0 : index
    %c0_109 = arith.constant 0 : index
    %159 = vector.load %arg8[%c0_107, %c0_108, %c0_109] : memref<5x96x96xf32, #tpu.memory_space<vmem>>, vector<1x96x96xf32>
    %160 = vector.shape_cast %159 : vector<1x96x96xf32> to vector<96x96xf32>
    %cst_110 = arith.constant dense<0.000000e+00> : vector<16x96xf32>
    %161 = tpu.matmul %158, %160, %cst_110 {dimension_numbers = #tpu.dot_dimension_numbers<[1], [0], [0], [1], [0, 0, 1, 1], [], []>} : vector<16x96xf32>, vector<96x96xf32>, vector<16x96xf32> -> vector<16x96xf32>
    %162 = vector.extract_strided_slice %156 {offsets = [0, 1, 0], sizes = [2, 8, 96], strides = [1, 1, 1]} : vector<2x12x96xf32> to vector<2x8x96xf32>
    %163 = vector.shape_cast %162 : vector<2x8x96xf32> to vector<16x96xf32>
    %c1_111 = arith.constant 1 : index
    %c0_112 = arith.constant 0 : index
    %c0_113 = arith.constant 0 : index
    %164 = vector.load %arg8[%c1_111, %c0_112, %c0_113] : memref<5x96x96xf32, #tpu.memory_space<vmem>>, vector<1x96x96xf32>
    %165 = vector.shape_cast %164 : vector<1x96x96xf32> to vector<96x96xf32>
    %cst_114 = arith.constant dense<0.000000e+00> : vector<16x96xf32>
    %166 = tpu.matmul %163, %165, %cst_114 {dimension_numbers = #tpu.dot_dimension_numbers<[1], [0], [0], [1], [0, 0, 1, 1], [], []>} : vector<16x96xf32>, vector<96x96xf32>, vector<16x96xf32> -> vector<16x96xf32>
    %167 = arith.addf %161, %166 : vector<16x96xf32>
    %168 = vector.extract_strided_slice %156 {offsets = [0, 2, 0], sizes = [2, 8, 96], strides = [1, 1, 1]} : vector<2x12x96xf32> to vector<2x8x96xf32>
    %169 = vector.shape_cast %168 : vector<2x8x96xf32> to vector<16x96xf32>
    %c2_115 = arith.constant 2 : index
    %c0_116 = arith.constant 0 : index
    %c0_117 = arith.constant 0 : index
    %170 = vector.load %arg8[%c2_115, %c0_116, %c0_117] : memref<5x96x96xf32, #tpu.memory_space<vmem>>, vector<1x96x96xf32>
    %171 = vector.shape_cast %170 : vector<1x96x96xf32> to vector<96x96xf32>
    %cst_118 = arith.constant dense<0.000000e+00> : vector<16x96xf32>
    %172 = tpu.matmul %169, %171, %cst_118 {dimension_numbers = #tpu.dot_dimension_numbers<[1], [0], [0], [1], [0, 0, 1, 1], [], []>} : vector<16x96xf32>, vector<96x96xf32>, vector<16x96xf32> -> vector<16x96xf32>
    %173 = arith.addf %167, %172 : vector<16x96xf32>
    %174 = vector.extract_strided_slice %156 {offsets = [0, 3, 0], sizes = [2, 8, 96], strides = [1, 1, 1]} : vector<2x12x96xf32> to vector<2x8x96xf32>
    %175 = vector.shape_cast %174 : vector<2x8x96xf32> to vector<16x96xf32>
    %c3_119 = arith.constant 3 : index
    %c0_120 = arith.constant 0 : index
    %c0_121 = arith.constant 0 : index
    %176 = vector.load %arg8[%c3_119, %c0_120, %c0_121] : memref<5x96x96xf32, #tpu.memory_space<vmem>>, vector<1x96x96xf32>
    %177 = vector.shape_cast %176 : vector<1x96x96xf32> to vector<96x96xf32>
    %cst_122 = arith.constant dense<0.000000e+00> : vector<16x96xf32>
    %178 = tpu.matmul %175, %177, %cst_122 {dimension_numbers = #tpu.dot_dimension_numbers<[1], [0], [0], [1], [0, 0, 1, 1], [], []>} : vector<16x96xf32>, vector<96x96xf32>, vector<16x96xf32> -> vector<16x96xf32>
    %179 = arith.addf %173, %178 : vector<16x96xf32>
    %180 = vector.extract_strided_slice %156 {offsets = [0, 4, 0], sizes = [2, 8, 96], strides = [1, 1, 1]} : vector<2x12x96xf32> to vector<2x8x96xf32>
    %181 = vector.shape_cast %180 : vector<2x8x96xf32> to vector<16x96xf32>
    %c4_123 = arith.constant 4 : index
    %c0_124 = arith.constant 0 : index
    %c0_125 = arith.constant 0 : index
    %182 = vector.load %arg8[%c4_123, %c0_124, %c0_125] : memref<5x96x96xf32, #tpu.memory_space<vmem>>, vector<1x96x96xf32>
    %183 = vector.shape_cast %182 : vector<1x96x96xf32> to vector<96x96xf32>
    %cst_126 = arith.constant dense<0.000000e+00> : vector<16x96xf32>
    %184 = tpu.matmul %181, %183, %cst_126 {dimension_numbers = #tpu.dot_dimension_numbers<[1], [0], [0], [1], [0, 0, 1, 1], [], []>} : vector<16x96xf32>, vector<96x96xf32>, vector<16x96xf32> -> vector<16x96xf32>
    %185 = arith.addf %179, %184 : vector<16x96xf32>
    %c0_127 = arith.constant 0 : index
    %c0_128 = arith.constant 0 : index
    %186 = vector.load %arg9[%c0_127, %c0_128] : memref<1x96xf32, #tpu.memory_space<vmem>>, vector<1x96xf32>
    %187 = vector.broadcast %186 : vector<1x96xf32> to vector<16x96xf32>
    %188 = arith.addf %185, %187 : vector<16x96xf32>
    %cst_129 = arith.constant 5.000000e-01 : f32
    %189 = vector.broadcast %cst_129 : f32 to vector<16x96xf32>
    %190 = arith.mulf %189, %188 : vector<16x96xf32>
    %191 = math.tanh %190 : vector<16x96xf32>
    %cst_130 = arith.constant 5.000000e-01 : f32
    %192 = vector.broadcast %cst_130 : f32 to vector<16x96xf32>
    %193 = arith.mulf %192, %191 : vector<16x96xf32>
    %cst_131 = arith.constant 5.000000e-01 : f32
    %194 = vector.broadcast %cst_131 : f32 to vector<16x96xf32>
    %195 = arith.addf %193, %194 : vector<16x96xf32>
    %196 = vector.shape_cast %195 : vector<16x96xf32> to vector<2x8x96xf32>
    %197 = vector.extract_strided_slice %196 {offsets = [0, 0, 0], sizes = [2, 1, 96], strides = [1, 1, 1]} : vector<2x8x96xf32> to vector<2x1x96xf32>
    %198 = vector.shape_cast %197 : vector<2x1x96xf32> to vector<2x96xf32>
    %c0_132 = arith.constant 0 : index
    %c0_133 = arith.constant 0 : index
    %c0_134 = arith.constant 0 : index
    %199 = vector.load %arg10[%c0_132, %c0_133, %c0_134] : memref<8x96x128xf32, #tpu.memory_space<vmem>>, vector<1x96x128xf32>
    %200 = vector.shape_cast %199 : vector<1x96x128xf32> to vector<96x128xf32>
    %cst_135 = arith.constant dense<0.000000e+00> : vector<2x128xf32>
    %201 = tpu.matmul %198, %200, %cst_135 {dimension_numbers = #tpu.dot_dimension_numbers<[1], [0], [0], [1], [0, 0, 1, 1], [], []>} : vector<2x96xf32>, vector<96x128xf32>, vector<2x128xf32> -> vector<2x128xf32>
    %202 = vector.extract_strided_slice %196 {offsets = [0, 1, 0], sizes = [2, 1, 96], strides = [1, 1, 1]} : vector<2x8x96xf32> to vector<2x1x96xf32>
    %203 = vector.shape_cast %202 : vector<2x1x96xf32> to vector<2x96xf32>
    %c1_136 = arith.constant 1 : index
    %c0_137 = arith.constant 0 : index
    %c0_138 = arith.constant 0 : index
    %204 = vector.load %arg10[%c1_136, %c0_137, %c0_138] : memref<8x96x128xf32, #tpu.memory_space<vmem>>, vector<1x96x128xf32>
    %205 = vector.shape_cast %204 : vector<1x96x128xf32> to vector<96x128xf32>
    %cst_139 = arith.constant dense<0.000000e+00> : vector<2x128xf32>
    %206 = tpu.matmul %203, %205, %cst_139 {dimension_numbers = #tpu.dot_dimension_numbers<[1], [0], [0], [1], [0, 0, 1, 1], [], []>} : vector<2x96xf32>, vector<96x128xf32>, vector<2x128xf32> -> vector<2x128xf32>
    %207 = arith.addf %201, %206 : vector<2x128xf32>
    %208 = vector.extract_strided_slice %196 {offsets = [0, 2, 0], sizes = [2, 1, 96], strides = [1, 1, 1]} : vector<2x8x96xf32> to vector<2x1x96xf32>
    %209 = vector.shape_cast %208 : vector<2x1x96xf32> to vector<2x96xf32>
    %c2_140 = arith.constant 2 : index
    %c0_141 = arith.constant 0 : index
    %c0_142 = arith.constant 0 : index
    %210 = vector.load %arg10[%c2_140, %c0_141, %c0_142] : memref<8x96x128xf32, #tpu.memory_space<vmem>>, vector<1x96x128xf32>
    %211 = vector.shape_cast %210 : vector<1x96x128xf32> to vector<96x128xf32>
    %cst_143 = arith.constant dense<0.000000e+00> : vector<2x128xf32>
    %212 = tpu.matmul %209, %211, %cst_143 {dimension_numbers = #tpu.dot_dimension_numbers<[1], [0], [0], [1], [0, 0, 1, 1], [], []>} : vector<2x96xf32>, vector<96x128xf32>, vector<2x128xf32> -> vector<2x128xf32>
    %213 = arith.addf %207, %212 : vector<2x128xf32>
    %214 = vector.extract_strided_slice %196 {offsets = [0, 3, 0], sizes = [2, 1, 96], strides = [1, 1, 1]} : vector<2x8x96xf32> to vector<2x1x96xf32>
    %215 = vector.shape_cast %214 : vector<2x1x96xf32> to vector<2x96xf32>
    %c3_144 = arith.constant 3 : index
    %c0_145 = arith.constant 0 : index
    %c0_146 = arith.constant 0 : index
    %216 = vector.load %arg10[%c3_144, %c0_145, %c0_146] : memref<8x96x128xf32, #tpu.memory_space<vmem>>, vector<1x96x128xf32>
    %217 = vector.shape_cast %216 : vector<1x96x128xf32> to vector<96x128xf32>
    %cst_147 = arith.constant dense<0.000000e+00> : vector<2x128xf32>
    %218 = tpu.matmul %215, %217, %cst_147 {dimension_numbers = #tpu.dot_dimension_numbers<[1], [0], [0], [1], [0, 0, 1, 1], [], []>} : vector<2x96xf32>, vector<96x128xf32>, vector<2x128xf32> -> vector<2x128xf32>
    %219 = arith.addf %213, %218 : vector<2x128xf32>
    %220 = vector.extract_strided_slice %196 {offsets = [0, 4, 0], sizes = [2, 1, 96], strides = [1, 1, 1]} : vector<2x8x96xf32> to vector<2x1x96xf32>
    %221 = vector.shape_cast %220 : vector<2x1x96xf32> to vector<2x96xf32>
    %c4_148 = arith.constant 4 : index
    %c0_149 = arith.constant 0 : index
    %c0_150 = arith.constant 0 : index
    %222 = vector.load %arg10[%c4_148, %c0_149, %c0_150] : memref<8x96x128xf32, #tpu.memory_space<vmem>>, vector<1x96x128xf32>
    %223 = vector.shape_cast %222 : vector<1x96x128xf32> to vector<96x128xf32>
    %cst_151 = arith.constant dense<0.000000e+00> : vector<2x128xf32>
    %224 = tpu.matmul %221, %223, %cst_151 {dimension_numbers = #tpu.dot_dimension_numbers<[1], [0], [0], [1], [0, 0, 1, 1], [], []>} : vector<2x96xf32>, vector<96x128xf32>, vector<2x128xf32> -> vector<2x128xf32>
    %225 = arith.addf %219, %224 : vector<2x128xf32>
    %226 = vector.extract_strided_slice %196 {offsets = [0, 5, 0], sizes = [2, 1, 96], strides = [1, 1, 1]} : vector<2x8x96xf32> to vector<2x1x96xf32>
    %227 = vector.shape_cast %226 : vector<2x1x96xf32> to vector<2x96xf32>
    %c5 = arith.constant 5 : index
    %c0_152 = arith.constant 0 : index
    %c0_153 = arith.constant 0 : index
    %228 = vector.load %arg10[%c5, %c0_152, %c0_153] : memref<8x96x128xf32, #tpu.memory_space<vmem>>, vector<1x96x128xf32>
    %229 = vector.shape_cast %228 : vector<1x96x128xf32> to vector<96x128xf32>
    %cst_154 = arith.constant dense<0.000000e+00> : vector<2x128xf32>
    %230 = tpu.matmul %227, %229, %cst_154 {dimension_numbers = #tpu.dot_dimension_numbers<[1], [0], [0], [1], [0, 0, 1, 1], [], []>} : vector<2x96xf32>, vector<96x128xf32>, vector<2x128xf32> -> vector<2x128xf32>
    %231 = arith.addf %225, %230 : vector<2x128xf32>
    %232 = vector.extract_strided_slice %196 {offsets = [0, 6, 0], sizes = [2, 1, 96], strides = [1, 1, 1]} : vector<2x8x96xf32> to vector<2x1x96xf32>
    %233 = vector.shape_cast %232 : vector<2x1x96xf32> to vector<2x96xf32>
    %c6 = arith.constant 6 : index
    %c0_155 = arith.constant 0 : index
    %c0_156 = arith.constant 0 : index
    %234 = vector.load %arg10[%c6, %c0_155, %c0_156] : memref<8x96x128xf32, #tpu.memory_space<vmem>>, vector<1x96x128xf32>
    %235 = vector.shape_cast %234 : vector<1x96x128xf32> to vector<96x128xf32>
    %cst_157 = arith.constant dense<0.000000e+00> : vector<2x128xf32>
    %236 = tpu.matmul %233, %235, %cst_157 {dimension_numbers = #tpu.dot_dimension_numbers<[1], [0], [0], [1], [0, 0, 1, 1], [], []>} : vector<2x96xf32>, vector<96x128xf32>, vector<2x128xf32> -> vector<2x128xf32>
    %237 = arith.addf %231, %236 : vector<2x128xf32>
    %238 = vector.extract_strided_slice %196 {offsets = [0, 7, 0], sizes = [2, 1, 96], strides = [1, 1, 1]} : vector<2x8x96xf32> to vector<2x1x96xf32>
    %239 = vector.shape_cast %238 : vector<2x1x96xf32> to vector<2x96xf32>
    %c7 = arith.constant 7 : index
    %c0_158 = arith.constant 0 : index
    %c0_159 = arith.constant 0 : index
    %240 = vector.load %arg10[%c7, %c0_158, %c0_159] : memref<8x96x128xf32, #tpu.memory_space<vmem>>, vector<1x96x128xf32>
    %241 = vector.shape_cast %240 : vector<1x96x128xf32> to vector<96x128xf32>
    %cst_160 = arith.constant dense<0.000000e+00> : vector<2x128xf32>
    %242 = tpu.matmul %239, %241, %cst_160 {dimension_numbers = #tpu.dot_dimension_numbers<[1], [0], [0], [1], [0, 0, 1, 1], [], []>} : vector<2x96xf32>, vector<96x128xf32>, vector<2x128xf32> -> vector<2x128xf32>
    %243 = arith.addf %237, %242 : vector<2x128xf32>
    %c0_161 = arith.constant 0 : index
    %c0_162 = arith.constant 0 : index
    %244 = vector.load %arg11[%c0_161, %c0_162] : memref<1x128xf32, #tpu.memory_space<vmem>>, vector<1x128xf32>
    %245 = vector.broadcast %244 : vector<1x128xf32> to vector<2x128xf32>
    %246 = arith.addf %243, %245 : vector<2x128xf32>
    %c0_163 = arith.constant 0 : index
    %c0_164 = arith.constant 0 : index
    %247 = vector.load %arg12[%c0_163, %c0_164] : memref<2x128xf32, #tpu.memory_space<vmem>>, vector<2x128xf32>
    tpu.vector_store %arg12[%c0_163, %c0_164], %246 {strides = array<i32>} : memref<2x128xf32, #tpu.memory_space<vmem>>, vector<2x128xf32>,
    return
  }
  func.func @transform_0(%arg0: i32) -> (i32, i32, i32) {
    %c0_i32 = arith.constant 0 : i32
    %c0_i32_0 = arith.constant 0 : i32
    %c0_i32_1 = arith.constant 0 : i32
    return %arg0, %c0_i32, %c0_i32_0 : i32, i32, i32
  }
  func.func @transform_1(%arg0: i32) -> (i32, i32, i32) {
    %c0_i32 = arith.constant 0 : i32
    %c0_i32_0 = arith.constant 0 : i32
    %c0_i32_1 = arith.constant 0 : i32
    %c0_i32_2 = arith.constant 0 : i32
    return %c0_i32, %c0_i32_0, %c0_i32_1 : i32, i32, i32
  }
  func.func @transform_2(%arg0: i32) -> (i32, i32) {
    %c0_i32 = arith.constant 0 : i32
    %c0_i32_0 = arith.constant 0 : i32
    %c0_i32_1 = arith.constant 0 : i32
    return %c0_i32, %c0_i32_0 : i32, i32
  }
  func.func @transform_3(%arg0: i32) -> (i32, i32, i32) {
    %c0_i32 = arith.constant 0 : i32
    %c0_i32_0 = arith.constant 0 : i32
    %c0_i32_1 = arith.constant 0 : i32
    %c0_i32_2 = arith.constant 0 : i32
    return %c0_i32, %c0_i32_0, %c0_i32_1 : i32, i32, i32
  }
  func.func @transform_4(%arg0: i32) -> (i32, i32) {
    %c0_i32 = arith.constant 0 : i32
    %c0_i32_0 = arith.constant 0 : i32
    %c0_i32_1 = arith.constant 0 : i32
    return %c0_i32, %c0_i32_0 : i32, i32
  }
  func.func @transform_5(%arg0: i32) -> (i32, i32, i32) {
    %c0_i32 = arith.constant 0 : i32
    %c0_i32_0 = arith.constant 0 : i32
    %c0_i32_1 = arith.constant 0 : i32
    %c0_i32_2 = arith.constant 0 : i32
    return %c0_i32, %c0_i32_0, %c0_i32_1 : i32, i32, i32
  }
  func.func @transform_6(%arg0: i32) -> (i32, i32) {
    %c0_i32 = arith.constant 0 : i32
    %c0_i32_0 = arith.constant 0 : i32
    %c0_i32_1 = arith.constant 0 : i32
    return %c0_i32, %c0_i32_0 : i32, i32
  }
  func.func @transform_7(%arg0: i32) -> (i32, i32, i32) {
    %c0_i32 = arith.constant 0 : i32
    %c0_i32_0 = arith.constant 0 : i32
    %c0_i32_1 = arith.constant 0 : i32
    %c0_i32_2 = arith.constant 0 : i32
    return %c0_i32, %c0_i32_0, %c0_i32_1 : i32, i32, i32
  }
  func.func @transform_8(%arg0: i32) -> (i32, i32) {
    %c0_i32 = arith.constant 0 : i32
    %c0_i32_0 = arith.constant 0 : i32
    %c0_i32_1 = arith.constant 0 : i32
    return %c0_i32, %c0_i32_0 : i32, i32
  }
  func.func @transform_9(%arg0: i32) -> (i32, i32, i32) {
    %c0_i32 = arith.constant 0 : i32
    %c0_i32_0 = arith.constant 0 : i32
    %c0_i32_1 = arith.constant 0 : i32
    %c0_i32_2 = arith.constant 0 : i32
    return %c0_i32, %c0_i32_0, %c0_i32_1 : i32, i32, i32
  }
  func.func @transform_10(%arg0: i32) -> (i32, i32) {
    %c0_i32 = arith.constant 0 : i32
    %c0_i32_0 = arith.constant 0 : i32
    %c0_i32_1 = arith.constant 0 : i32
    return %c0_i32, %c0_i32_0 : i32, i32
  }
  func.func @transform_11(%arg0: i32) -> (i32, i32) {
    %c0_i32 = arith.constant 0 : i32
    %c0_i32_0 = arith.constant 0 : i32
    return %arg0, %c0_i32 : i32, i32
  }
}

</mosaic_0001>

<bundles_post_ra>
// kernel: tile.23
= control target key start
LH: loop header
LB: loop body
LE: loop exit
PB: predicated region body
PF: predicated region fallthrough
CT: control target
= control target key end

     0   :  { %s28_s0 = inlined_call_operand.vmem [shape: f32[12], index: 0, kind: input, shape index: {}]   ;;  %s29_s1 = inlined_call_operand.vmem [shape: f32[16,12], index: 1, kind: output, shape index: {}]  }
   0x1   :  { %v4_v0 = vld [vmem:[%s28_s0] ss:$0 sm:$0xff] }
   0x2   :  { %5 = vst [vmem:[%s29_s1] sm:$0xff] %v4_v0  ;;  %8 = vst [vmem:[%s29_s1 + $0x8] sm:$0xff] %v4_v0 }

// kernel: tile.24
= control target key start
LH: loop header
LB: loop body
LE: loop exit
PB: predicated region body
PF: predicated region fallthrough
CT: control target
= control target key end

     0   :  { %vm9_vm0 = vcmask 64512   ;;  %s150_s12 = smov 120   ;;  %s151_s13 = smov 96   ;;  %vm3_vm1 = vcmask 97280   ;;  %vm13_vm2 = vcmask 31744   ;;  %vm16_vm3 = vcmask 1048512   ;;  %s232_s0 = inlined_call_operand.vmem [shape: f32[16,12], index: 0, kind: input, shape index: {}]   ;;  %s233_s1 = inlined_call_operand.vmem [shape: f32[1,192], index: 1, kind: output, shape index: {}]  }
   0x1   :  { %v118_v0 = vld [vmem:[%s232_s0 + $0xa] sm:$0x1]   ;;  %v121_v3 = vld [vmem:[%s232_s0 + $0x8] sm:$0x1]   ;;  %v120_v4 = vld [vmem:[%s232_s0 + $0x9] sm:$0x1]  }
   0x2   :  { %v119_v1 = vld [vmem:[%s232_s0 + $0xa] sm:$0x1]   ;;  %26 = vrot.lane.b32.xlu1 %v121_v3, %s151_s13  ;;  %v122_v5 = vld [vmem:[%s232_s0 + $0x7] sm:$0x1]   ;;  %s152_s18 = smov 108   ;;  %s153_s19 = smov 84  }
   0x3   :  { %v10_v2 = vsel %vm9_vm0, %v119_v1, %v118_v0  ;;  %v123_v6 = vld [vmem:[%s232_s0 + $0x6] sm:$0x1]   ;;  %v124_v7 = vld [vmem:[%s232_s0 + $0x5] sm:$0x1]   ;;  %v2_v8 = vld [vmem:[%s232_s0] sm:$0x1]  }
   0x4   :  { %11 = vrot.lane.b32.xlu0 %v10_v2, %s150_s12  ;;  %4 = vst.msk [vmem:[#allocation0] sm:$0x1] %vm3_vm1, %v2_v8   ;;  %s154_s26 = smov 72   ;;  %s155_s27 = smov 60   ;;  %v125_v9 = vld [vmem:[%s232_s0 + $0xf] sm:$0x1]  }
   0x5   :  { %v126_v10 = vld [vmem:[%s232_s0 + $0x4] sm:$0x1]   ;;  %s156_s3 = smov 52   ;;  %s157_s4 = smov 48   ;;  %v127_v11 = vld [vmem:[%s232_s0 + $0xe] sm:$0x1]  }
   0x6   :  { %32 = vrot.lane.b32.xlu1 %v122_v5, %s153_s19  ;;  %v128_v12 = vld [vmem:[%s232_s0 + $0x3] sm:$0x1]   ;;  %s158_s9 = smov 40   ;;  %s159_s10 = smov 36   ;;  %v129_v13 = vld [vmem:[%s232_s0 + $0xd] sm:$0x1]  }
   0x7   :  { %v130_v14 = vld [vmem:[%s232_s0 + $0x2] sm:$0x1]   ;;  %s160_s15 = smov 28   ;;  %s161_s16 = smov 24   ;;  %v131_v15 = vld [vmem:[%s232_s0 + $0xc] sm:$0x1]  }
   0x8   :  { %20 = vrot.lane.b32.xlu0 %v120_v4, %s152_s18  ;;  %v132_v16 = vld [vmem:[%s232_s0 + $0x1] sm:$0x1]   ;;  %s162_s21 = smov 16   ;;  %s163_s22 = smov 12   ;;  %v133_v17 = vld [vmem:[%s232_s0 + $0xb] sm:$0x1]  }
   0x9   :  { %s164_s0 = smov 4   ;;  %vm22_vm4 = vcmask 982880   ;;  %vm28_vm5 = vcmask 884480   ;;  %vm34_vm6 = vcmask 786080   ;;  %vm40_vm7 = vcmask 687680  }
   0xa   :  { %44 = vrot.lane.b32.xlu1 %v124_v7, %s155_s27  ;;  %vm46_vm8 = vcmask 589280   ;;  %vm52_vm9 = vcmask 523680   ;;  %vm59_vm10 = vcmask 490880   ;;  %vm65_vm11 = vcmask 425280  }
   0xb   :  { %vm72_vm12 = vcmask 392480   ;;  %vm78_vm13 = vcmask 326880   ;;  %vm85_vm14 = vcmask 294080   ;;  %vm91_vm15 = vcmask 228480  }
   0xc   :  { %38 = vrot.lane.b32.xlu0 %v123_v6, %s154_s26  ;;  %vm98_vm0 = vcmask 195680   ;;  %vm104_vm1 = vcmask 130080  }
   0xe   :  { %57 = vrot.lane.b32.xlu1 %v126_v10, %s157_s4 }
  0x10   :  { %50 = vrot.lane.b32.xlu0 %v125_v9, %s156_s3 }
  0x12   :  { %70 = vrot.lane.b32.xlu1 %v128_v12, %s159_s10 }
  0x14   :  { %63 = vrot.lane.b32.xlu0 %v127_v11, %s158_s9 }
  0x16   :  { %83 = vrot.lane.b32.xlu1 %v130_v14, %s161_s16 }
  0x18   :  { %76 = vrot.lane.b32.xlu0 %v129_v13, %s160_s15 }
  0x1a   :  { %96 = vrot.lane.b32.xlu1 %v132_v16, %s163_s22 }
  0x1c   :  { %89 = vrot.lane.b32.xlu0 %v131_v15, %s162_s21 }
  0x20   :  { %102 = vrot.lane.b32.xlu0 %v133_v17, %s164_s0 }
  0x74   :  { %v27_v19 = vpop.permute.xlu1 %26  }
  0x76   :  { %v12_v18 = vpop.permute.xlu0 %11  }
  0x77   :  { %15 = vst.msk [vmem:[#allocation0 + $0x8] sm:$0x1] %vm13_vm2, %v12_v18  }
  0x78   :  { %17 = vst.msk [vmem:[#allocation0] sm:$0x1] %vm16_vm3, %v12_v18   ;;  %v33_v21 = vpop.permute.xlu1 %32  }
  0x7a   :  { %v21_v20 = vpop.permute.xlu0 %20  }
  0x7b   :  { %23 = vst.msk [vmem:[#allocation0] sm:$0x1] %vm22_vm4, %v21_v20  }
  0x7c   :  { %29 = vst.msk [vmem:[#allocation0] sm:$0x1] %vm28_vm5, %v27_v19   ;;  %v45_v23 = vpop.permute.xlu1 %44  }
  0x7d   :  { %35 = vst.msk [vmem:[#allocation0] sm:$0x1] %vm34_vm6, %v33_v21  }
  0x7e   :  { %v39_v22 = vpop.permute.xlu0 %38  }
  0x7f   :  { %41 = vst.msk [vmem:[#allocation0] sm:$0x1] %vm40_vm7, %v39_v22  }
  0x80   :  { %47 = vst.msk [vmem:[#allocation0] sm:$0x1] %vm46_vm8, %v45_v23   ;;  %v58_v25 = vpop.permute.xlu1 %57  }
  0x81   :  { %60 = vst.msk [vmem:[#allocation0] sm:$0x1] %vm59_vm10, %v58_v25  }
  0x82   :  { %v51_v24 = vpop.permute.xlu0 %50  }
  0x83   :  { %54 = vst.msk [vmem:[#allocation0 + $0x8] sm:$0x1] %vm52_vm9, %v51_v24  }
  0x84   :  { %v71_v27 = vpop.permute.xlu1 %70  }
  0x85   :  { %73 = vst.msk [vmem:[#allocation0] sm:$0x1] %vm72_vm12, %v71_v27  }
  0x86   :  { %v64_v26 = vpop.permute.xlu0 %63  }
  0x87   :  { %67 = vst.msk [vmem:[#allocation0 + $0x8] sm:$0x1] %vm65_vm11, %v64_v26  }
  0x88   :  { %v84_v29 = vpop.permute.xlu1 %83  }
  0x89   :  { %86 = vst.msk [vmem:[#allocation0] sm:$0x1] %vm85_vm14, %v84_v29  }
  0x8a   :  { %v77_v28 = vpop.permute.xlu0 %76  }
  0x8b   :  { %80 = vst.msk [vmem:[#allocation0 + $0x8] sm:$0x1] %vm78_vm13, %v77_v28  }
  0x8c   :  { %v97_v31 = vpop.permute.xlu1 %96  }
  0x8d   :  { %99 = vst.msk [vmem:[#allocation0] sm:$0x1] %vm98_vm0, %v97_v31  }
  0x8e   :  { %v90_v30 = vpop.permute.xlu0 %89  }
  0x8f   :  { %93 = vst.msk [vmem:[#allocation0 + $0x8] sm:$0x1] %vm91_vm15, %v90_v30  }
  0x92   :  { %v103_v32 = vpop.permute.xlu0 %102  }
  0x93   :  { %106 = vst.msk [vmem:[#allocation0 + $0x8] sm:$0x1] %vm104_vm1, %v103_v32  }
  0x94   :  { %v110_v33 = vld [vmem:[#allocation0] sm:$0x1] }
  0x95   :  { %112 = vst [vmem:[%s233_s1] sm:$0x1] %v110_v33 }
  0x9a   :  { %v114_v34 = vld [vmem:[#allocation0 + $0x8] sm:$0x1] }
  0x9b   :  { %134 = vst [vmem:[%s233_s1 + $0x1] sm:$0x1] %v114_v34 }

// kernel: tile.28
= control target key start
LH: loop header
LB: loop body
LE: loop exit
PB: predicated region body
PF: predicated region fallthrough
CT: control target
= control target key end

     0   :  { %s22_s0 = inlined_call_operand.vmem [shape: f32[12], index: 0, kind: input, shape index: {}]   ;;  %s23_s1 = inlined_call_operand.vmem [shape: f32[8,12], index: 1, kind: output, shape index: {}]  }
   0x1   :  { %v4_v0 = vld [vmem:[%s22_s0] ss:$0 sm:$0xff] }
   0x2   :  { %5 = vst [vmem:[%s23_s1] sm:$0xff] %v4_v0 }

// kernel: tile.29
= control target key start
LH: loop header
LB: loop body
LE: loop exit
PB: predicated region body
PF: predicated region fallthrough
CT: control target
= control target key end

     0   :  { %s67_s10 = smov 84   ;;  %s68_s11 = smov 60   ;;  %vm3_vm0 = vcmask 97280   ;;  %vm9_vm1 = vcmask 786080   ;;  %vm15_vm2 = vcmask 687680   ;;  %vm21_vm3 = vcmask 589280   ;;  %s111_s0 = inlined_call_operand.vmem [shape: f32[8,12], index: 0, kind: input, shape index: {}]   ;;  %s112_s1 = inlined_call_operand.vmem [shape: f32[1,96], index: 1, kind: output, shape index: {}]  }
   0x1   :  { %v53_v0 = vld [vmem:[%s111_s0 + $0x7] sm:$0x1]   ;;  %v55_v1 = vld [vmem:[%s111_s0 + $0x5] sm:$0x1]   ;;  %v54_v2 = vld [vmem:[%s111_s0 + $0x6] sm:$0x1]  }
   0x2   :  { %7 = vrot.lane.b32.xlu0 %v53_v0, %s67_s10  ;;  %19 = vrot.lane.b32.xlu1 %v55_v1, %s68_s11  ;;  %v56_v3 = vld [vmem:[%s111_s0 + $0x4] sm:$0x1]   ;;  %v2_v4 = vld [vmem:[%s111_s0] sm:$0x1]   ;;  %s69_s18 = smov 72   ;;  %s70_s19 = smov 48  }
   0x3   :  { %4 = vst.msk [vmem:[#allocation0] sm:$0x1] %vm3_vm0, %v2_v4   ;;  %v57_v5 = vld [vmem:[%s111_s0 + $0x3] sm:$0x1]   ;;  %v58_v6 = vld [vmem:[%s111_s0 + $0x2] sm:$0x1]  }
   0x4   :  { %s71_s24 = smov 36   ;;  %s72_s25 = smov 24   ;;  %v59_v7 = vld [vmem:[%s111_s0 + $0x1] sm:$0x1]   ;;  %vm27_vm4 = vcmask 490880   ;;  %vm33_vm5 = vcmask 392480  }
   0x5   :  { %s73_s0 = smov 12   ;;  %vm39_vm6 = vcmask 294080   ;;  %vm45_vm7 = vcmask 195680  }
   0x6   :  { %13 = vrot.lane.b32.xlu0 %v54_v2, %s69_s18  ;;  %25 = vrot.lane.b32.xlu1 %v56_v3, %s70_s19 }
   0xa   :  { %31 = vrot.lane.b32.xlu0 %v57_v5, %s71_s24  ;;  %37 = vrot.lane.b32.xlu1 %v58_v6, %s72_s25 }
   0xe   :  { %43 = vrot.lane.b32.xlu0 %v59_v7, %s73_s0 }
  0x74   :  { %v8_v8 = vpop.permute.xlu0 %7   ;;  %v20_v9 = vpop.permute.xlu1 %19  }
  0x75   :  { %10 = vst.msk [vmem:[#allocation0] sm:$0x1] %vm9_vm1, %v8_v8  }
  0x78   :  { %v14_v10 = vpop.permute.xlu0 %13   ;;  %v26_v11 = vpop.permute.xlu1 %25  }
  0x79   :  { %16 = vst.msk [vmem:[#allocation0] sm:$0x1] %vm15_vm2, %v14_v10  }
  0x7a   :  { %22 = vst.msk [vmem:[#allocation0] sm:$0x1] %vm21_vm3, %v20_v9  }
  0x7b   :  { %28 = vst.msk [vmem:[#allocation0] sm:$0x1] %vm27_vm4, %v26_v11  }
  0x7c   :  { %v32_v12 = vpop.permute.xlu0 %31   ;;  %v38_v13 = vpop.permute.xlu1 %37  }
  0x7d   :  { %34 = vst.msk [vmem:[#allocation0] sm:$0x1] %vm33_vm5, %v32_v12  }
  0x7e   :  { %40 = vst.msk [vmem:[#allocation0] sm:$0x1] %vm39_vm6, %v38_v13  }
  0x80   :  { %v44_v14 = vpop.permute.xlu0 %43  }
  0x81   :  { %46 = vst.msk [vmem:[#allocation0] sm:$0x1] %vm45_vm7, %v44_v14  }
  0x88   :  { %v50_v15 = vld [vmem:[#allocation0] sm:$0x1] }
  0x89   :  { %52 = vst [vmem:[%s112_s1] sm:$0x1] %v50_v15 }

// kernel: lenet_forward.1
= control target key start
LH: loop header
LB: loop body
LE: loop exit
PB: predicated region body
PF: predicated region fallthrough
CT: control target
= control target key end

     0   :  { %v5566_v7 = vmov 0.0   ;;  %vm96_vm0 = vcmask 785408   ;;  %s7526_s0 = inlined_call_operand.vmem [shape: f32[2,36,96], index: 0, kind: input, shape index: {}]   ;;  %s7527_s1 = inlined_call_operand.vmem [shape: f32[5,96,192], index: 1, kind: input, shape index: {}]   ;;  %s7528_s2 = inlined_call_operand.vmem [shape: f32[1,192], index: 2, kind: input, shape index: {}]   ;;  %s7529_s3 = inlined_call_operand.vmem [shape: f32[5,192,96], index: 3, kind: input, shape index: {}]   ;;  %s7530_s4 = inlined_call_operand.vmem [shape: f32[1,96], index: 4, kind: input, shape index: {}]   ;;  %s7531_s5 = inlined_call_operand.vmem [shape: f32[5,96,96], index: 5, kind: input, shape index: {}]   ;;  %s7532_s6 = inlined_call_operand.vmem [shape: f32[1,96], index: 6, kind: input, shape index: {}]   ;;  %s7533_s7 = inlined_call_operand.vmem [shape: f32[5,96,96], index: 7, kind: input, shape index: {}]   ;;  %s7534_s8 = inlined_call_operand.vmem [shape: f32[1,96], index: 8, kind: input, shape index: {}]   ;;  %s7535_s9 = inlined_call_operand.vmem [shape: f32[8,96,128], index: 9, kind: input, shape index: {}]   ;;  %s7536_s10 = inlined_call_operand.vmem [shape: f32[1,128], index: 10, kind: input, shape index: {}]   ;;  %s7537_s11 = inlined_call_operand.hbm [shape: f32[2,128], index: 11, kind: output, shape index: {}]  }
   0x1   :  { %v3487_v0 = vld [vmem:[%s7527_s1 + $0xc8] sm:$0xff]  ;;  %v3489_v1 = vld [vmem:[%s7527_s1 + $0xd8] sm:$0xff]  ;;  %v3486_v2 = vld [vmem:[%s7527_s1 + $0xc0] sm:$0xff]  ;;  %167 = vmatprep.mubr.f32.mxu0 %v5566_v7  ;;  %250 = vmatprep.mubr.f32.mxu1 %v5566_v7 }
   0x2   :  { %v4658_v3 = vpack.c.bf16 %v3489_v1, %v3487_v0  ;;  %v3488_v4 = vld [vmem:[%s7527_s1 + $0xd0] sm:$0xff]  ;;  %v3491_v5 = vld [vmem:[%s7527_s1 + $0xe8] sm:$0xff]  ;;  %v3493_v6 = vld [vmem:[%s7527_s1 + $0xf8] sm:$0xff] }
   0x3   :  { %v4660_v8 = vpack.c.bf16 %v3488_v4, %v3486_v2  ;;  %v4662_v9 = vpack.c.bf16 %v3493_v6, %v3491_v5  ;;  %v3490_v10 = vld [vmem:[%s7527_s1 + $0xe0] sm:$0xff]  ;;  %v3492_v11 = vld [vmem:[%s7527_s1 + $0xf0] sm:$0xff]  ;;  %v3495_v12 = vld [vmem:[%s7527_s1 + $0x108] sm:$0xff] }
   0x4   :  { %4659 = vmatprep.subr.bf16.mxu0 %v4658_v3  ;;  %4683 = vmatprep.subr.bf16.mxu1 %v4658_v3  ;;  %v3497_v13 = vld [vmem:[%s7527_s1 + $0x118] sm:$0xff]  ;;  %v4664_v14 = vpack.c.bf16 %v3492_v11, %v3490_v10  ;;  %v3494_v16 = vld [vmem:[%s7527_s1 + $0x100] sm:$0xff]  ;;  %v3496_v17 = vld [vmem:[%s7527_s1 + $0x110] sm:$0xff] }
   0x5   :  { %4661 = vmatpush1.bf16.msra.mxu0 %v4660_v8  ;;  %4685 = vmatpush1.bf16.msra.mxu1 %v4660_v8  ;;  %v4666_v15 = vpack.c.bf16 %v3497_v13, %v3495_v12  ;;  %v3499_v18 = vld [vmem:[%s7527_s1 + $0x128] sm:$0xff]  ;;  %v3501_v19 = vld [vmem:[%s7527_s1 + $0x138] sm:$0xff]  ;;  %v4668_v20 = vpack.c.bf16 %v3496_v17, %v3494_v16  ;;  %v3498_v22 = vld [vmem:[%s7527_s1 + $0x120] sm:$0xff] }
   0x6   :  { %4663 = vmatprep.subr.bf16.mxu0 %v4662_v9  ;;  %4687 = vmatprep.subr.bf16.mxu1 %v4662_v9  ;;  %v4670_v21 = vpack.c.bf16 %v3501_v19, %v3499_v18  ;;  %v3500_v23 = vld [vmem:[%s7527_s1 + $0x130] sm:$0xff]  ;;  %v3503_v24 = vld [vmem:[%s7527_s1 + $0x148] sm:$0xff]  ;;  %v3505_v25 = vld [vmem:[%s7527_s1 + $0x158] sm:$0xff] }
   0x7   :  { %v4672_v26 = vpack.c.bf16 %v3500_v23, %v3498_v22  ;;  %v4674_v27 = vpack.c.bf16 %v3505_v25, %v3503_v24  ;;  %v3502_v28 = vld [vmem:[%s7527_s1 + $0x140] sm:$0xff]  ;;  %v3504_v29 = vld [vmem:[%s7527_s1 + $0x150] sm:$0xff]  ;;  %v3507_v30 = vld [vmem:[%s7527_s1 + $0x168] sm:$0xff] }
   0x8   :  { %v3509_v31 = vld [vmem:[%s7527_s1 + $0x178] sm:$0xff]  ;;  %v4676_v32 = vpack.c.bf16 %v3504_v29, %v3502_v28  ;;  %v3506_v34 = vld [vmem:[%s7527_s1 + $0x160] sm:$0xff]  ;;  %v3508_v35 = vld [vmem:[%s7527_s1 + $0x170] sm:$0xff] }
   0x9   :  { %4665 = vmatpush1.bf16.msra.mxu0 %v4664_v14  ;;  %4689 = vmatpush1.bf16.msra.mxu1 %v4664_v14  ;;  %v4678_v33 = vpack.c.bf16 %v3509_v31, %v3507_v30  ;;  %v44_v36 = vld [vmem:[%s7527_s1 + $0x8] sm:$0xff]  ;;  %v46_v37 = vld [vmem:[%s7527_s1 + $0x18] sm:$0xff]  ;;  %v4680_v38 = vpack.c.bf16 %v3508_v35, %v3506_v34  ;;  %v43_v40 = vld [vmem:[%s7527_s1] sm:$0xff] }
   0xa   :  { %4667 = vmatprep.subr.bf16.mxu0 %v4666_v15  ;;  %4691 = vmatprep.subr.bf16.mxu1 %v4666_v15  ;;  %v4706_v39 = vpack.c.bf16 %v46_v37, %v44_v36  ;;  %v45_v41 = vld [vmem:[%s7527_s1 + $0x10] sm:$0xff]  ;;  %v48_v42 = vld [vmem:[%s7527_s1 + $0x28] sm:$0xff]  ;;  %v50_v43 = vld [vmem:[%s7527_s1 + $0x38] sm:$0xff] }
   0xb   :  { %v67_v44 = vld [vmem:[%s7526_s0 + $0x9] sm:$0xff]  ;;  %v5728_v45 = vld [vmem:[%s7526_s0 + $0x1b] sm:$0xff]  ;;  %v4708_v46 = vpack.c.bf16 %v45_v41, %v43_v40  ;;  %v4710_v47 = vpack.c.bf16 %v50_v43, %v48_v42  ;;  %v68_v53 = vld [vmem:[%s7526_s0 + $0x31] sm:$0xff] }
   0xc   :  { %v47_v48 = vld [vmem:[%s7527_s1 + $0x20] sm:$0xff]  ;;  %v49_v49 = vld [vmem:[%s7527_s1 + $0x30] sm:$0xff]  ;;  %v52_v50 = vld [vmem:[%s7527_s1 + $0x48] sm:$0xff] }
   0xd   :  { %4669 = vmatpush1.bf16.msra.mxu0 %v4668_v20  ;;  %4693 = vmatpush1.bf16.msra.mxu1 %v4668_v20  ;;  %v54_v51 = vld [vmem:[%s7527_s1 + $0x58] sm:$0xff]  ;;  %v4712_v52 = vpack.c.bf16 %v49_v49, %v47_v48  ;;  %v5751_v54 = vld [vmem:[%s7526_s0 + $0x43] sm:$0xff]  ;;  %v53_v57 = vld [vmem:[%s7527_s1 + $0x50] sm:$0xff] }
   0xe   :  { %4671 = vmatprep.subr.bf16.mxu0 %v4670_v21  ;;  %4695 = vmatprep.subr.bf16.mxu1 %v4670_v21  ;;  %v4714_v55 = vpack.c.bf16 %v54_v51, %v52_v50  ;;  %v51_v56 = vld [vmem:[%s7527_s1 + $0x40] sm:$0xff]  ;;  %v56_v58 = vld [vmem:[%s7527_s1 + $0x68] sm:$0xff]  ;;  %v58_v59 = vld [vmem:[%s7527_s1 + $0x78] sm:$0xff] }
   0xf   :  { %v4716_v60 = vpack.c.bf16 %v53_v57, %v51_v56  ;;  %v4718_v61 = vpack.c.bf16 %v58_v59, %v56_v58  ;;  %v55_v62 = vld [vmem:[%s7527_s1 + $0x60] sm:$0xff]  ;;  %v57_v63 = vld [vmem:[%s7527_s1 + $0x70] sm:$0xff]  ;;  %v60_v0 = vld [vmem:[%s7527_s1 + $0x88] sm:$0xff] }
  0x10   :  { %v62_v1 = vld [vmem:[%s7527_s1 + $0x98] sm:$0xff]  ;;  %v4720_v2 = vpack.c.bf16 %v57_v63, %v55_v62  ;;  %v59_v4 = vld [vmem:[%s7527_s1 + $0x80] sm:$0xff]  ;;  %v61_v5 = vld [vmem:[%s7527_s1 + $0x90] sm:$0xff] }
  0x11   :  { %4673 = vmatpush1.bf16.msra.mxu0 %v4672_v26  ;;  %4697 = vmatpush1.bf16.msra.mxu1 %v4672_v26  ;;  %v4722_v3 = vpack.c.bf16 %v62_v1, %v60_v0  ;;  %v64_v6 = vld [vmem:[%s7527_s1 + $0xa8] sm:$0xff]  ;;  %v66_v8 = vld [vmem:[%s7527_s1 + $0xb8] sm:$0xff]  ;;  %v4724_v9 = vpack.c.bf16 %v61_v5, %v59_v4  ;;  %v63_v11 = vld [vmem:[%s7527_s1 + $0xa0] sm:$0xff] }
  0x12   :  { %4675 = vmatprep.subr.bf16.mxu0 %v4674_v27  ;;  %4699 = vmatprep.subr.bf16.mxu1 %v4674_v27  ;;  %v4726_v10 = vpack.c.bf16 %v66_v8, %v64_v6  ;;  %v65_v12 = vld [vmem:[%s7527_s1 + $0xb0] sm:$0xff]  ;;  %v3519_v13 = vld [vmem:[%s7527_s1 + $0x188] sm:$0xff]  ;;  %v3521_v14 = vld [vmem:[%s7527_s1 + $0x198] sm:$0xff] }
  0x13   :  { %v4728_v15 = vpack.c.bf16 %v65_v12, %v63_v11  ;;  %v4754_v16 = vpack.c.bf16 %v3521_v14, %v3519_v13  ;;  %v3518_v17 = vld [vmem:[%s7527_s1 + $0x180] sm:$0xff]  ;;  %v3520_v18 = vld [vmem:[%s7527_s1 + $0x190] sm:$0xff]  ;;  %v3523_v19 = vld [vmem:[%s7527_s1 + $0x1a8] sm:$0xff] }
  0x14   :  { %v3525_v20 = vld [vmem:[%s7527_s1 + $0x1b8] sm:$0xff]  ;;  %v39_v21 = vld [vmem:[%s7526_s0] sm:$0xff]  ;;  %v4756_v23 = vpack.c.bf16 %v3520_v18, %v3518_v17  ;;  %v3524_v26 = vld [vmem:[%s7527_s1 + $0x1b0] sm:$0xff] }
  0x15   :  { %4677 = vmatpush1.bf16.msra.mxu0 %v4676_v32  ;;  %4701 = vmatpush1.bf16.msra.mxu1 %v4676_v32  ;;  %v5826_v22 = vld [vmem:[%s7526_s0 + $0x12] sm:$0xff]  ;;  %v4758_v24 = vpack.c.bf16 %v3525_v20, %v3523_v19  ;;  %v3522_v25 = vld [vmem:[%s7527_s1 + $0x1a0] sm:$0xff]  ;;  %v3527_v27 = vld [vmem:[%s7527_s1 + $0x1c8] sm:$0xff] }
  0x16   :  { %4679 = vmatprep.subr.bf16.mxu0 %v4678_v33  ;;  %4703 = vmatprep.subr.bf16.mxu1 %v4678_v33  ;;  %v3529_v28 = vld [vmem:[%s7527_s1 + $0x1d8] sm:$0xff]  ;;  %v4760_v29 = vpack.c.bf16 %v3524_v26, %v3522_v25  ;;  %v40_v30 = vld [vmem:[%s7526_s0 + $0x28] sm:$0xff] }
  0x17   :  { %v5849_v31 = vld [vmem:[%s7526_s0 + $0x3a] sm:$0xff] }
  0x19   :  { %4681 = vmatpush1.bf16.msra.mxu0 %v4680_v38  ;;  %4705 = vmatpush1.bf16.msra.mxu1 %v4680_v38 }
  0x1a   :  { %4707 = vmatprep.subr.bf16.mxu0 %v4706_v39  ;;  %4731 = vmatprep.subr.bf16.mxu1 %v4706_v39 }
  0x1c   :  { %3510 = vmatmul.mubr.msk.f32.vlgmr.msra.gmra.mrb[0].mxu0 %vm96_vm0, %v67_v44  ;;  %3512 = vmatmul.mubr.msk.f32.vlgmr.msra.gmra.mrb[0].mxu1 %vm96_vm0, %v5728_v45 }
  0x1d   :  { %4709 = vmatpush1.bf16.msra.mxu0 %v4708_v46  ;;  %4733 = vmatpush1.bf16.msra.mxu1 %v4708_v46 }
  0x1e   :  { %4711 = vmatprep.subr.bf16.mxu0 %v4710_v47  ;;  %4735 = vmatprep.subr.bf16.mxu1 %v4710_v47 }
  0x1f   :  { %173 = vmatprep.mubr.f32.mxu0 %v5566_v7  ;;  %256 = vmatprep.mubr.f32.mxu1 %v5566_v7 }
  0x20   :  { %3511 = vmatmul.mubr.msk.f32.gmra.mrb[2].mxu0 %vm96_vm0, %v68_v53  ;;  %3513 = vmatmul.mubr.msk.f32.gmra.mrb[2].mxu1 %vm96_vm0, %v5751_v54 }
  0x21   :  { %4713 = vmatpush1.bf16.msra.mxu0 %v4712_v52  ;;  %4737 = vmatpush1.bf16.msra.mxu1 %v4712_v52 }
  0x22   :  { %4715 = vmatprep.subr.bf16.mxu0 %v4714_v55  ;;  %4739 = vmatprep.subr.bf16.mxu1 %v4714_v55 }
  0x23   :  { %333 = vmatprep.mubr.f32.mxu0 %v5566_v7  ;;  %416 = vmatprep.mubr.f32.mxu1 %v5566_v7 }
  0x25   :  { %4717 = vmatpush1.bf16.msra.mxu0 %v4716_v60  ;;  %4741 = vmatpush1.bf16.msra.mxu1 %v4716_v60 }
  0x26   :  { %4719 = vmatprep.subr.bf16.mxu0 %v4718_v61  ;;  %4743 = vmatprep.subr.bf16.mxu1 %v4718_v61 }
  0x29   :  { %4721 = vmatpush1.bf16.msra.mxu0 %v4720_v2  ;;  %4745 = vmatpush1.bf16.msra.mxu1 %v4720_v2 }
  0x2a   :  { %4723 = vmatprep.subr.bf16.mxu0 %v4722_v3  ;;  %4747 = vmatprep.subr.bf16.mxu1 %v4722_v3 }
  0x2d   :  { %4725 = vmatpush1.bf16.msra.mxu0 %v4724_v9  ;;  %4749 = vmatpush1.bf16.msra.mxu1 %v4724_v9 }
  0x2e   :  { %4727 = vmatprep.subr.bf16.mxu0 %v4726_v10  ;;  %4751 = vmatprep.subr.bf16.mxu1 %v4726_v10 }
  0x31   :  { %4729 = vmatpush1.bf16.msra.mxu0 %v4728_v15  ;;  %4753 = vmatpush1.bf16.msra.mxu1 %v4728_v15 }
  0x32   :  { %4755 = vmatprep.subr.bf16.mxu0 %v4754_v16  ;;  %4779 = vmatprep.subr.bf16.mxu1 %v4754_v16 }
  0x34   :  { %3514 = vmatmul.mubr.msk.f32.vlgmr.msra.gmra.mrb[0].mxu0 %vm96_vm0, %v39_v21  ;;  %3516 = vmatmul.mubr.msk.f32.vlgmr.msra.gmra.mrb[0].mxu1 %vm96_vm0, %v5826_v22 }
  0x35   :  { %4757 = vmatpush1.bf16.msra.mxu0 %v4756_v23  ;;  %4781 = vmatpush1.bf16.msra.mxu1 %v4756_v23 }
  0x36   :  { %16 = vsyncpa [#allocation3], 0  ;;  %4759 = vmatprep.subr.bf16.mxu0 %v4758_v24  ;;  %4783 = vmatprep.subr.bf16.mxu1 %v4758_v24  ;;  %v4762_v32 = vpack.c.bf16 %v3529_v28, %v3527_v27  ;;  %v3526_v33 = vld [vmem:[%s7527_s1 + $0x1c0] sm:$0xff]  ;;  %v3528_v34 = vld [vmem:[%s7527_s1 + $0x1d0] sm:$0xff]  ;;  %vm1078_vm1 = vcmask 1040384   ;;  %vm1156_vm2 = vcmask 523264  }
  0x37   :  { %v3531_v35 = vld [vmem:[%s7527_s1 + $0x1e8] sm:$0xff]  ;;  %v3533_v36 = vld [vmem:[%s7527_s1 + $0x1f8] sm:$0xff]  ;;  %339 = vmatprep.mubr.f32.mxu0 %v5566_v7  ;;  %422 = vmatprep.mubr.f32.mxu1 %v5566_v7  ;;  %v4764_v37 = vpack.c.bf16 %v3528_v34, %v3526_v33  ;;  %v3530_v39 = vld [vmem:[%s7527_s1 + $0x1e0] sm:$0xff]  ;;  %vm1325_vm4 = vcmask 1046528   ;;  %vm1572_vm5 = vcmask 1045504   ;;  %vm1716_vm6 = vcmask 1041408  }
  0x38   :  { %3515 = vmatmul.mubr.msk.f32.gmra.mrb[2].mxu0 %vm96_vm0, %v40_v30  ;;  %3517 = vmatmul.mubr.msk.f32.gmra.mrb[2].mxu1 %vm96_vm0, %v5849_v31  ;;  %v4766_v38 = vpack.c.bf16 %v3533_v36, %v3531_v35  ;;  %v3532_v40 = vld [vmem:[%s7527_s1 + $0x1f0] sm:$0xff]  ;;  %v3535_v41 = vld [vmem:[%s7527_s1 + $0x208] sm:$0xff]  ;;  %v3537_v42 = vld [vmem:[%s7527_s1 + $0x218] sm:$0xff]  ;;  %vm2115_vm7 = vcmask 1043456   ;;  %vm2014_vm8 = vcmask 1044480   ;;  %vm5568_vm9 = vmmov 0  }
  0x39   :  { %4761 = vmatpush1.bf16.msra.mxu0 %v4760_v29  ;;  %4785 = vmatpush1.bf16.msra.mxu1 %v4760_v29  ;;  %v4768_v43 = vpack.c.bf16 %v3532_v40, %v3530_v39  ;;  %v4770_v44 = vpack.c.bf16 %v3537_v42, %v3535_v41  ;;  %v3534_v46 = vld [vmem:[%s7527_s1 + $0x200] sm:$0xff]  ;;  %v3536_v47 = vld [vmem:[%s7527_s1 + $0x210] sm:$0xff]  ;;  %v3539_v48 = vld [vmem:[%s7527_s1 + $0x228] sm:$0xff]  ;;  %vm2781_vm10 = vcmask 1041409   ;;  %s5569_s20 = smov [#allocation2]  }
  0x3a   :  { %4763 = vmatprep.subr.bf16.mxu0 %v4762_v32  ;;  %4787 = vmatprep.subr.bf16.mxu1 %v4762_v32  ;;  %v3541_v49 = vld [vmem:[%s7527_s1 + $0x238] sm:$0xff]  ;;  %v4772_v50 = vpack.c.bf16 %v3536_v47, %v3534_v46  ;;  %v3538_v52 = vld [vmem:[%s7527_s1 + $0x220] sm:$0xff]  ;;  %v3540_v53 = vld [vmem:[%s7527_s1 + $0x230] sm:$0xff] }
  0x3b   :  { %520 = vmatprep.mubr.f32.mxu0 %v5566_v7  ;;  %603 = vmatprep.mubr.f32.mxu1 %v5566_v7  ;;  %v4774_v51 = vpack.c.bf16 %v3541_v49, %v3539_v48  ;;  %v3547_v55 = vld [vmem:[%s7527_s1 + $0x248] sm:$0xff]  ;;  %v3549_v56 = vld [vmem:[%s7527_s1 + $0x258] sm:$0xff]  ;;  %v4776_v57 = vpack.c.bf16 %v3540_v53, %v3538_v52  ;;  %v3546_v59 = vld [vmem:[%s7527_s1 + $0x240] sm:$0xff] }
  0x3c   :  { %v4802_v58 = vpack.c.bf16 %v3549_v56, %v3547_v55  ;;  %v3548_v60 = vld [vmem:[%s7527_s1 + $0x250] sm:$0xff]  ;;  %v3551_v61 = vld [vmem:[%s7527_s1 + $0x268] sm:$0xff]  ;;  %v3553_v62 = vld [vmem:[%s7527_s1 + $0x278] sm:$0xff] }
  0x3d   :  { %4765 = vmatpush1.bf16.msra.mxu0 %v4764_v37  ;;  %4789 = vmatpush1.bf16.msra.mxu1 %v4764_v37  ;;  %v5921_v63 = vld [vmem:[%s7526_s0 + $0x1] sm:$0xff]  ;;  %v4804_v0 = vpack.c.bf16 %v3548_v60, %v3546_v59  ;;  %v4806_v1 = vpack.c.bf16 %v3553_v62, %v3551_v61  ;;  %v3552_v3 = vld [vmem:[%s7527_s1 + $0x270] sm:$0xff]  ;;  %v3557_v5 = vld [vmem:[%s7527_s1 + $0x298] sm:$0xff] }
  0x3e   :  { %4767 = vmatprep.subr.bf16.mxu0 %v4766_v38  ;;  %4791 = vmatprep.subr.bf16.mxu1 %v4766_v38  ;;  %v3550_v2 = vld [vmem:[%s7527_s1 + $0x260] sm:$0xff]  ;;  %v3555_v4 = vld [vmem:[%s7527_s1 + $0x288] sm:$0xff]  ;;  %v3556_v11 = vld [vmem:[%s7527_s1 + $0x290] sm:$0xff] }
  0x3f   :  { %v4808_v6 = vpack.c.bf16 %v3552_v3, %v3550_v2  ;;  %v5942_v8 = vld [vmem:[%s7526_s0 + $0x29] sm:$0xff]  ;;  %v4810_v9 = vpack.c.bf16 %v3557_v5, %v3555_v4  ;;  %v3554_v10 = vld [vmem:[%s7527_s1 + $0x280] sm:$0xff]  ;;  %v3561_v13 = vld [vmem:[%s7527_s1 + $0x2b8] sm:$0xff] }
  0x40   :  { %v3559_v12 = vld [vmem:[%s7527_s1 + $0x2a8] sm:$0xff]  ;;  %v4812_v14 = vpack.c.bf16 %v3556_v11, %v3554_v10  ;;  %v3558_v16 = vld [vmem:[%s7527_s1 + $0x2a0] sm:$0xff]  ;;  %v3560_v17 = vld [vmem:[%s7527_s1 + $0x2b0] sm:$0xff] }
  0x41   :  { %4769 = vmatpush1.bf16.msra.mxu0 %v4768_v43  ;;  %4793 = vmatpush1.bf16.msra.mxu1 %v4768_v43  ;;  %v4814_v15 = vpack.c.bf16 %v3561_v13, %v3559_v12  ;;  %v3563_v18 = vld [vmem:[%s7527_s1 + $0x2c8] sm:$0xff]  ;;  %v3565_v19 = vld [vmem:[%s7527_s1 + $0x2d8] sm:$0xff]  ;;  %v4816_v20 = vpack.c.bf16 %v3560_v17, %v3558_v16  ;;  %v3564_v23 = vld [vmem:[%s7527_s1 + $0x2d0] sm:$0xff]  ;;  %v5567_v13 = vmov 0.0|0.0  }
  0x42   :  { %4771 = vmatprep.subr.bf16.mxu0 %v4770_v44  ;;  %4795 = vmatprep.subr.bf16.mxu1 %v4770_v44  ;;  %v4818_v21 = vpack.c.bf16 %v3565_v19, %v3563_v18  ;;  %v3567_v24 = vld [vmem:[%s7527_s1 + $0x2e8] sm:$0xff]  ;;  %v3569_v25 = vld [vmem:[%s7527_s1 + $0x2f8] sm:$0xff]  ;;  %v3566_v28 = vld [vmem:[%s7527_s1 + $0x2e0] sm:$0xff] }
  0x43   :  { %v4822_v27 = vpack.c.bf16 %v3569_v25, %v3567_v24  ;;  %v3568_v29 = vld [vmem:[%s7527_s1 + $0x2f0] sm:$0xff]  ;;  %v3575_v30 = vld [vmem:[%s7527_s1 + $0x308] sm:$0xff]  ;;  %v3574_v34 = vld [vmem:[%s7527_s1 + $0x300] sm:$0xff] }
  0x44   :  { %v4824_v32 = vpack.c.bf16 %v3568_v29, %v3566_v28  ;;  %v3576_v35 = vld [vmem:[%s7527_s1 + $0x310] sm:$0xff]  ;;  %v3579_v36 = vld [vmem:[%s7527_s1 + $0x328] sm:$0xff]  ;;  %v3581_v37 = vld [vmem:[%s7527_s1 + $0x338] sm:$0xff] }
  0x45   :  { %4773 = vmatpush1.bf16.msra.mxu0 %v4772_v50  ;;  %4797 = vmatpush1.bf16.msra.mxu1 %v4772_v50  ;;  %v624_v38 = vld [vmem:[%s7526_s0 + $0xa] sm:$0xff]  ;;  %v4852_v39 = vpack.c.bf16 %v3576_v35, %v3574_v34  ;;  %v4854_v40 = vpack.c.bf16 %v3581_v37, %v3579_v36  ;;  %v3578_v41 = vld [vmem:[%s7527_s1 + $0x320] sm:$0xff]  ;;  %v3585_v44 = vld [vmem:[%s7527_s1 + $0x358] sm:$0xff] }
  0x46   :  { %4775 = vmatprep.subr.bf16.mxu0 %v4774_v51  ;;  %4799 = vmatprep.subr.bf16.mxu1 %v4774_v51  ;;  %v3580_v42 = vld [vmem:[%s7527_s1 + $0x330] sm:$0xff]  ;;  %v3583_v43 = vld [vmem:[%s7527_s1 + $0x348] sm:$0xff]  ;;  %v3582_v49 = vld [vmem:[%s7527_s1 + $0x340] sm:$0xff] }
  0x47   :  { %v4856_v46 = vpack.c.bf16 %v3580_v42, %v3578_v41  ;;  %v625_v47 = vld [vmem:[%s7526_s0 + $0x32] sm:$0xff]  ;;  %v4858_v48 = vpack.c.bf16 %v3585_v44, %v3583_v43  ;;  %v3587_v50 = vld [vmem:[%s7527_s1 + $0x368] sm:$0xff]  ;;  %v3586_v55 = vld [vmem:[%s7527_s1 + $0x360] sm:$0xff] }
  0x48   :  { %v3589_v51 = vld [vmem:[%s7527_s1 + $0x378] sm:$0xff]  ;;  %v3588_v56 = vld [vmem:[%s7527_s1 + $0x370] sm:$0xff]  ;;  %v3590_v60 = vld [vmem:[%s7527_s1 + $0x380] sm:$0xff] }
  0x49   :  { %4777 = vmatpush1.bf16.msra.mxu0 %v4776_v57  ;;  %4801 = vmatpush1.bf16.msra.mxu1 %v4776_v57  ;;  %v4862_v53 = vpack.c.bf16 %v3589_v51, %v3587_v50  ;;  %v3593_v57 = vld [vmem:[%s7527_s1 + $0x398] sm:$0xff]  ;;  %v3592_v61 = vld [vmem:[%s7527_s1 + $0x390] sm:$0xff]  ;;  %v3595_v62 = vld [vmem:[%s7527_s1 + $0x3a8] sm:$0xff] }
  0x4a   :  { %4803 = vmatprep.subr.bf16.mxu0 %v4802_v58  ;;  %4827 = vmatprep.subr.bf16.mxu1 %v4802_v58  ;;  %v4864_v58 = vpack.c.bf16 %v3588_v56, %v3586_v55  ;;  %v3594_v3 = vld [vmem:[%s7527_s1 + $0x3a0] sm:$0xff]  ;;  %v3596_v4 = vld [vmem:[%s7527_s1 + $0x3b0] sm:$0xff]  ;;  %v1108_v11 = vld [vmem:[%s7529_s3 + $0x8] sm:$0xff] }
  0x4b   :  { %v4872_v5 = vpack.c.bf16 %v3596_v4, %v3594_v3  ;;  %v1107_v10 = vld [vmem:[%s7529_s3] sm:$0xff]  ;;  %v819_v12 = vld [vmem:[%s7526_s0 + $0x13] sm:$0xff]  ;;  %v1112_v25 = vld [vmem:[%s7529_s3 + $0x28] sm:$0xff] }
  0x4c   :  { %3542 = vmatmul.mubr.msk.f32.vlgmr.msra.gmra.mrb[0].mxu0 %vm96_vm0, %v5826_v22  ;;  %3544 = vmatmul.mubr.msk.f32.vlgmr.msra.gmra.mrb[0].mxu1 %vm96_vm0, %v5921_v63  ;;  %v3562_v22 = vld [vmem:[%s7527_s1 + $0x2c0] sm:$0xff]  ;;  %v3604_v16 = vld [vmem:[%s7529_s3 + $0xd0] sm:$0xff]  ;;  %v3605_v17 = vld [vmem:[%s7529_s3 + $0xd8] sm:$0xff] }
  0x4d   :  { %4805 = vmatpush1.bf16.msra.mxu0 %v4804_v0  ;;  %4829 = vmatpush1.bf16.msra.mxu1 %v4804_v0  ;;  %v4820_v26 = vpack.c.bf16 %v3564_v23, %v3562_v22  ;;  %v3597_v0 = vld [vmem:[%s7527_s1 + $0x3b8] sm:$0xff]  ;;  %v1109_v18 = vld [vmem:[%s7529_s3 + $0x10] sm:$0xff]  ;;  %v3606_v23 = vld [vmem:[%s7529_s3 + $0xe0] sm:$0xff] }
  0x4e   :  { %4807 = vmatprep.subr.bf16.mxu0 %v4806_v1  ;;  %4831 = vmatprep.subr.bf16.mxu1 %v4806_v1  ;;  %v4868_v1 = vpack.c.bf16 %v3592_v61, %v3590_v60  ;;  %v4870_v2 = vpack.c.bf16 %v3597_v0, %v3595_v62  ;;  %v1110_v19 = vld [vmem:[%s7529_s3 + $0x18] sm:$0xff]  ;;  %v1111_v24 = vld [vmem:[%s7529_s3 + $0x20] sm:$0xff]  ;;  %v3608_v28 = vld [vmem:[%s7529_s3 + $0xf0] sm:$0xff] }
  0x4f   :  { %526 = vmatprep.mubr.f32.mxu0 %v5566_v7  ;;  %609 = vmatprep.mubr.f32.mxu1 %v5566_v7  ;;  %v4938_v22 = vpack.c.bf16 %v1110_v19, %v1109_v18  ;;  %v3609_v29 = vld [vmem:[%s7529_s3 + $0xf8] sm:$0xff]  ;;  %v3611_v34 = vld [vmem:[%s7529_s3 + $0x108] sm:$0xff]  ;;  %v1115_v35 = vld [vmem:[%s7529_s3 + $0x40] sm:$0xff] }
  0x50   :  { %3543 = vmatmul.mubr.msk.f32.gmra.mrb[2].mxu0 %vm96_vm0, %v5849_v31  ;;  %3545 = vmatmul.mubr.msk.f32.gmra.mrb[2].mxu1 %vm96_vm0, %v5942_v8  ;;  %v3577_v31 = vld [vmem:[%s7527_s1 + $0x318] sm:$0xff]  ;;  %v1116_v36 = vld [vmem:[%s7529_s3 + $0x48] sm:$0xff]  ;;  %v1117_v41 = vld [vmem:[%s7529_s3 + $0x50] sm:$0xff] }
  0x51   :  { %4809 = vmatpush1.bf16.msra.mxu0 %v4808_v6  ;;  %4833 = vmatpush1.bf16.msra.mxu1 %v4808_v6  ;;  %v4850_v33 = vpack.c.bf16 %v3577_v31, %v3575_v30  ;;  %v3602_v6 = vld [vmem:[%s7529_s3 + $0xc0] sm:$0xff]  ;;  %v1114_v30 = vld [vmem:[%s7529_s3 + $0x38] sm:$0xff]  ;;  %v4908_v31 = vpack.c.bf16 %v3609_v29, %v3608_v28  ;;  %v3616_v51 = vld [vmem:[%s7529_s3 + $0x130] sm:$0xff] }
  0x52   :  { %4811 = vmatprep.subr.bf16.mxu0 %v4810_v9  ;;  %4835 = vmatprep.subr.bf16.mxu1 %v4810_v9  ;;  %v3603_v9 = vld [vmem:[%s7529_s3 + $0xc8] sm:$0xff]  ;;  %v1118_v42 = vld [vmem:[%s7529_s3 + $0x58] sm:$0xff]  ;;  %v3620_v0 = vld [vmem:[%s7529_s3 + $0x150] sm:$0xff] }
  0x53   :  { %715 = vmatprep.mubr.f32.mxu0 %v5566_v7  ;;  %798 = vmatprep.mubr.f32.mxu1 %v5566_v7  ;;  %v4950_v44 = vpack.c.bf16 %v1118_v42, %v1117_v41  ;;  %v1122_v56 = vld [vmem:[%s7529_s3 + $0x78] sm:$0xff]  ;;  %v1124_v61 = vld [vmem:[%s7529_s3 + $0x88] sm:$0xff]  ;;  %vm6286_vm3 = vmneg %vm1078_vm1 }
  0x54   :  { %v1126_v4 = vld [vmem:[%s7529_s3 + $0x98] sm:$0xff] }
  0x55   :  { %4813 = vmatpush1.bf16.msra.mxu0 %v4812_v14  ;;  %4837 = vmatpush1.bf16.msra.mxu1 %v4812_v14  ;;  %v4899_v14 = vpack.c.bf16 %v3603_v9, %v3602_v6  ;;  %v3622_v6 = vld [vmem:[%s7529_s3 + $0x160] sm:$0xff]  ;;  %v3623_v9 = vld [vmem:[%s7529_s3 + $0x168] sm:$0xff]  ;;  %v1130_v19 = vld [vmem:[%s7529_s3 + $0xb8] sm:$0xff] }
  0x56   :  { %4815 = vmatprep.subr.bf16.mxu0 %v4814_v15  ;;  %4839 = vmatprep.subr.bf16.mxu1 %v4814_v15  ;;  %v4935_v15 = vpack.c.bf16 %v1108_v11, %v1107_v10  ;;  %v1127_v10 = vld [vmem:[%s7529_s3 + $0xa0] sm:$0xff]  ;;  %v4929_v11 = vpack.c.bf16 %v3623_v9, %v3622_v6 }
  0x59   :  { %4817 = vmatpush1.bf16.msra.mxu0 %v4816_v20  ;;  %4841 = vmatpush1.bf16.msra.mxu1 %v4816_v20  ;;  %v820_v20 = vld [vmem:[%s7526_s0 + $0x3b] sm:$0xff]  ;;  %s3478_s0 = sshll.u32 %s5569_s20, 4  ;;  %s3479_s0 = int_to_ptr.vmem [resolvable:$true] %s3478_s0 }
  0x5a   :  { %4819 = vmatprep.subr.bf16.mxu0 %v4818_v21  ;;  %4843 = vmatprep.subr.bf16.mxu1 %v4818_v21  ;;  %v4902_v21 = vpack.c.bf16 %v3605_v17, %v3604_v16  ;;  %v3625_v16 = vld [vmem:[%s7529_s3 + $0x178] sm:$0xff]  ;;  %v1129_v17 = vld [vmem:[%s7529_s3 + $0xb0] sm:$0xff]  ;;  %s5542_s21 = scalar_lea.vmem %s3479_s0, 32  ;;  %p5547_p1 = scmp.lt.s32.totalorder %s3479_s0, %s3479_s0 }
  0x5b   :  { %p5543_p0 = scmp.ne.s32.totalorder %s3479_s0, %s5542_s21  ;;  %p5548_p2 = scmp.lt.s32.totalorder %s5542_s21, %s5542_s21 }
  0x5d   :  { %4821 = vmatpush1.bf16.msra.mxu0 %v4820_v26  ;;  %4845 = vmatpush1.bf16.msra.mxu1 %v4820_v26  ;;  %p5549_p3 = por %p5548_p2, %p5547_p1 }
  0x5e   :  { %4823 = vmatprep.subr.bf16.mxu0 %v4822_v27  ;;  %4847 = vmatprep.subr.bf16.mxu1 %v4822_v27  ;;  %v4941_v27 = vpack.c.bf16 %v1112_v25, %v1111_v24 }
  0x5f   :  { %p5550_p4 = pnand %p5549_p3, %p5543_p0 }
  0x61   :  { %4825 = vmatpush1.bf16.msra.mxu0 %v4824_v32  ;;  %4849 = vmatpush1.bf16.msra.mxu1 %v4824_v32 }
  0x62   :  { %4851 = vmatprep.subr.bf16.mxu0 %v4850_v33  ;;  %4875 = vmatprep.subr.bf16.mxu1 %v4850_v33  ;;  %v3610_v33 = vld [vmem:[%s7529_s3 + $0x100] sm:$0xff] }
  0x63   :  { %v4911_v37 = vpack.c.bf16 %v3611_v34, %v3610_v33 }
  0x64   :  { %3570 = vmatmul.mubr.msk.f32.vlgmr.msra.gmra.mrb[0].mxu0 %vm96_vm0, %v5728_v45  ;;  %3572 = vmatmul.mubr.msk.f32.vlgmr.msra.gmra.mrb[0].mxu1 %vm96_vm0, %v624_v38  ;;  %v3584_v45 = vld [vmem:[%s7527_s1 + $0x350] sm:$0xff]  ;;  %v4947_v38 = vpack.c.bf16 %v1116_v36, %v1115_v35 }
  0x65   :  { %4853 = vmatpush1.bf16.msra.mxu0 %v4852_v39  ;;  %4877 = vmatpush1.bf16.msra.mxu1 %v4852_v39  ;;  %v4860_v52 = vpack.c.bf16 %v3584_v45, %v3582_v49  ;;  %v3612_v39 = vld [vmem:[%s7529_s3 + $0x110] sm:$0xff]  ;;  %v1120_v45 = vld [vmem:[%s7529_s3 + $0x68] sm:$0xff] }
  0x66   :  { %4855 = vmatprep.subr.bf16.mxu0 %v4854_v40  ;;  %4879 = vmatprep.subr.bf16.mxu1 %v4854_v40  ;;  %v3613_v40 = vld [vmem:[%s7529_s3 + $0x118] sm:$0xff] }
  0x67   :  { %721 = vmatprep.mubr.f32.mxu0 %v5566_v7  ;;  %804 = vmatprep.mubr.f32.mxu1 %v5566_v7  ;;  %v4914_v43 = vpack.c.bf16 %v3613_v40, %v3612_v39 }
  0x68   :  { %3571 = vmatmul.mubr.msk.f32.gmra.mrb[2].mxu0 %vm96_vm0, %v5751_v54  ;;  %3573 = vmatmul.mubr.msk.f32.gmra.mrb[2].mxu1 %vm96_vm0, %v625_v47  ;;  %v3591_v54 = vld [vmem:[%s7527_s1 + $0x388] sm:$0xff] }
  0x69   :  { %4857 = vmatpush1.bf16.msra.mxu0 %v4856_v46  ;;  %4881 = vmatpush1.bf16.msra.mxu1 %v4856_v46  ;;  %v4866_v59 = vpack.c.bf16 %v3593_v57, %v3591_v54  ;;  %v3614_v46 = vld [vmem:[%s7529_s3 + $0x120] sm:$0xff]  ;;  %v3615_v47 = vld [vmem:[%s7529_s3 + $0x128] sm:$0xff] }
  0x6a   :  { %4859 = vmatprep.subr.bf16.mxu0 %v4858_v48  ;;  %4883 = vmatprep.subr.bf16.mxu1 %v4858_v48  ;;  %v1119_v48 = vld [vmem:[%s7529_s3 + $0x60] sm:$0xff]  ;;  %v4917_v49 = vpack.c.bf16 %v3615_v47, %v3614_v46 }
  0x6b   :  { %910 = vmatprep.mubr.f32.mxu0 %v5566_v7  ;;  %993 = vmatprep.mubr.f32.mxu1 %v5566_v7  ;;  %v4953_v50 = vpack.c.bf16 %v1120_v45, %v1119_v48  ;;  %v3618_v57 = vld [vmem:[%s7529_s3 + $0x140] sm:$0xff] }
  0x6d   :  { %4861 = vmatpush1.bf16.msra.mxu0 %v4860_v52  ;;  %4885 = vmatpush1.bf16.msra.mxu1 %v4860_v52  ;;  %v3617_v52 = vld [vmem:[%s7529_s3 + $0x138] sm:$0xff] }
  0x6e   :  { %4863 = vmatprep.subr.bf16.mxu0 %v4862_v53  ;;  %4887 = vmatprep.subr.bf16.mxu1 %v4862_v53  ;;  %v1121_v53 = vld [vmem:[%s7529_s3 + $0x70] sm:$0xff]  ;;  %v4920_v55 = vpack.c.bf16 %v3617_v52, %v3616_v51 }
  0x6f   :  { %v4956_v54 = vpack.c.bf16 %v1122_v56, %v1121_v53 }
  0x71   :  { %4865 = vmatpush1.bf16.msra.mxu0 %v4864_v58  ;;  %4889 = vmatpush1.bf16.msra.mxu1 %v4864_v58  ;;  %v3619_v58 = vld [vmem:[%s7529_s3 + $0x148] sm:$0xff] }
  0x72   :  { %4867 = vmatprep.subr.bf16.mxu0 %v4866_v59  ;;  %4891 = vmatprep.subr.bf16.mxu1 %v4866_v59  ;;  %v1123_v59 = vld [vmem:[%s7529_s3 + $0x80] sm:$0xff]  ;;  %v4923_v60 = vpack.c.bf16 %v3619_v58, %v3618_v57 }
  0x73   :  { %v4959_v62 = vpack.c.bf16 %v1124_v61, %v1123_v59  ;;  %v3638_v61 = vld [vmem:[%s7529_s3 + $0x180] sm:$0xff] }
  0x75   :  { %4869 = vmatpush1.bf16.msra.mxu0 %v4868_v1  ;;  %4893 = vmatpush1.bf16.msra.mxu1 %v4868_v1  ;;  %v3621_v1 = vld [vmem:[%s7529_s3 + $0x158] sm:$0xff] }
  0x76   :  { %4871 = vmatprep.subr.bf16.mxu0 %v4870_v2  ;;  %4895 = vmatprep.subr.bf16.mxu1 %v4870_v2  ;;  %v1125_v2 = vld [vmem:[%s7529_s3 + $0x90] sm:$0xff]  ;;  %v4926_v3 = vpack.c.bf16 %v3621_v1, %v3620_v0 }
  0x79   :  { %4873 = vmatpush1.bf16.msra.mxu0 %v4872_v5  ;;  %4897 = vmatpush1.bf16.msra.mxu1 %v4872_v5  ;;  %v4962_v5 = vpack.c.bf16 %v1126_v4, %v1125_v2  ;;  %v3664_v4 = vld [vmem:[%s7529_s3 + $0x240] sm:$0xff] }
  0x7a   :  { %4898 = vmatprep.subr.bf16.mxu0 %v5567_v13  ;;  %4934 = vmatprep.subr.bf16.mxu1 %v5567_v13 }
  0x7c   :  { %3598 = vmatmul.mubr.msk.f32.vlgmr.msra.gmra.mrb[0].mxu0 %vm96_vm0, %v5921_v63  ;;  %3600 = vmatmul.mubr.msk.f32.vlgmr.msra.gmra.mrb[0].mxu1 %vm96_vm0, %v819_v12  ;;  %v3607_v63 = vld [vmem:[%s7529_s3 + $0xe8] sm:$0xff] }
  0x7d   :  { %916 = vmatprep.mubr.f32.mxu0 %v5566_v7  ;;  %999 = vmatprep.mubr.f32.mxu1 %v5566_v7  ;;  %v4905_v26 = vpack.c.bf16 %v3607_v63, %v3606_v23  ;;  %v1128_v12 = vld [vmem:[%s7529_s3 + $0xa8] sm:$0xff]  ;;  %v1014_v63 = vld [vmem:[%s7528_s2] sm:$0x3] }
  0x7e   :  { %4900 = vmatpush1.bf16.msra.mxu0 %v4899_v14  ;;  %4936 = vmatpush1.bf16.msra.mxu1 %v4935_v15  ;;  %v4965_v14 = vpack.c.bf16 %v1128_v12, %v1127_v10  ;;  %v3624_v15 = vld [vmem:[%s7529_s3 + $0x170] sm:$0xff] }
  0x7f   :  { %4901 = vmatprep.subr.bf16.mxu0 %v5567_v13  ;;  %4937 = vmatprep.subr.bf16.mxu1 %v5567_v13  ;;  %v4932_v18 = vpack.c.bf16 %v3625_v16, %v3624_v15 }
  0x80   :  { %3599 = vmatmul.mubr.msk.f32.gmra.mrb[2].mxu0 %vm96_vm0, %v5942_v8  ;;  %3601 = vmatmul.mubr.msk.f32.gmra.mrb[2].mxu1 %vm96_vm0, %v820_v20  ;;  %v1113_v8 = vld [vmem:[%s7529_s3 + $0x30] sm:$0xff]  ;;  %v4968_v20 = vpack.c.bf16 %v1130_v19, %v1129_v17 }
  0x81   :  { %v4944_v32 = vpack.c.bf16 %v1114_v30, %v1113_v8 }
  0x82   :  { %4903 = vmatpush1.bf16.msra.mxu0 %v4902_v21  ;;  %4939 = vmatpush1.bf16.msra.mxu1 %v4938_v22  ;;  %v1016_v21 = vlaneseq }
  0x83   :  { %4904 = vmatprep.subr.bf16.mxu0 %v5567_v13  ;;  %4940 = vmatprep.subr.bf16.mxu1 %v5567_v13 }
  0x84   :  { %v1017_v22 = vshrl.u32 %v1016_v21, 7  ;;  %v3640_v21 = vld [vmem:[%s7529_s3 + $0x190] sm:$0xff] }
  0x86   :  { %4906 = vmatpush1.bf16.msra.mxu0 %v4905_v26  ;;  %4942 = vmatpush1.bf16.msra.mxu1 %v4941_v27  ;;  %v1018_v23 = vsub.s32 0, %v1017_v22  ;;  %v1022_v24 = vsub.s32 1, %v1017_v22  ;;  %v3641_v22 = vld [vmem:[%s7529_s3 + $0x198] sm:$0xff] }
  0x87   :  { %4907 = vmatprep.subr.bf16.mxu0 %v5567_v13  ;;  %4943 = vmatprep.subr.bf16.mxu1 %v5567_v13 }
  0x88   :  { %v1019_v25 = vrot.slane %v1014_v63, %v1018_v23  ;;  %v1023_v26 = vrot.slane %v1014_v63, %v1022_v24 }
  0x8a   :  { %4909 = vmatpush1.bf16.msra.mxu0 %v4908_v31  ;;  %4945 = vmatpush1.bf16.msra.mxu1 %v4944_v32 }
  0x8b   :  { %4910 = vmatprep.subr.bf16.mxu0 %v5567_v13  ;;  %4946 = vmatprep.subr.bf16.mxu1 %v5567_v13 }
  0x8e   :  { %4912 = vmatpush1.bf16.msra.mxu0 %v4911_v37  ;;  %4948 = vmatpush1.bf16.msra.mxu1 %v4947_v38 }
  0x8f   :  { %4913 = vmatprep.subr.bf16.mxu0 %v5567_v13  ;;  %4949 = vmatprep.subr.bf16.mxu1 %v5567_v13 }
  0x92   :  { %4915 = vmatpush1.bf16.msra.mxu0 %v4914_v43  ;;  %4951 = vmatpush1.bf16.msra.mxu1 %v4950_v44 }
  0x93   :  { %4916 = vmatprep.subr.bf16.mxu0 %v5567_v13  ;;  %4952 = vmatprep.subr.bf16.mxu1 %v5567_v13 }
  0x96   :  { %4918 = vmatpush1.bf16.msra.mxu0 %v4917_v49  ;;  %4954 = vmatpush1.bf16.msra.mxu1 %v4953_v50 }
  0x97   :  { %4919 = vmatprep.subr.bf16.mxu0 %v5567_v13  ;;  %4955 = vmatprep.subr.bf16.mxu1 %v5567_v13 }
  0x9a   :  { %4921 = vmatpush1.bf16.msra.mxu0 %v4920_v55  ;;  %4957 = vmatpush1.bf16.msra.mxu1 %v4956_v54 }
  0x9b   :  { %4922 = vmatprep.subr.bf16.mxu0 %v5567_v13  ;;  %4958 = vmatprep.subr.bf16.mxu1 %v5567_v13 }
  0x9e   :  { %4924 = vmatpush1.bf16.msra.mxu0 %v4923_v60  ;;  %4960 = vmatpush1.bf16.msra.mxu1 %v4959_v62 }
  0x9f   :  { %4925 = vmatprep.subr.bf16.mxu0 %v5567_v13  ;;  %4961 = vmatprep.subr.bf16.mxu1 %v5567_v13 }
  0xa2   :  { %4927 = vmatpush1.bf16.msra.mxu0 %v4926_v3  ;;  %4963 = vmatpush1.bf16.msra.mxu1 %v4962_v5  ;;  %v3639_v3 = vld [vmem:[%s7529_s3 + $0x188] sm:$0xff] }
  0xa3   :  { %4928 = vmatprep.subr.bf16.mxu0 %v5567_v13  ;;  %4964 = vmatprep.subr.bf16.mxu1 %v5567_v13  ;;  %v3665_v5 = vld [vmem:[%s7529_s3 + $0x248] sm:$0xff] }
  0xa4   :  { %v5007_v15 = vpack.c.bf16 %v3665_v5, %v3664_v4  ;;  %v3648_v4 = vld [vmem:[%s7529_s3 + $0x1d0] sm:$0xff]  ;;  %v3649_v5 = vld [vmem:[%s7529_s3 + $0x1d8] sm:$0xff] }
  0xa6   :  { %4930 = vmatpush1.bf16.msra.mxu0 %v4929_v11  ;;  %4966 = vmatpush1.bf16.msra.mxu1 %v4965_v14  ;;  %v4971_v14 = vpack.c.bf16 %v3639_v3, %v3638_v61 }
  0xa7   :  { %4931 = vmatprep.subr.bf16.mxu0 %v5567_v13  ;;  %4967 = vmatprep.subr.bf16.mxu1 %v5567_v13 }
  0xaa   :  { %4933 = vmatpush1.bf16.msra.mxu0 %v4932_v18  ;;  %4969 = vmatpush1.bf16.msra.mxu1 %v4968_v20 }
  0xab   :  { %4970 = vmatprep.subr.bf16.mxu0 %v5567_v13  ;;  %5006 = vmatprep.subr.bf16.mxu1 %v5567_v13 }
 0x14f   :  { %v912_v27 = vpop.f32.mrb[0].mxu0  ;;  %v995_v28 = vpop.f32.mrb[0].mxu1 }
 0x150   :  { %v1026_v29 = vadd.f32 %v1019_v25, %v912_v27  ;;  %v1046_v8 = vadd.f32 %v1019_v25, %v995_v28  ;;  %v914_v30 = vpop.f32.mrb[1].mxu0  ;;  %v997_v31 = vpop.f32.mrb[1].mxu1  ;;  %v3667_v27 = vld [vmem:[%s7529_s3 + $0x258] sm:$0xff] }
 0x151   :  { %v1027_v32 = vadd.f32 %v1023_v26, %v914_v30  ;;  %v1047_v33 = vadd.f32 %v1023_v26, %v997_v31 }
 0x152   :  { %v1030_v34 = vmul.f32 0.5, %v1026_v29  ;;  %v1050_v35 = vmul.f32 0.5, %v1046_v8 }
 0x153   :  { %v1031_v36 = vmul.f32 0.5, %v1027_v32  ;;  %v1051_v37 = vmul.f32 0.5, %v1047_v33  ;;  %v918_v38 = vpop.f32.mrb[2].mxu0  ;;  %v1001_v39 = vpop.f32.mrb[2].mxu1  ;;  %v4974_v33 = vpack.c.bf16 %v3641_v22, %v3640_v21  ;;  %v3652_v21 = vld [vmem:[%s7529_s3 + $0x1f0] sm:$0xff]  ;;  %v3653_v22 = vld [vmem:[%s7529_s3 + $0x1f8] sm:$0xff] }
 0x154   :  { %5514 = vtanh.f32 %v1030_v34  ;;  %v1028_v40 = vadd.f32 %v1019_v25, %v918_v38  ;;  %v1048_v41 = vadd.f32 %v1019_v25, %v1001_v39  ;;  %v920_v42 = vpop.f32.mrb[3].mxu0  ;;  %v1003_v43 = vpop.f32.mrb[3].mxu1  ;;  %v3642_v39 = vld [vmem:[%s7529_s3 + $0x1a0] sm:$0xff] }
 0x155   :  { %5516 = vtanh.f32 %v1050_v35  ;;  %v1029_v44 = vadd.f32 %v1023_v26, %v920_v42  ;;  %v1049_v46 = vadd.f32 %v1023_v26, %v1003_v43  ;;  %v3666_v26 = vld [vmem:[%s7529_s3 + $0x250] sm:$0xff] }
 0x156   :  { %5518 = vtanh.f32 %v1031_v36  ;;  %v1032_v47 = vmul.f32 0.5, %v1028_v40  ;;  %v1052_v48 = vmul.f32 0.5, %v1048_v41  ;;  %v5010_v34 = vpack.c.bf16 %v3667_v27, %v3666_v26  ;;  %v3643_v40 = vld [vmem:[%s7529_s3 + $0x1a8] sm:$0xff]  ;;  %v3654_v27 = vld [vmem:[%s7529_s3 + $0x200] sm:$0xff] }
 0x157   :  { %5520 = vtanh.f32 %v1051_v37  ;;  %v1033_v49 = vmul.f32 0.5, %v1029_v44  ;;  %v1053_v45 = vmul.f32 0.5, %v1049_v46  ;;  %v3668_v46 = vld [vmem:[%s7529_s3 + $0x260] sm:$0xff] }
 0x158   :  { %5522 = vtanh.f32 %v1032_v47  ;;  %v3669_v47 = vld [vmem:[%s7529_s3 + $0x268] sm:$0xff] }
 0x159   :  { %5524 = vtanh.f32 %v1052_v48 }
 0x15a   :  { %5526 = vtanh.f32 %v1033_v49  ;;  %v4977_v49 = vpack.c.bf16 %v3643_v40, %v3642_v39 }
 0x15b   :  { %5528 = vtanh.f32 %v1053_v45 }
 0x15e   :  { %v5515_v50 = vpop.eup %5514 }
 0x15f   :  { %v5517_v51 = vpop.eup %5516  ;;  %v1038_v53 = vmul.f32 0.5, %v5515_v50 }
 0x160   :  { %v5519_v52 = vpop.eup %5518  ;;  %v1058_v55 = vmul.f32 0.5, %v5517_v51 }
 0x161   :  { %v5521_v56 = vpop.eup %5520  ;;  %v1039_v54 = vmul.f32 0.5, %v5519_v52  ;;  %v1042_v0 = vadd.f32 0.5, %v1038_v53  ;;  %v5013_v52 = vpack.c.bf16 %v3669_v47, %v3668_v46  ;;  %v3644_v53 = vld [vmem:[%s7529_s3 + $0x1b0] sm:$0xff]  ;;  %v3658_v46 = vld [vmem:[%s7529_s3 + $0x220] sm:$0xff]  ;;  %v3659_v47 = vld [vmem:[%s7529_s3 + $0x228] sm:$0xff] }
 0x162   :  { %v5523_v57 = vpop.eup %5522  ;;  %v1059_v58 = vmul.f32 0.5, %v5521_v56  ;;  %v1062_v1 = vadd.f32 0.5, %v1058_v55  ;;  %v3645_v55 = vld [vmem:[%s7529_s3 + $0x1b8] sm:$0xff]  ;;  %v3670_v56 = vld [vmem:[%s7529_s3 + $0x270] sm:$0xff] }
 0x163   :  { %v5525_v59 = vpop.eup %5524  ;;  %v1043_v60 = vadd.f32 0.5, %v1039_v54  ;;  %v1040_v10 = vmul.f32 0.5, %v5523_v57  ;;  %v6281_v16 = vrot.slane %v1042_v0, 7  ;;  %v3671_v54 = vld [vmem:[%s7529_s3 + $0x278] sm:$0xff]  ;;  %v3672_v0 = vld [vmem:[%s7529_s3 + $0x280] sm:$0xff] }
 0x164   :  { %v5527_v62 = vpop.eup %5526  ;;  %v1063_v2 = vadd.f32 0.5, %v1059_v58  ;;  %v1060_v11 = vmul.f32 0.5, %v5525_v59  ;;  %v6283_v17 = vrot.slane %v1062_v1, 7  ;;  %v4980_v58 = vpack.c.bf16 %v3645_v55, %v3644_v53  ;;  %v3673_v1 = vld [vmem:[%s7529_s3 + $0x288] sm:$0xff]  ;;  %v3661_v53 = vld [vmem:[%s7529_s3 + $0x238] sm:$0xff]  ;;  %v3686_v55 = vld [vmem:[%s7529_s3 + $0x2f0] sm:$0xff] }
 0x165   :  { %v5529_v6 = vpop.eup %5528  ;;  %v1071_v9 = vrot.slane %v1043_v60, 7  ;;  %v1041_v18 = vmul.f32 0.5, %v5527_v62  ;;  %v1044_v23 = vadd.f32 0.5, %v1040_v10  ;;  %v5016_v59 = vpack.c.bf16 %v3671_v54, %v3670_v56  ;;  %v3646_v60 = vld [vmem:[%s7529_s3 + $0x1c0] sm:$0xff]  ;;  %v3647_v62 = vld [vmem:[%s7529_s3 + $0x1c8] sm:$0xff]  ;;  %v3687_v56 = vld [vmem:[%s7529_s3 + $0x2f8] sm:$0xff] }
 0x166   :  { %v1092_v12 = vrot.slane %v1063_v2, 7  ;;  %v1061_v19 = vmul.f32 0.5, %v5529_v6  ;;  %v1064_v63 = vadd.f32 0.5, %v1060_v11  ;;  %v4983_v2 = vpack.c.bf16 %v3647_v62, %v3646_v60  ;;  %v3674_v6 = vld [vmem:[%s7529_s3 + $0x290] sm:$0xff] }
 0x167   :  { %v6298_v25 = vsel %vm1078_vm1, 0.0, %v1071_v9  ;;  %v6307_v28 = vsel %vm1078_vm1, %v1071_v9, 0.0  ;;  %v1045_v8 = vadd.f32 0.5, %v1041_v18  ;;  %v6332_v41 = vrot.slane %v1044_v23, 7  ;;  %v3675_v9 = vld [vmem:[%s7529_s3 + $0x298] sm:$0xff]  ;;  %v3677_v18 = vld [vmem:[%s7529_s3 + $0x2a8] sm:$0xff] }
 0x168   :  { %v1100_v24 = vsel %vm1078_vm1, 0.0, %v1092_v12  ;;  %v1104_v29 = vsel %vm1078_vm1, %v1092_v12, 0.0  ;;  %v6310_v30 = vadd.f32 0.5, %v1061_v19  ;;  %3632 = vmatprep.mubr.msk.f32.mxu1 %vm1156_vm2, %v6298_v25  ;;  %v1329_v37 = vrot.slane %v6298_v25, 1  ;;  %v3650_v12 = vld [vmem:[%s7529_s3 + $0x1e0] sm:$0xff]  ;;  %v3678_v23 = vld [vmem:[%s7529_s3 + $0x2b0] sm:$0xff] }
 0x169   :  { %3626 = vmatprep.mubr.msk.f32.mxu0 %vm1156_vm2, %v1100_v24  ;;  %3634 = vmatmul.mubr.msk.f32.vlgmr.msra.gmra.mrb[4].mxu1 %vm6286_vm3, %v6281_v16  ;;  %v1073_v31 = vrot.slane %v1045_v8, 7  ;;  %v1456_v35 = vrot.slane %v1104_v29, 1  ;;  %v1455_v36 = vrot.slane %v1100_v24, 1  ;;  %v1330_v38 = vrot.slane %v6307_v28, 1  ;;  %v3655_v29 = vld [vmem:[%s7529_s3 + $0x208] sm:$0xff]  ;;  %v3680_v8 = vld [vmem:[%s7529_s3 + $0x2c0] sm:$0xff] }
 0x16a   :  { %3628 = vmatmul.mubr.msk.f32.vlgmr.msra.gmra.mrb[4].mxu0 %vm6286_vm3, %v6283_v17  ;;  %v1094_v32 = vrot.slane %v6310_v30, 7  ;;  %5008 = vmatpush1.bf16.msra.mxu1 %v5007_v15  ;;  %v6334_v42 = vrot.slane %v1064_v63, 7  ;;  %v5019_v3 = vpack.c.bf16 %v3673_v1, %v3672_v0  ;;  %v4986_v10 = vpack.c.bf16 %v3649_v5, %v3648_v4  ;;  %v3676_v15 = vld [vmem:[%s7529_s3 + $0x2a0] sm:$0xff]  ;;  %v3679_v63 = vld [vmem:[%s7529_s3 + $0x2b8] sm:$0xff]  ;;  %v3691_v30 = vld [vmem:[%s7529_s3 + $0x308] sm:$0xff] }
 0x16b   :  { %4972 = vmatpush1.bf16.msra.mxu0 %v4971_v14  ;;  %5009 = vmatprep.subr.bf16.mxu1 %v5567_v13  ;;  %v6342_v44 = vsel %vm1078_vm1, 0.0, %v1073_v31  ;;  %v6355_v48 = vsel %vm1078_vm1, %v1073_v31, 0.0  ;;  %v1331_v50 = vsel %vm1325_vm4, %v1329_v37, %v1330_v38  ;;  %v1457_v51 = vsel %vm1325_vm4, %v1455_v36, %v1456_v35  ;;  %v3651_v14 = vld [vmem:[%s7529_s3 + $0x1e8] sm:$0xff]  ;;  %v3656_v35 = vld [vmem:[%s7529_s3 + $0x210] sm:$0xff]  ;;  %v3657_v36 = vld [vmem:[%s7529_s3 + $0x218] sm:$0xff] }
 0x16c   :  { %4973 = vmatprep.subr.bf16.mxu0 %v5567_v13  ;;  %v6339_v43 = vsel %vm1078_vm1, 0.0, %v1094_v32  ;;  %3635 = vmatprep.mubr.msk.f32.mxu1 %vm1156_vm2, %v6342_v44  ;;  %v1582_v45 = vrot.slane %v6342_v44, 2  ;;  %v1583_v57 = vrot.slane %v6355_v48, 2  ;;  %v5022_v11 = vpack.c.bf16 %v3675_v9, %v3674_v6  ;;  %v3681_v31 = vld [vmem:[%s7529_s3 + $0x2c8] sm:$0xff]  ;;  %v3682_v37 = vld [vmem:[%s7529_s3 + $0x2d0] sm:$0xff]  ;;  %v3683_v38 = vld [vmem:[%s7529_s3 + $0x2d8] sm:$0xff] }
 0x16d   :  { %3629 = vmatprep.mubr.msk.f32.mxu0 %vm1156_vm2, %v6339_v43  ;;  %3637 = vmatmul.mubr.msk.f32.gmra.mrb[6].mxu1 %vm6286_vm3, %v6332_v41  ;;  %v4989_v19 = vpack.c.bf16 %v3651_v14, %v3650_v12  ;;  %v5025_v20 = vpack.c.bf16 %v3677_v18, %v3676_v15  ;;  %v4992_v24 = vpack.c.bf16 %v3653_v22, %v3652_v21  ;;  %v6500_v54 = vsel %vm1078_vm1, 0.0, %v6281_v16 }
 0x16e   :  { %3631 = vmatmul.mubr.msk.f32.gmra.mrb[6].mxu0 %vm6286_vm3, %v6334_v42  ;;  %5011 = vmatpush1.bf16.msra.mxu1 %v5010_v34  ;;  %v6387_v61 = vsel %vm1572_vm5, %v1582_v45, %v1583_v57  ;;  %v5028_v26 = vpack.c.bf16 %v3679_v63, %v3678_v23  ;;  %v5031_v34 = vpack.c.bf16 %v3681_v31, %v3680_v8  ;;  %v3685_v45 = vld [vmem:[%s7529_s3 + $0x2e8] sm:$0xff]  ;;  %v6504_v57 = vsel %vm1078_vm1, %v6281_v16, 0.0  ;;  %v3696_v8 = vld [vmem:[%s7529_s3 + $0x330] sm:$0xff]  ;;  %v3697_v31 = vld [vmem:[%s7529_s3 + $0x338] sm:$0xff] }
 0x16f   :  { %4975 = vmatpush1.bf16.msra.mxu0 %v4974_v33  ;;  %3662 = vmatprep.mubr.msk.f32.mxu0 %vm1156_vm2, %v1331_v50  ;;  %v4995_v33 = vpack.c.bf16 %v3655_v29, %v3654_v27  ;;  %v4998_v39 = vpack.c.bf16 %v3657_v36, %v3656_v35  ;;  %v5034_v40 = vpack.c.bf16 %v3683_v38, %v3682_v37  ;;  %v1106_v60 = vsel %vm1078_vm1, %v1094_v32, 0.0  ;;  %v3699_v35 = vld [vmem:[%s7529_s3 + $0x348] sm:$0xff]  ;;  %v3700_v37 = vld [vmem:[%s7529_s3 + $0x350] sm:$0xff]  ;;  %v3701_v38 = vld [vmem:[%s7529_s3 + $0x358] sm:$0xff] }
 0x170   :  { %3688 = vmatprep.mubr.msk.f32.mxu1 %vm1156_vm2, %v1457_v51  ;;  %4976 = vmatprep.subr.bf16.mxu0 %v5567_v13  ;;  %v5001_v50 = vpack.c.bf16 %v3659_v47, %v3658_v46  ;;  %v5040_v0 = vpack.c.bf16 %v3687_v56, %v3686_v55  ;;  %v1326_v16 = vrot.slane %v6500_v54, 1  ;;  %v1462_v4 = vrot.slane %v1106_v60, 1  ;;  %v3703_v46 = vld [vmem:[%s7529_s3 + $0x368] sm:$0xff]  ;;  %v3708_v55 = vld [vmem:[%s7529_s3 + $0x390] sm:$0xff]  ;;  %v3709_v56 = vld [vmem:[%s7529_s3 + $0x398] sm:$0xff] }
 0x171   :  { %5012 = vmatprep.subr.bf16.mxu1 %v5567_v13  ;;  %v6525_v32 = vsel %vm1078_vm1, 0.0, %v6332_v41  ;;  %v6529_v5 = vsel %vm1078_vm1, %v6332_v41, 0.0  ;;  %v1101_v6 = vsel %vm1078_vm1, 0.0, %v6334_v42  ;;  %v1461_v9 = vrot.slane %v6339_v43, 1  ;;  %v3711_v60 = vld [vmem:[%s7529_s3 + $0x3a8] sm:$0xff] }
 0x172   :  { %5014 = vmatpush1.bf16.msra.mxu1 %v5013_v52  ;;  %v3660_v52 = vld [vmem:[%s7529_s3 + $0x230] sm:$0xff]  ;;  %v1105_v12 = vsel %vm1078_vm1, %v6334_v42, 0.0  ;;  %v1332_v18 = vrot.slane %v6525_v32, 1  ;;  %v1333_v43 = vrot.slane %v6529_v5, 1  ;;  %v3693_v42 = vld [vmem:[%s7529_s3 + $0x318] sm:$0xff]  ;;  %v1577_v23 = vrot.slane %v6307_v28, 2 }
 0x173   :  { %4978 = vmatpush1.bf16.msra.mxu0 %v4977_v49  ;;  %5015 = vmatprep.subr.bf16.mxu1 %v5567_v13  ;;  %v3684_v49 = vld [vmem:[%s7529_s3 + $0x2e0] sm:$0xff]  ;;  %v5004_v62 = vpack.c.bf16 %v3661_v53, %v3660_v52  ;;  %v1463_v22 = vsel %vm1325_vm4, %v1461_v9, %v1462_v4  ;;  %v3695_v28 = vld [vmem:[%s7529_s3 + $0x328] sm:$0xff] }
 0x174   :  { %4979 = vmatprep.subr.bf16.mxu0 %v5567_v13  ;;  %v5037_v51 = vpack.c.bf16 %v3685_v45, %v3684_v49  ;;  %v3704_v49 = vld [vmem:[%s7529_s3 + $0x370] sm:$0xff]  ;;  %v3705_v45 = vld [vmem:[%s7529_s3 + $0x378] sm:$0xff]  ;;  %v3707_v52 = vld [vmem:[%s7529_s3 + $0x388] sm:$0xff] }
 0x176   :  { %5017 = vmatpush1.bf16.msra.mxu1 %v5016_v59  ;;  %v1103_v59 = vsel %vm1078_vm1, %v6283_v17, 0.0 }
 0x177   :  { %4981 = vmatpush1.bf16.msra.mxu0 %v4980_v58  ;;  %5018 = vmatprep.subr.bf16.mxu1 %v5567_v13  ;;  %v1099_v58 = vsel %vm1078_vm1, 0.0, %v6283_v17  ;;  %v3690_v17 = vld [vmem:[%s7529_s3 + $0x300] sm:$0xff] }
 0x178   :  { %4982 = vmatprep.subr.bf16.mxu0 %v5567_v13  ;;  %v1452_v1 = vrot.slane %v1099_v58, 1  ;;  %v5043_v41 = vpack.c.bf16 %v3691_v30, %v3690_v17  ;;  %v5070_v58 = vpack.c.bf16 %v3709_v56, %v3708_v55  ;;  %v1579_v17 = vrot.slane %v6525_v32, 2  ;;  %v3719_v32 = vld [vmem:[%s7531_s5 + $0x70] sm:$0xff] }
 0x179   :  { %v1580_v30 = vrot.slane %v6529_v5, 2 }
 0x17a   :  { %5020 = vmatpush1.bf16.msra.mxu1 %v5019_v3  ;;  %v1327_v3 = vrot.slane %v6504_v57, 1 }
 0x17b   :  { %4984 = vmatpush1.bf16.msra.mxu0 %v4983_v2  ;;  %5021 = vmatprep.subr.bf16.mxu1 %v5567_v13  ;;  %v1453_v2 = vrot.slane %v1103_v59, 1  ;;  %v3710_v59 = vld [vmem:[%s7529_s3 + $0x3a0] sm:$0xff] }
 0x17c   :  { %4985 = vmatprep.subr.bf16.mxu0 %v5567_v13  ;;  %v1328_v14 = vsel %vm1325_vm4, %v1326_v16, %v1327_v3  ;;  %v1573_v16 = vrot.slane %v6500_v54, 2  ;;  %v1574_v3 = vrot.slane %v6504_v57, 2  ;;  %v3717_v54 = vld [vmem:[%s7531_s5 + $0x60] sm:$0xff]  ;;  %v3718_v57 = vld [vmem:[%s7531_s5 + $0x68] sm:$0xff] }
 0x17d   :  { %v1454_v15 = vsel %vm1325_vm4, %v1452_v1, %v1453_v2  ;;  %v3713_v1 = vld [vmem:[%s7529_s3 + $0x3b8] sm:$0xff]  ;;  %v5078_v9 = vpack.c.bf16 %v3718_v57, %v3717_v54 }
 0x17e   :  { %5023 = vmatpush1.bf16.msra.mxu1 %v5022_v11  ;;  %v1336_v11 = vrot.slane %v6355_v48, 1  ;;  %v3692_v48 = vld [vmem:[%s7529_s3 + $0x310] sm:$0xff]  ;;  %v1575_v4 = vsel %vm1572_vm5, %v1573_v16, %v1574_v3 }
 0x17f   :  { %4987 = vmatpush1.bf16.msra.mxu0 %v4986_v10  ;;  %5024 = vmatprep.subr.bf16.mxu1 %v5567_v13  ;;  %v1335_v10 = vrot.slane %v6342_v44, 1  ;;  %v1459_v44 = vrot.slane %v1105_v12, 1  ;;  %v5046_v63 = vpack.c.bf16 %v3693_v42, %v3692_v48  ;;  %v3728_v48 = vld [vmem:[%s7531_s5 + $0xb8] sm:$0xff]  ;;  %v1721_v42 = vld [vmem:[%s7531_s5] sm:$0xff] }
 0x180   :  { %4988 = vmatprep.subr.bf16.mxu0 %v5567_v13 }
 0x181   :  { %v1337_v21 = vsel %vm1325_vm4, %v1335_v10, %v1336_v11  ;;  %v3721_v10 = vld [vmem:[%s7531_s5 + $0x80] sm:$0xff]  ;;  %v3722_v11 = vld [vmem:[%s7531_s5 + $0x88] sm:$0xff] }
 0x182   :  { %5026 = vmatpush1.bf16.msra.mxu1 %v5025_v20  ;;  %v1576_v20 = vrot.slane %v6298_v25, 2  ;;  %v3694_v25 = vld [vmem:[%s7529_s3 + $0x320] sm:$0xff]  ;;  %v5086_v12 = vpack.c.bf16 %v3722_v11, %v3721_v10 }
 0x183   :  { %4990 = vmatpush1.bf16.msra.mxu0 %v4989_v19  ;;  %5027 = vmatprep.subr.bf16.mxu1 %v5567_v13  ;;  %v1458_v19 = vrot.slane %v1101_v6, 1  ;;  %v5049_v29 = vpack.c.bf16 %v3695_v28, %v3694_v25  ;;  %v1581_v6 = vsel %vm1572_vm5, %v1579_v17, %v1580_v30 }
 0x184   :  { %4991 = vmatprep.subr.bf16.mxu0 %v5567_v13  ;;  %v1578_v27 = vsel %vm1572_vm5, %v1576_v20, %v1577_v23 }
 0x186   :  { %5029 = vmatpush1.bf16.msra.mxu1 %v5028_v26  ;;  %v1460_v26 = vsel %vm1325_vm4, %v1458_v19, %v1459_v44  ;;  %v3727_v44 = vld [vmem:[%s7531_s5 + $0xb0] sm:$0xff] }
 0x187   :  { %4993 = vmatpush1.bf16.msra.mxu0 %v4992_v24  ;;  %5030 = vmatprep.subr.bf16.mxu1 %v5567_v13  ;;  %v1334_v24 = vsel %vm1325_vm4, %v1332_v18, %v1333_v43  ;;  %v3725_v18 = vld [vmem:[%s7531_s5 + $0xa0] sm:$0xff]  ;;  %v3726_v43 = vld [vmem:[%s7531_s5 + $0xa8] sm:$0xff]  ;;  %v5098_v20 = vpack.c.bf16 %v3728_v48, %v3727_v44 }
 0x188   :  { %4994 = vmatprep.subr.bf16.mxu0 %v5567_v13  ;;  %v5094_v19 = vpack.c.bf16 %v3726_v43, %v3725_v18 }
 0x18a   :  { %5032 = vmatpush1.bf16.msra.mxu1 %v5031_v34  ;;  %v3698_v34 = vld [vmem:[%s7529_s3 + $0x340] sm:$0xff] }
 0x18b   :  { %4996 = vmatpush1.bf16.msra.mxu0 %v4995_v33  ;;  %5033 = vmatprep.subr.bf16.mxu1 %v5567_v13  ;;  %v5052_v33 = vpack.c.bf16 %v3697_v31, %v3696_v8  ;;  %v5055_v36 = vpack.c.bf16 %v3699_v35, %v3698_v34 }
 0x18c   :  { %4997 = vmatprep.subr.bf16.mxu0 %v5567_v13 }
 0x18e   :  { %5035 = vmatpush1.bf16.msra.mxu1 %v5034_v40  ;;  %v3702_v40 = vld [vmem:[%s7529_s3 + $0x360] sm:$0xff] }
 0x18f   :  { %4999 = vmatpush1.bf16.msra.mxu0 %v4998_v39  ;;  %5036 = vmatprep.subr.bf16.mxu1 %v5567_v13  ;;  %v5058_v39 = vpack.c.bf16 %v3701_v38, %v3700_v37  ;;  %v5061_v47 = vpack.c.bf16 %v3703_v46, %v3702_v40 }
 0x190   :  { %5000 = vmatprep.subr.bf16.mxu0 %v5567_v13 }
 0x192   :  { %5038 = vmatpush1.bf16.msra.mxu1 %v5037_v51  ;;  %v3706_v51 = vld [vmem:[%s7529_s3 + $0x380] sm:$0xff] }
 0x193   :  { %5002 = vmatpush1.bf16.msra.mxu0 %v5001_v50  ;;  %5039 = vmatprep.subr.bf16.mxu1 %v5567_v13  ;;  %v5064_v50 = vpack.c.bf16 %v3705_v45, %v3704_v49  ;;  %v5067_v53 = vpack.c.bf16 %v3707_v52, %v3706_v51  ;;  %v3716_v51 = vld [vmem:[%s7530_s4] ss:$0 sm:$0xff] }
 0x194   :  { %5003 = vmatprep.subr.bf16.mxu0 %v5567_v13 }
 0x196   :  { %5041 = vmatpush1.bf16.msra.mxu1 %v5040_v0  ;;  %v3712_v0 = vld [vmem:[%s7529_s3 + $0x3b0] sm:$0xff] }
 0x197   :  { %5005 = vmatpush1.bf16.msra.mxu0 %v5004_v62  ;;  %v5073_v62 = vpack.c.bf16 %v3711_v60, %v3710_v59  ;;  %v5076_v2 = vpack.c.bf16 %v3713_v1, %v3712_v0  ;;  %5079 = vmatprep.subr.bf16.mxu1 %v5078_v9 }
 0x198   :  { %5042 = vmatprep.subr.bf16.mxu0 %v5567_v13 }
 0x199   :  { %1560 = vmatmul.mubr.f32.vlgmr.msra.gmra.mrb[8].mxu1 %v1454_v15  ;;  %v3724_v15 = vld [vmem:[%s7531_s5 + $0x98] sm:$0xff] }
 0x19a   :  { %1434 = vmatmul.mubr.f32.vlgmr.msra.gmra.mrb[8].mxu0 %v1328_v14  ;;  %3689 = vmatprep.mubr.msk.f32.mxu1 %vm1156_vm2, %v1463_v22  ;;  %v3723_v14 = vld [vmem:[%s7531_s5 + $0x90] sm:$0xff] }
 0x19b   :  { %3663 = vmatprep.mubr.msk.f32.mxu0 %vm1156_vm2, %v1337_v21  ;;  %5044 = vmatpush1.bf16.msra.mxu0 %v5043_v41  ;;  %v5090_v41 = vpack.c.bf16 %v3724_v15, %v3723_v14  ;;  %v1722_v21 = vld [vmem:[%s7531_s5 + $0x8] sm:$0xff] }
 0x19c   :  { %5045 = vmatprep.subr.bf16.mxu0 %v5567_v13  ;;  %5081 = vmatpush3.bf16.msra.mxu1 %v5078_v9  ;;  %v6680_v25 = vpack.c.bf16 %v1722_v21, %v1721_v42  ;;  %v1725_v21 = vld [vmem:[%s7531_s5 + $0x20] sm:$0xff] }
 0x19d   :  { %1565 = vmatmul.mubr.f32.gmra.mrb[10].mxu1 %v1460_v26 }
 0x19e   :  { %1439 = vmatmul.mubr.f32.gmra.mrb[10].mxu0 %v1334_v24 }
 0x19f   :  { %3714 = vmatprep.mubr.msk.f32.mxu0 %vm1156_vm2, %v1578_v27  ;;  %5047 = vmatpush1.bf16.msra.mxu0 %v5046_v63 }
 0x1a0   :  { %5048 = vmatprep.subr.bf16.mxu0 %v5567_v13 }
 0x1a3   :  { %5050 = vmatpush1.bf16.msra.mxu0 %v5049_v29 }
 0x1a4   :  { %5051 = vmatprep.subr.bf16.mxu0 %v5567_v13 }
 0x1a7   :  { %5053 = vmatpush1.bf16.msra.mxu0 %v5052_v33 }
 0x1a8   :  { %5054 = vmatprep.subr.bf16.mxu0 %v5567_v13 }
 0x1ab   :  { %5056 = vmatpush1.bf16.msra.mxu0 %v5055_v36 }
 0x1ac   :  { %5057 = vmatprep.subr.bf16.mxu0 %v5567_v13 }
 0x1af   :  { %5059 = vmatpush1.bf16.msra.mxu0 %v5058_v39 }
 0x1b0   :  { %5060 = vmatprep.subr.bf16.mxu0 %v5567_v13 }
 0x1b3   :  { %5062 = vmatpush1.bf16.msra.mxu0 %v5061_v47 }
 0x1b4   :  { %5063 = vmatprep.subr.bf16.mxu0 %v5567_v13 }
 0x1b7   :  { %5065 = vmatpush1.bf16.msra.mxu0 %v5064_v50 }
 0x1b8   :  { %5066 = vmatprep.subr.bf16.mxu0 %v5567_v13 }
 0x1bb   :  { %5068 = vmatpush1.bf16.msra.mxu0 %v5067_v53 }
 0x1bc   :  { %5069 = vmatprep.subr.bf16.mxu0 %v5567_v13 }
 0x1bf   :  { %5071 = vmatpush1.bf16.msra.mxu0 %v5070_v58 }
 0x1c0   :  { %5072 = vmatprep.subr.bf16.mxu0 %v5567_v13 }
 0x1c3   :  { %5074 = vmatpush1.bf16.msra.mxu0 %v5073_v62 }
 0x1c4   :  { %5075 = vmatprep.subr.bf16.mxu0 %v5567_v13 }
 0x1c7   :  { %5077 = vmatpush1.bf16.msra.mxu0 %v5076_v2 }
 0x1ca   :  { %1681 = vmatmul.mubr.f32.vlgmr.msra.gmra.mrb[12].mxu0 %v1575_v4 }
 0x1cb   :  { %3715 = vmatprep.mubr.msk.f32.mxu0 %vm1156_vm2, %v6387_v61  ;;  %v3720_v61 = vld [vmem:[%s7531_s5 + $0x78] sm:$0xff] }
 0x1cc   :  { %v5082_v5 = vpack.c.bf16 %v3720_v61, %v3719_v32  ;;  %v1723_v61 = vld [vmem:[%s7531_s5 + $0x10] sm:$0xff] }
 0x1ce   :  { %1686 = vmatmul.mubr.f32.gmra.mrb[14].mxu0 %v1581_v6  ;;  %5083 = vmatprep.subr.bf16.mxu1 %v5082_v5 }
 0x1cf   :  { %5085 = vmatpush3.bf16.msra.mxu1 %v5082_v5  ;;  %v1724_v5 = vld [vmem:[%s7531_s5 + $0x18] sm:$0xff] }
 0x1d0   :  { %5087 = vmatprep.subr.bf16.mxu1 %v5086_v12  ;;  %v5106_v43 = vpack.c.bf16 %v1724_v5, %v1723_v61 }
 0x1d3   :  { %5089 = vmatpush3.bf16.msra.mxu1 %v5086_v12 }
 0x1d4   :  { %5091 = vmatprep.subr.bf16.mxu1 %v5090_v41 }
 0x1d7   :  { %5093 = vmatpush3.bf16.msra.mxu1 %v5090_v41 }
 0x1d8   :  { %5095 = vmatprep.subr.bf16.mxu1 %v5094_v19 }
 0x1db   :  { %5097 = vmatpush3.bf16.msra.mxu1 %v5094_v19 }
 0x1dc   :  { %5099 = vmatprep.subr.bf16.mxu1 %v5098_v20 }
 0x1df   :  { %5101 = vmatpush3.bf16.msra.mxu1 %v5098_v20 }
 0x1e0   :  { %5103 = vmatprep.subr.bf16.mxu1 %v6680_v25 }
 0x23c   :  { %v1310_v23 = vpop.f32.mrb[4].mxu1 }
 0x23d   :  { %v1229_v22 = vpop.f32.mrb[4].mxu0  ;;  %v1312_v26 = vpop.f32.mrb[5].mxu1 }
 0x23e   :  { %v1311_v63 = vadd.f32 %v1310_v23, %v1229_v22  ;;  %v1231_v24 = vpop.f32.mrb[5].mxu0  ;;  %v1726_v22 = vld [vmem:[%s7531_s5 + $0x28] sm:$0xff] }
 0x23f   :  { %v5110_v26 = vpack.c.bf16 %v1726_v22, %v1725_v21  ;;  %v3762_v21 = vld [vmem:[%s7531_s5 + $0x188] sm:$0xff] }
 0x240   :  { %v1315_v27 = vpop.f32.mrb[6].mxu1 }
 0x241   :  { %v1234_v28 = vpop.f32.mrb[6].mxu0  ;;  %v1317_v31 = vpop.f32.mrb[7].mxu1 }
 0x242   :  { %v1316_v29 = vadd.f32 %v1315_v27, %v1234_v28  ;;  %v1236_v8 = vpop.f32.mrb[7].mxu0  ;;  %v1727_v28 = vld [vmem:[%s7531_s5 + $0x30] sm:$0xff]  ;;  %v1728_v27 = vld [vmem:[%s7531_s5 + $0x38] sm:$0xff] }
 0x243   :  { %v1730_v8 = vld [vmem:[%s7531_s5 + $0x48] sm:$0xff] }
 0x26c   :  { %v1561_v34 = vpop.f32.mrb[8].mxu1 }
 0x26d   :  { %v1435_v33 = vpop.f32.mrb[8].mxu0  ;;  %v1563_v37 = vpop.f32.mrb[9].mxu1 }
 0x26e   :  { %v1444_v35 = vadd.f32 %v1435_v33, %v1311_v63  ;;  %v1437_v36 = vpop.f32.mrb[9].mxu0  ;;  %v1731_v33 = vld [vmem:[%s7531_s5 + $0x50] sm:$0xff]  ;;  %v3734_v37 = vld [vmem:[%s7531_s5 + $0xc8] sm:$0xff] }
 0x26f   :  { %v3733_v36 = vld [vmem:[%s7531_s5 + $0xc0] sm:$0xff] }
 0x270   :  { %v1570_v38 = vadd.f32 %v1561_v34, %v1444_v35  ;;  %v1566_v40 = vpop.f32.mrb[10].mxu1  ;;  %v1732_v34 = vld [vmem:[%s7531_s5 + $0x58] sm:$0xff] }
 0x271   :  { %v1440_v39 = vpop.f32.mrb[10].mxu0  ;;  %v1568_v49 = vpop.f32.mrb[11].mxu1  ;;  %v5122_v35 = vpack.c.bf16 %v1732_v34, %v1731_v33 }
 0x272   :  { %v1445_v46 = vadd.f32 %v1440_v39, %v1316_v29  ;;  %v1442_v47 = vpop.f32.mrb[11].mxu0  ;;  %v5114_v29 = vpack.c.bf16 %v1728_v27, %v1727_v28  ;;  %v3735_v39 = vld [vmem:[%s7531_s5 + $0xd0] sm:$0xff]  ;;  %v3765_v27 = vld [vmem:[%s7531_s5 + $0x1a0] sm:$0xff] }
 0x274   :  { %v1571_v45 = vadd.f32 %v1566_v40, %v1445_v46  ;;  %v3736_v40 = vld [vmem:[%s7531_s5 + $0xd8] sm:$0xff] }
 0x275   :  { %v5130_v49 = vpack.c.bf16 %v3736_v40, %v3735_v39  ;;  %v3777_v39 = vld [vmem:[%s7533_s7 + $0x68] sm:$0xff] }
 0x29d   :  { %v1682_v50 = vpop.f32.mrb[12].mxu0 }
 0x29e   :  { %v1691_v52 = vadd.f32 %v1682_v50, %v1570_v38  ;;  %v1684_v53 = vpop.f32.mrb[13].mxu0  ;;  %v5126_v38 = vpack.c.bf16 %v3734_v37, %v3733_v36  ;;  %v3738_v50 = vld [vmem:[%s7531_s5 + $0xe8] sm:$0xff]  ;;  %v3772_v36 = vld [vmem:[%s7531_s5 + $0x1d8] sm:$0xff] }
 0x29f   :  { %v3739_v53 = vld [vmem:[%s7531_s5 + $0xf0] sm:$0xff] }
 0x2a0   :  { %v1700_v55 = vadd.f32 %v3716_v51, %v1691_v52 }
 0x2a1   :  { %v1687_v56 = vpop.f32.mrb[14].mxu0 }
 0x2a2   :  { %v1702_v58 = vmul.f32 0.5, %v1700_v55  ;;  %v1692_v59 = vadd.f32 %v1687_v56, %v1571_v45  ;;  %v1689_v60 = vpop.f32.mrb[15].mxu0  ;;  %v3737_v45 = vld [vmem:[%s7531_s5 + $0xe0] sm:$0xff]  ;;  %v3740_v55 = vld [vmem:[%s7531_s5 + $0xf8] sm:$0xff] }
 0x2a3   :  { %v5134_v52 = vpack.c.bf16 %v3738_v50, %v3737_v45  ;;  %v5138_v56 = vpack.c.bf16 %v3740_v55, %v3739_v53  ;;  %v3781_v45 = vld [vmem:[%s7533_s7 + $0x88] sm:$0xff]  ;;  %v3784_v55 = vld [vmem:[%s7533_s7 + $0xa0] sm:$0xff] }
 0x2a4   :  { %5530 = vtanh.f32 %v1702_v58  ;;  %v1701_v62 = vadd.f32 %v3716_v51, %v1692_v59  ;;  %v3741_v58 = vld [vmem:[%s7531_s5 + $0x100] sm:$0xff]  ;;  %v3742_v59 = vld [vmem:[%s7531_s5 + $0x108] sm:$0xff] }
 0x2a5   :  { %v5142_v60 = vpack.c.bf16 %v3742_v59, %v3741_v58  ;;  %v3786_v59 = vld [vmem:[%s7533_s7 + $0xb0] sm:$0xff] }
 0x2a6   :  { %v1703_v0 = vmul.f32 0.5, %v1701_v62  ;;  %v3743_v62 = vld [vmem:[%s7531_s5 + $0x110] sm:$0xff] }
 0x2a8   :  { %5532 = vtanh.f32 %v1703_v0  ;;  %v3744_v0 = vld [vmem:[%s7531_s5 + $0x118] sm:$0xff] }
 0x2ae   :  { %v5531_v1 = vpop.eup %5530 }
 0x2af   :  { %v1706_v2 = vmul.f32 0.5, %v5531_v1  ;;  %v5146_v1 = vpack.c.bf16 %v3744_v0, %v3743_v62  ;;  %v2243_v0 = vld [vmem:[%s7533_s7] sm:$0xff] }
 0x2b1   :  { %v1708_v16 = vadd.f32 0.5, %v1706_v2  ;;  %v3747_v2 = vld [vmem:[%s7531_s5 + $0x120] sm:$0xff] }
 0x2b2   :  { %v5533_v3 = vpop.eup %5532 }
 0x2b3   :  { %v1712_v4 = vrot.slane %v1708_v16, 6  ;;  %v1707_v17 = vmul.f32 0.5, %v5533_v3  ;;  %v3748_v16 = vld [vmem:[%s7531_s5 + $0x128] sm:$0xff] }
 0x2b4   :  { %v5150_v3 = vpack.c.bf16 %v3748_v16, %v3747_v2  ;;  %v3775_v16 = vld [vmem:[%s7532_s6] ss:$0 sm:$0xff] }
 0x2b5   :  { %v6687_v30 = vsel %vm1716_vm6, 0.0, %v1712_v4  ;;  %v6690_v6 = vsel %vm1716_vm6, %v1712_v4, 0.0  ;;  %v1709_v54 = vadd.f32 0.5, %v1707_v17 }
 0x2b6   :  { %v1737_v57 = vrot.slane %v6687_v30, 1  ;;  %v1738_v9 = vrot.slane %v6690_v6, 1  ;;  %v2116_v10 = vrot.slane %v6687_v30, 4  ;;  %v2117_v12 = vrot.slane %v6690_v6, 4 }
 0x2b7   :  { %v1713_v32 = vrot.slane %v1709_v54, 6  ;;  %v1914_v46 = vrot.slane %v6687_v30, 2  ;;  %v1915_v47 = vrot.slane %v6690_v6, 2  ;;  %v3749_v54 = vld [vmem:[%s7531_s5 + $0x130] sm:$0xff] }
 0x2b8   :  { %v1739_v11 = vsel %vm1325_vm4, %v1737_v57, %v1738_v9  ;;  %v6715_v48 = vsel %vm2115_vm7, %v2116_v10, %v2117_v12  ;;  %v3750_v57 = vld [vmem:[%s7531_s5 + $0x138] sm:$0xff]  ;;  %v2015_v9 = vrot.slane %v6687_v30, 3  ;;  %v3751_v10 = vld [vmem:[%s7531_s5 + $0x140] sm:$0xff] }
 0x2b9   :  { %v6704_v14 = vsel %vm1716_vm6, 0.0, %v1713_v32  ;;  %v6707_v15 = vsel %vm1716_vm6, %v1713_v32, 0.0  ;;  %4196 = vmatprep.mubr.msk.f32.mxu1 %vm96_vm0, %v1739_v11  ;;  %v1916_v51 = vsel %vm1572_vm5, %v1914_v46, %v1915_v47  ;;  %v2016_v32 = vrot.slane %v6690_v6, 3  ;;  %v3752_v11 = vld [vmem:[%s7531_s5 + $0x148] sm:$0xff]  ;;  %v3753_v6 = vld [vmem:[%s7531_s5 + $0x150] sm:$0xff]  ;;  %v3779_v47 = vld [vmem:[%s7533_s7 + $0x78] sm:$0xff] }
 0x2ba   :  { %v1740_v41 = vrot.slane %v6704_v14, 1  ;;  %v1741_v18 = vrot.slane %v6707_v15, 1  ;;  %v2018_v19 = vrot.slane %v6704_v14, 3  ;;  %v2019_v44 = vrot.slane %v6707_v15, 3  ;;  %v3778_v46 = vld [vmem:[%s7533_s7 + $0x70] sm:$0xff] }
 0x2bb   :  { %v2119_v42 = vrot.slane %v6704_v14, 4  ;;  %v2120_v23 = vrot.slane %v6707_v15, 4  ;;  %v1917_v4 = vrot.slane %v6704_v14, 2  ;;  %v1918_v17 = vrot.slane %v6707_v15, 2 }
 0x2bc   :  { %v1742_v20 = vsel %vm1325_vm4, %v1740_v41, %v1741_v18  ;;  %v6728_v63 = vsel %vm2014_vm8, %v2018_v19, %v2019_v44  ;;  %v5154_v61 = vpack.c.bf16 %v3750_v57, %v3749_v54  ;;  %v2017_v12 = vsel %vm2014_vm8, %v2015_v9, %v2016_v32  ;;  %v3755_v41 = vld [vmem:[%s7531_s5 + $0x160] sm:$0xff]  ;;  %v3756_v18 = vld [vmem:[%s7531_s5 + $0x168] sm:$0xff]  ;;  %v3757_v19 = vld [vmem:[%s7531_s5 + $0x170] sm:$0xff] }
 0x2bd   :  { %4197 = vmatmul.mubr.msk.f32.vlgmr.msra.gmra.mrb[12].mxu1 %vm96_vm0, %v1742_v20  ;;  %v6734_v24 = vsel %vm2115_vm7, %v2119_v42, %v2120_v23  ;;  %v1919_v5 = vsel %vm1572_vm5, %v1917_v4, %v1918_v17  ;;  %v3758_v44 = vld [vmem:[%s7531_s5 + $0x178] sm:$0xff]  ;;  %v3761_v20 = vld [vmem:[%s7531_s5 + $0x180] sm:$0xff]  ;;  %v3763_v23 = vld [vmem:[%s7531_s5 + $0x190] sm:$0xff] }
 0x2be   :  { %5105 = vmatpush3.bf16.msra.mxu1 %v6680_v25  ;;  %4223 = vmatprep.mubr.msk.f32.mxu1 %vm96_vm0, %v6687_v30  ;;  %v1729_v25 = vld [vmem:[%s7531_s5 + $0x40] sm:$0xff]  ;;  %v5158_v30 = vpack.c.bf16 %v3752_v11, %v3751_v10  ;;  %v5170_v42 = vpack.c.bf16 %v3758_v44, %v3757_v19  ;;  %v5174_v22 = vpack.c.bf16 %v3762_v21, %v3761_v20  ;;  %v2245_v44 = vld [vmem:[%s7533_s7 + $0x10] sm:$0xff] }
 0x2bf   :  { %5107 = vmatprep.subr.bf16.mxu1 %v5106_v43  ;;  %v5118_v31 = vpack.c.bf16 %v1730_v8, %v1729_v25  ;;  %v3767_v8 = vld [vmem:[%s7531_s5 + $0x1b0] sm:$0xff] }
 0x2c2   :  { %5109 = vmatpush3.bf16.msra.mxu1 %v5106_v43  ;;  %v5166_v43 = vpack.c.bf16 %v3756_v18, %v3755_v41 }
 0x2c3   :  { %5111 = vmatprep.subr.bf16.mxu1 %v5110_v26 }
 0x2c6   :  { %5113 = vmatpush3.bf16.msra.mxu1 %v5110_v26  ;;  %v3764_v26 = vld [vmem:[%s7531_s5 + $0x198] sm:$0xff] }
 0x2c7   :  { %5115 = vmatprep.subr.bf16.mxu1 %v5114_v29  ;;  %v5178_v28 = vpack.c.bf16 %v3764_v26, %v3763_v23 }
 0x2ca   :  { %5117 = vmatpush3.bf16.msra.mxu1 %v5114_v29  ;;  %v3766_v29 = vld [vmem:[%s7531_s5 + $0x1a8] sm:$0xff] }
 0x2cb   :  { %5119 = vmatprep.subr.bf16.mxu1 %v5118_v31  ;;  %v5182_v25 = vpack.c.bf16 %v3766_v29, %v3765_v27  ;;  %v2247_v27 = vld [vmem:[%s7533_s7 + $0x20] sm:$0xff]  ;;  %v2248_v29 = vld [vmem:[%s7533_s7 + $0x28] sm:$0xff] }
 0x2ce   :  { %5121 = vmatpush3.bf16.msra.mxu1 %v5118_v31  ;;  %v3768_v31 = vld [vmem:[%s7531_s5 + $0x1b8] sm:$0xff] }
 0x2cf   :  { %5123 = vmatprep.subr.bf16.mxu1 %v5122_v35  ;;  %v5186_v33 = vpack.c.bf16 %v3768_v31, %v3767_v8 }
 0x2d2   :  { %5125 = vmatpush3.bf16.msra.mxu1 %v5122_v35  ;;  %v3771_v35 = vld [vmem:[%s7531_s5 + $0x1d0] sm:$0xff] }
 0x2d3   :  { %5127 = vmatprep.subr.bf16.mxu1 %v5126_v38  ;;  %v5194_v37 = vpack.c.bf16 %v3772_v36, %v3771_v35  ;;  %v5230_v35 = vpack.c.bf16 %v2248_v29, %v2247_v27  ;;  %v3816_v27 = vld [vmem:[%s7533_s7 + $0x170] sm:$0xff]  ;;  %v3817_v29 = vld [vmem:[%s7533_s7 + $0x178] sm:$0xff] }
 0x2d5   :  { %4224 = vmatmul.mubr.msk.f32.vlgmr.msra.gmra.mrb[12].mxu1 %vm96_vm0, %v6704_v14  ;;  %v3754_v14 = vld [vmem:[%s7531_s5 + $0x158] sm:$0xff] }
 0x2d6   :  { %5129 = vmatpush3.bf16.msra.mxu1 %v5126_v38  ;;  %4250 = vmatprep.mubr.msk.f32.mxu1 %vm96_vm0, %v1916_v51  ;;  %v5162_v15 = vpack.c.bf16 %v3754_v14, %v3753_v6  ;;  %v3776_v38 = vld [vmem:[%s7533_s7 + $0x60] sm:$0xff]  ;;  %v3782_v51 = vld [vmem:[%s7533_s7 + $0x90] sm:$0xff] }
 0x2d7   :  { %5131 = vmatprep.subr.bf16.mxu1 %v5130_v49  ;;  %v5198_v40 = vpack.c.bf16 %v3777_v39, %v3776_v38  ;;  %v2250_v38 = vld [vmem:[%s7533_s7 + $0x38] sm:$0xff] }
 0x2d9   :  { %5199 = vmatprep.subr.bf16.mxu0 %v5198_v40 }
 0x2da   :  { %5133 = vmatpush3.bf16.msra.mxu1 %v5130_v49  ;;  %5201 = vmatpush3.bf16.msra.mxu0 %v5198_v40  ;;  %v3780_v49 = vld [vmem:[%s7533_s7 + $0x80] sm:$0xff] }
 0x2db   :  { %5135 = vmatprep.subr.bf16.mxu1 %v5134_v52  ;;  %v5206_v50 = vpack.c.bf16 %v3781_v45, %v3780_v49  ;;  %v2251_v40 = vld [vmem:[%s7533_s7 + $0x40] sm:$0xff]  ;;  %v2254_v49 = vld [vmem:[%s7533_s7 + $0x58] sm:$0xff] }
 0x2de   :  { %5137 = vmatpush3.bf16.msra.mxu1 %v5134_v52  ;;  %v3783_v52 = vld [vmem:[%s7533_s7 + $0x98] sm:$0xff] }
 0x2df   :  { %5139 = vmatprep.subr.bf16.mxu1 %v5138_v56  ;;  %v5210_v53 = vpack.c.bf16 %v3783_v52, %v3782_v51  ;;  %v3793_v51 = vld [vmem:[%s7533_s7 + $0xc8] sm:$0xff] }
 0x2e2   :  { %5141 = vmatpush3.bf16.msra.mxu1 %v5138_v56  ;;  %v3785_v56 = vld [vmem:[%s7533_s7 + $0xa8] sm:$0xff] }
 0x2e3   :  { %5143 = vmatprep.subr.bf16.mxu1 %v5142_v60  ;;  %v5214_v58 = vpack.c.bf16 %v3785_v56, %v3784_v55  ;;  %v3795_v55 = vld [vmem:[%s7533_s7 + $0xd8] sm:$0xff] }
 0x2e6   :  { %5145 = vmatpush3.bf16.msra.mxu1 %v5142_v60  ;;  %v3787_v60 = vld [vmem:[%s7533_s7 + $0xb8] sm:$0xff] }
 0x2e7   :  { %5147 = vmatprep.subr.bf16.mxu1 %v5146_v1  ;;  %v5218_v62 = vpack.c.bf16 %v3787_v60, %v3786_v59  ;;  %v3796_v60 = vld [vmem:[%s7533_s7 + $0xe0] sm:$0xff] }
 0x2ea   :  { %5149 = vmatpush3.bf16.msra.mxu1 %v5146_v1  ;;  %v2244_v1 = vld [vmem:[%s7533_s7 + $0x8] sm:$0xff] }
 0x2eb   :  { %5151 = vmatprep.subr.bf16.mxu1 %v5150_v3  ;;  %v5222_v2 = vpack.c.bf16 %v2244_v1, %v2243_v0 }
 0x2ed   :  { %4251 = vmatmul.mubr.msk.f32.vlgmr.msra.gmra.mrb[12].mxu1 %vm96_vm0, %v1919_v5 }
 0x2ee   :  { %5153 = vmatpush3.bf16.msra.mxu1 %v5150_v3  ;;  %4277 = vmatprep.mubr.msk.f32.mxu1 %vm96_vm0, %v2017_v12 }
 0x2ef   :  { %5155 = vmatprep.subr.bf16.mxu1 %v5154_v61 }
 0x2f2   :  { %5157 = vmatpush3.bf16.msra.mxu1 %v5154_v61 }
 0x2f3   :  { %5159 = vmatprep.subr.bf16.mxu1 %v5158_v30 }
 0x2f6   :  { %5161 = vmatpush3.bf16.msra.mxu1 %v5158_v30 }
 0x2f7   :  { %5163 = vmatprep.subr.bf16.mxu1 %v5162_v15 }
 0x2fa   :  { %5165 = vmatpush3.bf16.msra.mxu1 %v5162_v15 }
 0x2fb   :  { %5167 = vmatprep.subr.bf16.mxu1 %v5166_v43 }
 0x2fe   :  { %5169 = vmatpush3.bf16.msra.mxu1 %v5166_v43 }
 0x2ff   :  { %5171 = vmatprep.subr.bf16.mxu1 %v5170_v42 }
 0x302   :  { %5173 = vmatpush3.bf16.msra.mxu1 %v5170_v42  ;;  %v2246_v42 = vld [vmem:[%s7533_s7 + $0x18] sm:$0xff] }
 0x303   :  { %5175 = vmatprep.subr.bf16.mxu1 %v5174_v22  ;;  %v5226_v23 = vpack.c.bf16 %v2246_v42, %v2245_v44 }
 0x305   :  { %4278 = vmatmul.mubr.msk.f32.vlgmr.msra.gmra.mrb[12].mxu1 %vm96_vm0, %v6728_v63  ;;  %v3769_v63 = vld [vmem:[%s7531_s5 + $0x1c0] sm:$0xff] }
 0x306   :  { %5177 = vmatpush3.bf16.msra.mxu1 %v5174_v22  ;;  %4304 = vmatprep.mubr.msk.f32.mxu1 %vm96_vm0, %v6715_v48  ;;  %v3770_v48 = vld [vmem:[%s7531_s5 + $0x1c8] sm:$0xff] }
 0x307   :  { %5179 = vmatprep.subr.bf16.mxu1 %v5178_v28  ;;  %v5190_v34 = vpack.c.bf16 %v3770_v48, %v3769_v63 }
 0x30a   :  { %5181 = vmatpush3.bf16.msra.mxu1 %v5178_v28 }
 0x30b   :  { %5183 = vmatprep.subr.bf16.mxu1 %v5182_v25 }
 0x30e   :  { %5185 = vmatpush3.bf16.msra.mxu1 %v5182_v25 }
 0x30f   :  { %5187 = vmatprep.subr.bf16.mxu1 %v5186_v33 }
 0x312   :  { %5189 = vmatpush3.bf16.msra.mxu1 %v5186_v33 }
 0x313   :  { %5191 = vmatprep.subr.bf16.mxu1 %v5190_v34 }
 0x316   :  { %5193 = vmatpush3.bf16.msra.mxu1 %v5190_v34 }
 0x317   :  { %5195 = vmatprep.subr.bf16.mxu1 %v5194_v37 }
 0x31a   :  { %5197 = vmatpush3.bf16.msra.mxu1 %v5194_v37  ;;  %v2249_v37 = vld [vmem:[%s7533_s7 + $0x30] sm:$0xff] }
 0x31b   :  { %5318 = vmatprep.subr.bf16.mxu1 %v5567_v13  ;;  %v5234_v39 = vpack.c.bf16 %v2250_v38, %v2249_v37  ;;  %v3824_v38 = vld [vmem:[%s7533_s7 + $0x1a0] sm:$0xff] }
 0x31d   :  { %4305 = vmatmul.mubr.msk.f32.vlgmr.msra.gmra.mrb[12].mxu1 %vm96_vm0, %v6734_v24  ;;  %v5202_v24 = vpack.c.bf16 %v3779_v47, %v3778_v46  ;;  %v2252_v46 = vld [vmem:[%s7533_s7 + $0x48] sm:$0xff] }
 0x31e   :  { %v5238_v47 = vpack.c.bf16 %v2252_v46, %v2251_v40  ;;  %v3826_v46 = vld [vmem:[%s7533_s7 + $0x1b0] sm:$0xff]  ;;  %4466 = vmatprep.mubr.msk.f32.mxu1 %vm5568_vm9, %v5566_v7 }
 0x31f   :  { %5203 = vmatprep.subr.bf16.mxu0 %v5202_v24 }
 0x320   :  { %5205 = vmatpush3.bf16.msra.mxu0 %v5202_v24  ;;  %v2253_v24 = vld [vmem:[%s7533_s7 + $0x50] sm:$0xff] }
 0x321   :  { %5207 = vmatprep.subr.bf16.mxu0 %v5206_v50  ;;  %v5242_v45 = vpack.c.bf16 %v2254_v49, %v2253_v24 }
 0x324   :  { %5209 = vmatpush3.bf16.msra.mxu0 %v5206_v50  ;;  %v3792_v50 = vld [vmem:[%s7533_s7 + $0xc0] sm:$0xff] }
 0x325   :  { %5211 = vmatprep.subr.bf16.mxu0 %v5210_v53  ;;  %v5246_v52 = vpack.c.bf16 %v3793_v51, %v3792_v50  ;;  %v3831_v50 = vld [vmem:[%s7533_s7 + $0x1d8] sm:$0xff] }
 0x328   :  { %5213 = vmatpush3.bf16.msra.mxu0 %v5210_v53  ;;  %v3794_v53 = vld [vmem:[%s7533_s7 + $0xd0] sm:$0xff] }
 0x329   :  { %5215 = vmatprep.subr.bf16.mxu0 %v5214_v58  ;;  %v5250_v59 = vpack.c.bf16 %v3795_v55, %v3794_v53  ;;  %v3836_v53 = vld [vmem:[%s7535_s9 + $0x68] sm:$0xff]  ;;  %v3849_v55 = vld [vmem:[%s7535_s9 + $0xc0] sm:$0xff] }
 0x32c   :  { %5217 = vmatpush3.bf16.msra.mxu0 %v5214_v58 }
 0x32d   :  { %5219 = vmatprep.subr.bf16.mxu0 %v5218_v62 }
 0x330   :  { %5221 = vmatpush3.bf16.msra.mxu0 %v5218_v62  ;;  %v3797_v62 = vld [vmem:[%s7533_s7 + $0xe8] sm:$0xff] }
 0x331   :  { %5223 = vmatprep.subr.bf16.mxu0 %v5222_v2  ;;  %v5254_v1 = vpack.c.bf16 %v3797_v62, %v3796_v60  ;;  %v3838_v60 = vld [vmem:[%s7535_s9 + $0x78] sm:$0xff]  ;;  %v3851_v62 = vld [vmem:[%s7535_s9 + $0xd0] sm:$0xff] }
 0x3f0   :  { %v4306_v3 = vpop.f32.mrb[12].mxu1 }
 0x3f1   :  { %v2224_v4 = vadd.f32 %v4306_v3, %v3775_v16  ;;  %v2205_v17 = vpop.f32.mrb[13].mxu1 }
 0x3f2   :  { %v2223_v54 = vadd.f32 %v3775_v16, %v2205_v17  ;;  %v3799_v16 = vld [vmem:[%s7533_s7 + $0xf8] sm:$0xff]  ;;  %v3801_v17 = vld [vmem:[%s7533_s7 + $0x108] sm:$0xff] }
 0x3f3   :  { %v2226_v57 = vmul.f32 0.5, %v2224_v4  ;;  %v3800_v4 = vld [vmem:[%s7533_s7 + $0x100] sm:$0xff] }
 0x3f4   :  { %v2225_v9 = vmul.f32 0.5, %v2223_v54  ;;  %v5262_v54 = vpack.c.bf16 %v3801_v17, %v3800_v4  ;;  %v3853_v4 = vld [vmem:[%s7535_s9 + $0xe0] sm:$0xff] }
 0x3f5   :  { %5534 = vtanh.f32 %v2226_v57  ;;  %v3802_v57 = vld [vmem:[%s7533_s7 + $0x110] sm:$0xff] }
 0x3f6   :  { %5536 = vtanh.f32 %v2225_v9  ;;  %v3803_v9 = vld [vmem:[%s7533_s7 + $0x118] sm:$0xff] }
 0x3ff   :  { %v5535_v32 = vpop.eup %5534 }
 0x400   :  { %v5537_v61 = vpop.eup %5536  ;;  %v2230_v5 = vmul.f32 0.5, %v5535_v32  ;;  %v5266_v32 = vpack.c.bf16 %v3803_v9, %v3802_v57  ;;  %v3841_v9 = vld [vmem:[%s7535_s9 + $0x90] sm:$0xff] }
 0x401   :  { %v2229_v10 = vmul.f32 0.5, %v5537_v61  ;;  %v3806_v61 = vld [vmem:[%s7533_s7 + $0x120] sm:$0xff] }
 0x402   :  { %v2232_v11 = vadd.f32 0.5, %v2230_v5  ;;  %v3807_v5 = vld [vmem:[%s7533_s7 + $0x128] sm:$0xff] }
 0x403   :  { %v2231_v12 = vadd.f32 0.5, %v2229_v10  ;;  %v5270_v10 = vpack.c.bf16 %v3807_v5, %v3806_v61  ;;  %v3855_v61 = vld [vmem:[%s7535_s9 + $0xf0] sm:$0xff] }
 0x404   :  { %v2236_v30 = vrot.slane %v2232_v11, 6 }
 0x405   :  { %v2235_v6 = vrot.slane %v2231_v12, 6 }
 0x406   :  { %v6929_v14 = vsel %vm1716_vm6, 0.0, %v2236_v30  ;;  %v6932_v15 = vsel %vm1716_vm6, %v2236_v30, 0.0  ;;  %v3808_v30 = vld [vmem:[%s7533_s7 + $0x130] sm:$0xff] }
 0x407   :  { %v2263_v41 = vrot.slane %v6932_v15, 1  ;;  %v6936_v18 = vsel %vm1716_vm6, 0.0, %v2235_v6  ;;  %v6939_v43 = vsel %vm1716_vm6, %v2235_v6, 0.0  ;;  %v2262_v19 = vrot.slane %v6929_v14, 1  ;;  %v3809_v6 = vld [vmem:[%s7533_s7 + $0x138] sm:$0xff] }
 0x408   :  { %v2259_v20 = vrot.slane %v6936_v18, 1  ;;  %v2260_v21 = vrot.slane %v6939_v43, 1  ;;  %v2539_v26 = vrot.slane %v6929_v14, 3  ;;  %v2540_v25 = vrot.slane %v6932_v15, 3 }
 0x409   :  { %v2264_v28 = vsel %vm1325_vm4, %v2262_v19, %v2263_v41  ;;  %v2636_v8 = vrot.slane %v6936_v18, 4  ;;  %v2637_v31 = vrot.slane %v6939_v43, 4  ;;  %v2639_v33 = vrot.slane %v6929_v14, 4 }
 0x40a   :  { %v2261_v22 = vsel %vm1325_vm4, %v2259_v20, %v2260_v21  ;;  %v2640_v63 = vrot.slane %v6932_v15, 4  ;;  %v6969_v48 = vsel %vm2014_vm8, %v2539_v26, %v2540_v25  ;;  %v2436_v56 = vrot.slane %v6936_v18, 2  ;;  %v3813_v21 = vld [vmem:[%s7533_s7 + $0x158] sm:$0xff]  ;;  %v3815_v26 = vld [vmem:[%s7533_s7 + $0x168] sm:$0xff] }
 0x40b   :  { %4331 = vmatprep.mubr.msk.f32.mxu0 %vm96_vm0, %v2261_v22  ;;  %v6972_v34 = vsel %vm2115_vm7, %v2636_v8, %v2637_v31  ;;  %v2437_v58 = vrot.slane %v6939_v43, 2  ;;  %v2439_v11 = vrot.slane %v6929_v14, 2  ;;  %v2440_v12 = vrot.slane %v6932_v15, 2  ;;  %v3811_v15 = vld [vmem:[%s7533_s7 + $0x148] sm:$0xff]  ;;  %v3820_v8 = vld [vmem:[%s7533_s7 + $0x180] sm:$0xff] }
 0x40c   :  { %4332 = vmatmul.mubr.msk.f32.vlgmr.msra.gmra.mrb[16].mxu0 %vm96_vm0, %v2264_v28  ;;  %v6975_v36 = vsel %vm2115_vm7, %v2639_v33, %v2640_v63  ;;  %v2536_v41 = vrot.slane %v6936_v18, 3  ;;  %v2537_v19 = vrot.slane %v6939_v43, 3  ;;  %v5274_v44 = vpack.c.bf16 %v3809_v6, %v3808_v30  ;;  %v3812_v43 = vld [vmem:[%s7533_s7 + $0x150] sm:$0xff]  ;;  %v3821_v31 = vld [vmem:[%s7533_s7 + $0x188] sm:$0xff]  ;;  %v3857_v6 = vld [vmem:[%s7535_s9 + $0x100] sm:$0xff] }
 0x40d   :  { %5225 = vmatpush3.bf16.msra.mxu0 %v5222_v2  ;;  %4358 = vmatprep.mubr.msk.f32.mxu0 %vm96_vm0, %v6936_v18  ;;  %v2438_v0 = vsel %vm1572_vm5, %v2436_v56, %v2437_v58  ;;  %v3798_v2 = vld [vmem:[%s7533_s7 + $0xf0] sm:$0xff]  ;;  %v2441_v42 = vsel %vm1572_vm5, %v2439_v11, %v2440_v12  ;;  %v5282_v22 = vpack.c.bf16 %v3813_v21, %v3812_v43  ;;  %v3850_v58 = vld [vmem:[%s7535_s9 + $0xc8] sm:$0xff]  ;;  %v3843_v12 = vld [vmem:[%s7535_s9 + $0xa0] sm:$0xff] }
 0x40e   :  { %5227 = vmatprep.subr.bf16.mxu0 %v5226_v23  ;;  %v5258_v3 = vpack.c.bf16 %v3799_v16, %v3798_v2  ;;  %v2538_v20 = vsel %vm2014_vm8, %v2536_v41, %v2537_v19  ;;  %v5290_v25 = vpack.c.bf16 %v3817_v29, %v3816_v27  ;;  %v5294_v33 = vpack.c.bf16 %v3821_v31, %v3820_v8  ;;  %v3822_v63 = vld [vmem:[%s7533_s7 + $0x190] sm:$0xff]  ;;  %v3839_v16 = vld [vmem:[%s7535_s9 + $0x80] sm:$0xff]  ;;  %v3844_v30 = vld [vmem:[%s7535_s9 + $0xa8] sm:$0xff] }
 0x40f   :  { %v5331_v41 = vpack.c.bf16 %v3844_v30, %v3843_v12  ;;  %v3858_v19 = vld [vmem:[%s7535_s9 + $0x108] sm:$0xff]  ;;  %v3834_v21 = vld [vmem:[%s7534_s8] ss:$0 sm:$0xff] }
 0x410   :  { %v2753_v8 = vld [vmem:[%s7535_s9] sm:$0xff] }
 0x411   :  { %5229 = vmatpush3.bf16.msra.mxu0 %v5226_v23  ;;  %v3814_v23 = vld [vmem:[%s7533_s7 + $0x160] sm:$0xff] }
 0x412   :  { %5231 = vmatprep.subr.bf16.mxu0 %v5230_v35  ;;  %v5286_v28 = vpack.c.bf16 %v3815_v26, %v3814_v23 }
 0x415   :  { %5233 = vmatpush3.bf16.msra.mxu0 %v5230_v35  ;;  %v3823_v35 = vld [vmem:[%s7533_s7 + $0x198] sm:$0xff] }
 0x416   :  { %5235 = vmatprep.subr.bf16.mxu0 %v5234_v39  ;;  %v5298_v37 = vpack.c.bf16 %v3823_v35, %v3822_v63  ;;  %v2754_v63 = vld [vmem:[%s7535_s9 + $0x8] sm:$0xff]  ;;  %v3875_v35 = vld [vmem:[%s7535_s9 + $0x180] sm:$0xff] }
 0x419   :  { %5237 = vmatpush3.bf16.msra.mxu0 %v5234_v39  ;;  %v3825_v39 = vld [vmem:[%s7533_s7 + $0x1a8] sm:$0xff] }
 0x41a   :  { %5239 = vmatprep.subr.bf16.mxu0 %v5238_v47  ;;  %v5302_v40 = vpack.c.bf16 %v3825_v39, %v3824_v38 }
 0x41d   :  { %5241 = vmatpush3.bf16.msra.mxu0 %v5238_v47  ;;  %v3827_v47 = vld [vmem:[%s7533_s7 + $0x1b8] sm:$0xff] }
 0x41e   :  { %5243 = vmatprep.subr.bf16.mxu0 %v5242_v45  ;;  %v5306_v24 = vpack.c.bf16 %v3827_v47, %v3826_v46  ;;  %v5337_v46 = vpack.c.bf16 %v2754_v63, %v2753_v8  ;;  %v3901_v63 = vld [vmem:[%s7535_s9 + $0x240] sm:$0xff] }
 0x421   :  { %5245 = vmatpush3.bf16.msra.mxu0 %v5242_v45  ;;  %v3830_v45 = vld [vmem:[%s7533_s7 + $0x1d0] sm:$0xff] }
 0x422   :  { %5247 = vmatprep.subr.bf16.mxu0 %v5246_v52  ;;  %v5314_v51 = vpack.c.bf16 %v3831_v50, %v3830_v45 }
 0x424   :  { %4359 = vmatmul.mubr.msk.f32.vlgmr.msra.gmra.mrb[16].mxu0 %vm96_vm0, %v6929_v14  ;;  %v3810_v14 = vld [vmem:[%s7533_s7 + $0x140] sm:$0xff] }
 0x425   :  { %5249 = vmatpush3.bf16.msra.mxu0 %v5246_v52  ;;  %4385 = vmatprep.mubr.msk.f32.mxu0 %vm96_vm0, %v2438_v0  ;;  %v5278_v18 = vpack.c.bf16 %v3811_v15, %v3810_v14  ;;  %v3835_v52 = vld [vmem:[%s7535_s9 + $0x60] sm:$0xff]  ;;  %v3846_v14 = vld [vmem:[%s7535_s9 + $0xb8] sm:$0xff]  ;;  %v3859_v15 = vld [vmem:[%s7535_s9 + $0x110] sm:$0xff] }
 0x426   :  { %5251 = vmatprep.subr.bf16.mxu0 %v5250_v59  ;;  %v5319_v56 = vpack.c.bf16 %v3836_v53, %v3835_v52 }
 0x428   :  { %5320 = vmatpush3.bf16.msra.mxu1 %v5319_v56  ;;  %v3877_v56 = vld [vmem:[%s7535_s9 + $0x190] sm:$0xff] }
 0x429   :  { %5253 = vmatpush3.bf16.msra.mxu0 %v5250_v59  ;;  %v5355_v59 = vpack.c.bf16 %v3850_v58, %v3849_v55  ;;  %5321 = vmatprep.subr.bf16.mxu1 %v5567_v13  ;;  %v2756_v55 = vld [vmem:[%s7535_s9 + $0x18] sm:$0xff] }
 0x42a   :  { %5255 = vmatprep.subr.bf16.mxu0 %v5254_v1  ;;  %v3878_v58 = vld [vmem:[%s7535_s9 + $0x198] sm:$0xff] }
 0x42d   :  { %5257 = vmatpush3.bf16.msra.mxu0 %v5254_v1  ;;  %v3852_v1 = vld [vmem:[%s7535_s9 + $0xd8] sm:$0xff] }
 0x42e   :  { %5259 = vmatprep.subr.bf16.mxu0 %v5258_v3  ;;  %v5358_v2 = vpack.c.bf16 %v3852_v1, %v3851_v62 }
 0x431   :  { %5261 = vmatpush3.bf16.msra.mxu0 %v5258_v3  ;;  %v3840_v3 = vld [vmem:[%s7535_s9 + $0x88] sm:$0xff] }
 0x432   :  { %5263 = vmatprep.subr.bf16.mxu0 %v5262_v54  ;;  %v5325_v17 = vpack.c.bf16 %v3840_v3, %v3839_v16 }
 0x435   :  { %5265 = vmatpush3.bf16.msra.mxu0 %v5262_v54  ;;  %v3854_v54 = vld [vmem:[%s7535_s9 + $0xe8] sm:$0xff] }
 0x436   :  { %5267 = vmatprep.subr.bf16.mxu0 %v5266_v32  ;;  %v5361_v57 = vpack.c.bf16 %v3854_v54, %v3853_v4 }
 0x439   :  { %5269 = vmatpush3.bf16.msra.mxu0 %v5266_v32  ;;  %v3842_v32 = vld [vmem:[%s7535_s9 + $0x98] sm:$0xff] }
 0x43a   :  { %5271 = vmatprep.subr.bf16.mxu0 %v5270_v10  ;;  %v5328_v5 = vpack.c.bf16 %v3842_v32, %v3841_v9  ;;  %v5394_v9 = vpack.c.bf16 %v3878_v58, %v3877_v56  ;;  %v2757_v32 = vld [vmem:[%s7535_s9 + $0x20] sm:$0xff]  ;;  %v3907_v56 = vld [vmem:[%s7535_s9 + $0x270] sm:$0xff]  ;;  %v3908_v58 = vld [vmem:[%s7535_s9 + $0x278] sm:$0xff] }
 0x43c   :  { %4386 = vmatmul.mubr.msk.f32.vlgmr.msra.gmra.mrb[16].mxu0 %vm96_vm0, %v2441_v42  ;;  %v3845_v42 = vld [vmem:[%s7535_s9 + $0xb0] sm:$0xff] }
 0x43d   :  { %5273 = vmatpush3.bf16.msra.mxu0 %v5270_v10  ;;  %4412 = vmatprep.mubr.msk.f32.mxu0 %vm96_vm0, %v2538_v20  ;;  %v3856_v10 = vld [vmem:[%s7535_s9 + $0xf8] sm:$0xff]  ;;  %v5334_v20 = vpack.c.bf16 %v3846_v14, %v3845_v42 }
 0x43e   :  { %5275 = vmatprep.subr.bf16.mxu0 %v5274_v44  ;;  %v5364_v11 = vpack.c.bf16 %v3856_v10, %v3855_v61  ;;  %v2758_v61 = vld [vmem:[%s7535_s9 + $0x28] sm:$0xff]  ;;  %v3882_v42 = vld [vmem:[%s7535_s9 + $0x1b8] sm:$0xff] }
 0x43f   :  { %v3880_v10 = vld [vmem:[%s7535_s9 + $0x1a8] sm:$0xff]  ;;  %v5343_v30 = vpack.c.bf16 %v2758_v61, %v2757_v32 }
 0x441   :  { %5277 = vmatpush3.bf16.msra.mxu0 %v5274_v44  ;;  %v5367_v44 = vpack.c.bf16 %v3858_v19, %v3857_v6  ;;  %v2760_v19 = vld [vmem:[%s7535_s9 + $0x38] sm:$0xff] }
 0x442   :  { %5279 = vmatprep.subr.bf16.mxu0 %v5278_v18 }
 0x445   :  { %5281 = vmatpush3.bf16.msra.mxu0 %v5278_v18  ;;  %v3860_v18 = vld [vmem:[%s7535_s9 + $0x118] sm:$0xff] }
 0x446   :  { %5283 = vmatprep.subr.bf16.mxu0 %v5282_v22  ;;  %v5370_v43 = vpack.c.bf16 %v3860_v18, %v3859_v15  ;;  %v2762_v18 = vld [vmem:[%s7535_s9 + $0x48] sm:$0xff] }
 0x449   :  { %5285 = vmatpush3.bf16.msra.mxu0 %v5282_v22 }
 0x44a   :  { %5287 = vmatprep.subr.bf16.mxu0 %v5286_v28 }
 0x44d   :  { %5289 = vmatpush3.bf16.msra.mxu0 %v5286_v28 }
 0x44e   :  { %5291 = vmatprep.subr.bf16.mxu0 %v5290_v25 }
 0x451   :  { %5293 = vmatpush3.bf16.msra.mxu0 %v5290_v25 }
 0x452   :  { %5295 = vmatprep.subr.bf16.mxu0 %v5294_v33 }
 0x454   :  { %4413 = vmatmul.mubr.msk.f32.vlgmr.msra.gmra.mrb[16].mxu0 %vm96_vm0, %v6969_v48  ;;  %v3828_v48 = vld [vmem:[%s7533_s7 + $0x1c0] sm:$0xff] }
 0x455   :  { %5297 = vmatpush3.bf16.msra.mxu0 %v5294_v33  ;;  %4439 = vmatprep.mubr.msk.f32.mxu0 %vm96_vm0, %v6972_v34  ;;  %v3829_v34 = vld [vmem:[%s7533_s7 + $0x1c8] sm:$0xff] }
 0x456   :  { %5299 = vmatprep.subr.bf16.mxu0 %v5298_v37  ;;  %v5310_v49 = vpack.c.bf16 %v3829_v34, %v3828_v48 }
 0x459   :  { %5301 = vmatpush3.bf16.msra.mxu0 %v5298_v37  ;;  %v3876_v37 = vld [vmem:[%s7535_s9 + $0x188] sm:$0xff] }
 0x45a   :  { %5303 = vmatprep.subr.bf16.mxu0 %v5302_v40  ;;  %v5391_v47 = vpack.c.bf16 %v3876_v37, %v3875_v35  ;;  %v3902_v35 = vld [vmem:[%s7535_s9 + $0x248] sm:$0xff] }
 0x45d   :  { %5305 = vmatpush3.bf16.msra.mxu0 %v5302_v40 }
 0x45e   :  { %5307 = vmatprep.subr.bf16.mxu0 %v5306_v24 }
 0x461   :  { %5309 = vmatpush3.bf16.msra.mxu0 %v5306_v24 }
 0x462   :  { %5311 = vmatprep.subr.bf16.mxu0 %v5310_v49 }
 0x465   :  { %5313 = vmatpush3.bf16.msra.mxu0 %v5310_v49 }
 0x466   :  { %5315 = vmatprep.subr.bf16.mxu0 %v5314_v51 }
 0x469   :  { %5317 = vmatpush3.bf16.msra.mxu0 %v5314_v51  ;;  %v2755_v51 = vld [vmem:[%s7535_s9 + $0x10] sm:$0xff] }
 0x46a   :  { %5354 = vmatprep.subr.bf16.mxu0 %v5567_v13 }
 0x46c   :  { %4440 = vmatmul.mubr.msk.f32.vlgmr.msra.gmra.mrb[16].mxu0 %vm96_vm0, %v6975_v36  ;;  %v3837_v36 = vld [vmem:[%s7535_s9 + $0x70] sm:$0xff] }
 0x46d   :  { %5356 = vmatpush3.bf16.msra.mxu0 %v5355_v59  ;;  %v5322_v0 = vpack.c.bf16 %v3838_v60, %v3837_v36  ;;  %4520 = vmatprep.mubr.msk.f32.mxu0 %vm5568_vm9, %v5566_v7 }
 0x46e   :  { %5357 = vmatprep.subr.bf16.mxu0 %v5567_v13 }
 0x46f   :  { %5323 = vmatpush3.bf16.msra.mxu1 %v5322_v0 }
 0x470   :  { %5324 = vmatprep.subr.bf16.mxu1 %v5567_v13 }
 0x471   :  { %5359 = vmatpush3.bf16.msra.mxu0 %v5358_v2 }
 0x472   :  { %5360 = vmatprep.subr.bf16.mxu0 %v5567_v13 }
 0x473   :  { %5326 = vmatpush3.bf16.msra.mxu1 %v5325_v17 }
 0x474   :  { %5327 = vmatprep.subr.bf16.mxu1 %v5567_v13 }
 0x475   :  { %5362 = vmatpush3.bf16.msra.mxu0 %v5361_v57  ;;  %v5340_v57 = vpack.c.bf16 %v2756_v55, %v2755_v51  ;;  %v3869_v55 = vld [vmem:[%s7535_s9 + $0x158] sm:$0xff] }
 0x476   :  { %5363 = vmatprep.subr.bf16.mxu0 %v5567_v13 }
 0x477   :  { %5329 = vmatpush3.bf16.msra.mxu1 %v5328_v5  ;;  %v3879_v5 = vld [vmem:[%s7535_s9 + $0x1a0] sm:$0xff] }
 0x478   :  { %5330 = vmatprep.subr.bf16.mxu1 %v5567_v13  ;;  %v5397_v6 = vpack.c.bf16 %v3880_v10, %v3879_v5  ;;  %v3888_v5 = vld [vmem:[%s7535_s9 + $0x1e0] sm:$0xff]  ;;  %v3889_v10 = vld [vmem:[%s7535_s9 + $0x1e8] sm:$0xff] }
 0x479   :  { %5365 = vmatpush3.bf16.msra.mxu0 %v5364_v11 }
 0x47a   :  { %5366 = vmatprep.subr.bf16.mxu0 %v5567_v13 }
 0x47b   :  { %5332 = vmatpush3.bf16.msra.mxu1 %v5331_v41  ;;  %v2759_v41 = vld [vmem:[%s7535_s9 + $0x30] sm:$0xff] }
 0x47c   :  { %5333 = vmatprep.subr.bf16.mxu1 %v5567_v13  ;;  %v5346_v14 = vpack.c.bf16 %v2760_v19, %v2759_v41  ;;  %v3891_v41 = vld [vmem:[%s7535_s9 + $0x1f8] sm:$0xff] }
 0x47d   :  { %5368 = vmatpush3.bf16.msra.mxu0 %v5367_v44  ;;  %v3881_v44 = vld [vmem:[%s7535_s9 + $0x1b0] sm:$0xff] }
 0x47e   :  { %5369 = vmatprep.subr.bf16.mxu0 %v5567_v13  ;;  %v5400_v15 = vpack.c.bf16 %v3882_v42, %v3881_v44  ;;  %v3892_v44 = vld [vmem:[%s7535_s9 + $0x200] sm:$0xff]  ;;  %v3893_v42 = vld [vmem:[%s7535_s9 + $0x208] sm:$0xff] }
 0x47f   :  { %5335 = vmatpush3.bf16.msra.mxu1 %v5334_v20  ;;  %v2761_v20 = vld [vmem:[%s7535_s9 + $0x40] sm:$0xff] }
 0x480   :  { %5336 = vmatprep.subr.bf16.mxu1 %v5567_v13 }
 0x481   :  { %5371 = vmatpush3.bf16.msra.mxu0 %v5370_v43  ;;  %v3883_v43 = vld [vmem:[%s7535_s9 + $0x1c0] sm:$0xff] }
 0x482   :  { %5390 = vmatprep.subr.bf16.mxu0 %v5567_v13 }
 0x53f   :  { %v4441_v22 = vpop.f32.mrb[16].mxu0 }
 0x540   :  { %v2744_v23 = vadd.f32 %v4441_v22, %v3834_v21  ;;  %v2725_v26 = vpop.f32.mrb[17].mxu0  ;;  %v5349_v22 = vpack.c.bf16 %v2762_v18, %v2761_v20  ;;  %v3896_v20 = vld [vmem:[%s7535_s9 + $0x220] sm:$0xff]  ;;  %v3897_v18 = vld [vmem:[%s7535_s9 + $0x228] sm:$0xff] }
 0x541   :  { %v2743_v28 = vadd.f32 %v3834_v21, %v2725_v26  ;;  %v3884_v21 = vld [vmem:[%s7535_s9 + $0x1c8] sm:$0xff]  ;;  %v2763_v26 = vld [vmem:[%s7535_s9 + $0x50] sm:$0xff] }
 0x542   :  { %v2746_v27 = vmul.f32 0.5, %v2744_v23  ;;  %v5403_v23 = vpack.c.bf16 %v3884_v21, %v3883_v43  ;;  %v5421_v43 = vpack.c.bf16 %v3897_v18, %v3896_v20  ;;  %v3898_v21 = vld [vmem:[%s7535_s9 + $0x230] sm:$0xff] }
 0x543   :  { %v2745_v29 = vmul.f32 0.5, %v2743_v28  ;;  %v2764_v28 = vld [vmem:[%s7535_s9 + $0x58] sm:$0xff] }
 0x544   :  { %5538 = vtanh.f32 %v2746_v27  ;;  %v3885_v27 = vld [vmem:[%s7535_s9 + $0x1d0] sm:$0xff] }
 0x545   :  { %5540 = vtanh.f32 %v2745_v29  ;;  %v3886_v29 = vld [vmem:[%s7535_s9 + $0x1d8] sm:$0xff] }
 0x546   :  { %v5406_v8 = vpack.c.bf16 %v3886_v29, %v3885_v27  ;;  %v3916_v29 = vld [vmem:[%s7535_s9 + $0x2b0] sm:$0xff] }
 0x54e   :  { %v5539_v25 = vpop.eup %5538 }
 0x54f   :  { %v5541_v31 = vpop.eup %5540  ;;  %v2750_v33 = vmul.f32 0.5, %v5539_v25  ;;  %v5352_v25 = vpack.c.bf16 %v2764_v28, %v2763_v26  ;;  %v3914_v26 = vld [vmem:[%s7535_s9 + $0x2a0] sm:$0xff]  ;;  %v3915_v28 = vld [vmem:[%s7535_s9 + $0x2a8] sm:$0xff] }
 0x550   :  { %v2749_v38 = vmul.f32 0.5, %v5541_v31  ;;  %v3862_v31 = vld [vmem:[%s7535_s9 + $0x120] sm:$0xff]  ;;  %v5445_v27 = vpack.c.bf16 %v3915_v28, %v3914_v26 }
 0x551   :  { %v2752_v39 = vadd.f32 0.5, %v2750_v33  ;;  %v3863_v33 = vld [vmem:[%s7535_s9 + $0x128] sm:$0xff] }
 0x552   :  { %v2751_v40 = vadd.f32 0.5, %v2749_v38  ;;  %v5373_v37 = vpack.c.bf16 %v3863_v33, %v3862_v31  ;;  %v5427_v38 = vpack.c.bf16 %v3902_v35, %v3901_v63  ;;  %v3918_v31 = vld [vmem:[%s7535_s9 + $0x2c0] sm:$0xff]  ;;  %v3919_v33 = vld [vmem:[%s7535_s9 + $0x2c8] sm:$0xff] }
 0x553   :  { %v2943_v24 = vrot.slane %v2752_v39, 1  ;;  %v2855_v48 = vrot.slane %v2752_v39, 7  ;;  %v3121_v34 = vrot.slane %v2752_v39, 3  ;;  %v3032_v49 = vrot.slane %v2752_v39, 2 }
 0x554   :  { %v2780_v45 = vrot.slane %v2751_v40, 1  ;;  %v2942_v50 = vrot.slane %v2751_v40, 2  ;;  %v3120_v52 = vrot.slane %v2751_v40, 4  ;;  %v3031_v53 = vrot.slane %v2751_v40, 3 }
 0x555   :  { %v7240_v59 = vsel %vm2781_vm10, %v2855_v48, %v2751_v40  ;;  %v3298_v36 = vrot.slane %v2751_v40, 6  ;;  %v3299_v60 = vrot.slane %v2752_v39, 5  ;;  %v3209_v62 = vrot.slane %v2751_v40, 5 }
 0x556   :  { %v2782_v0 = vsel %vm2781_vm10, %v2752_v39, %v2780_v45  ;;  %v2944_v1 = vsel %vm2781_vm10, %v2943_v24, %v2942_v50  ;;  %v7245_v2 = vsel %vm2781_vm10, %v3121_v34, %v3120_v52  ;;  %v7248_v16 = vsel %vm2781_vm10, %v3032_v49, %v3031_v53  ;;  %v3866_v34 = vld [vmem:[%s7535_s9 + $0x140] sm:$0xff]  ;;  %v3867_v49 = vld [vmem:[%s7535_s9 + $0x148] sm:$0xff]  ;;  %v3868_v53 = vld [vmem:[%s7535_s9 + $0x150] sm:$0xff] }
 0x557   :  { %4467 = vmatmul.mubr.msk.f32.vlgmr.msra.gmra.mrb[14].mxu1 %vm96_vm0, %v2782_v0  ;;  %4521 = vmatmul.mubr.msk.f32.vlgmr.msra.gmra.mrb[18].mxu0 %vm96_vm0, %v2944_v1  ;;  %v7253_v3 = vsel %vm2781_vm10, %v3299_v60, %v3298_v36  ;;  %v3210_v4 = vrot.slane %v2752_v39, 4  ;;  %v3387_v17 = vrot.slane %v2751_v40, 7  ;;  %v3388_v54 = vrot.slane %v2752_v39, 6  ;;  %v3864_v39 = vld [vmem:[%s7535_s9 + $0x130] sm:$0xff]  ;;  %v3865_v40 = vld [vmem:[%s7535_s9 + $0x138] sm:$0xff]  ;;  %v3905_v45 = vld [vmem:[%s7535_s9 + $0x260] sm:$0xff] }
 0x558   :  { %5338 = vmatpush3.bf16.msra.mxu1 %v5337_v46  ;;  %5392 = vmatpush3.bf16.msra.mxu0 %v5391_v47  ;;  %v3903_v46 = vld [vmem:[%s7535_s9 + $0x250] sm:$0xff]  ;;  %v3904_v47 = vld [vmem:[%s7535_s9 + $0x258] sm:$0xff]  ;;  %v5376_v24 = vpack.c.bf16 %v3865_v40, %v3864_v39  ;;  %v3906_v50 = vld [vmem:[%s7535_s9 + $0x268] sm:$0xff]  ;;  %v5379_v51 = vpack.c.bf16 %v3867_v49, %v3866_v34  ;;  %v5436_v36 = vpack.c.bf16 %v3908_v58, %v3907_v56 }
 0x559   :  { %5339 = vmatprep.subr.bf16.mxu1 %v5567_v13  ;;  %5393 = vmatprep.subr.bf16.mxu0 %v5567_v13  ;;  %v7270_v11 = vsel %vm2781_vm10, %v3210_v4, %v3209_v62  ;;  %v7273_v12 = vsel %vm2781_vm10, %v3388_v54, %v3387_v17  ;;  %v5430_v48 = vpack.c.bf16 %v3904_v47, %v3903_v46  ;;  %v3870_v60 = vld [vmem:[%s7535_s9 + $0x160] sm:$0xff]  ;;  %v3871_v62 = vld [vmem:[%s7535_s9 + $0x168] sm:$0xff]  ;;  %v3872_v17 = vld [vmem:[%s7535_s9 + $0x170] sm:$0xff] }
 0x55a   :  { %4493 = vmatprep.mubr.msk.f32.mxu1 %vm5568_vm9, %v5566_v7  ;;  %4574 = vmatprep.mubr.msk.f32.mxu0 %vm5568_vm9, %v5566_v7  ;;  %v5433_v52 = vpack.c.bf16 %v3906_v50, %v3905_v45  ;;  %v3909_v0 = vld [vmem:[%s7535_s9 + $0x280] sm:$0xff]  ;;  %v3910_v1 = vld [vmem:[%s7535_s9 + $0x288] sm:$0xff]  ;;  %v3873_v54 = vld [vmem:[%s7535_s9 + $0x178] sm:$0xff]  ;;  %v5451_v63 = vpack.c.bf16 %v3919_v33, %v3918_v31 }
 0x55b   :  { %v5439_v4 = vpack.c.bf16 %v3910_v1, %v3909_v0  ;;  %v5388_v32 = vpack.c.bf16 %v3873_v54, %v3872_v17  ;;  %v3924_v40 = vld [vmem:[%s7535_s9 + $0x2f0] sm:$0xff]  ;;  %v3925_v46 = vld [vmem:[%s7535_s9 + $0x2f8] sm:$0xff] }
 0x55c   :  { %5341 = vmatpush3.bf16.msra.mxu1 %v5340_v57  ;;  %5395 = vmatpush3.bf16.msra.mxu0 %v5394_v9  ;;  %v3911_v57 = vld [vmem:[%s7535_s9 + $0x290] sm:$0xff]  ;;  %v3912_v9 = vld [vmem:[%s7535_s9 + $0x298] sm:$0xff]  ;;  %v5460_v47 = vpack.c.bf16 %v3925_v46, %v3924_v40 }
 0x55d   :  { %5342 = vmatprep.subr.bf16.mxu1 %v5567_v13  ;;  %5396 = vmatprep.subr.bf16.mxu0 %v5567_v13  ;;  %v5442_v61 = vpack.c.bf16 %v3912_v9, %v3911_v57 }
 0x560   :  { %5344 = vmatpush3.bf16.msra.mxu1 %v5343_v30  ;;  %5398 = vmatpush3.bf16.msra.mxu0 %v5397_v6  ;;  %v5409_v30 = vpack.c.bf16 %v3889_v10, %v3888_v5  ;;  %v3890_v6 = vld [vmem:[%s7535_s9 + $0x1f0] sm:$0xff] }
 0x561   :  { %5345 = vmatprep.subr.bf16.mxu1 %v5567_v13  ;;  %5399 = vmatprep.subr.bf16.mxu0 %v5567_v13  ;;  %v5412_v19 = vpack.c.bf16 %v3891_v41, %v3890_v6 }
 0x564   :  { %5347 = vmatpush3.bf16.msra.mxu1 %v5346_v14  ;;  %5401 = vmatpush3.bf16.msra.mxu0 %v5400_v15  ;;  %v3895_v14 = vld [vmem:[%s7535_s9 + $0x218] sm:$0xff] }
 0x565   :  { %5348 = vmatprep.subr.bf16.mxu1 %v5567_v13  ;;  %5402 = vmatprep.subr.bf16.mxu0 %v5567_v13 }
 0x568   :  { %5350 = vmatpush3.bf16.msra.mxu1 %v5349_v22  ;;  %5404 = vmatpush3.bf16.msra.mxu0 %v5403_v23  ;;  %v3899_v22 = vld [vmem:[%s7535_s9 + $0x238] sm:$0xff] }
 0x569   :  { %5351 = vmatprep.subr.bf16.mxu1 %v5567_v13  ;;  %5405 = vmatprep.subr.bf16.mxu0 %v5567_v13  ;;  %v5424_v23 = vpack.c.bf16 %v3899_v22, %v3898_v21 }
 0x56c   :  { %5353 = vmatpush3.bf16.msra.mxu1 %v5352_v25  ;;  %5407 = vmatpush3.bf16.msra.mxu0 %v5406_v8  ;;  %v3917_v25 = vld [vmem:[%s7535_s9 + $0x2b8] sm:$0xff] }
 0x56d   :  { %5372 = vmatprep.subr.bf16.mxu1 %v5567_v13  ;;  %5426 = vmatprep.subr.bf16.mxu0 %v5567_v13  ;;  %v5448_v8 = vpack.c.bf16 %v3917_v25, %v3916_v29 }
 0x56f   :  { %4494 = vmatmul.mubr.msk.f32.vlgmr.msra.gmra.mrb[16].mxu1 %vm96_vm0, %v7240_v59  ;;  %4575 = vmatmul.mubr.msk.f32.vlgmr.msra.gmra.mrb[20].mxu0 %vm96_vm0, %v7245_v2  ;;  %v5382_v59 = vpack.c.bf16 %v3869_v55, %v3868_v53  ;;  %v5385_v2 = vpack.c.bf16 %v3871_v62, %v3870_v60 }
 0x570   :  { %5374 = vmatpush3.bf16.msra.mxu1 %v5373_v37  ;;  %5428 = vmatpush3.bf16.msra.mxu0 %v5427_v38  ;;  %v3922_v37 = vld [vmem:[%s7535_s9 + $0x2e0] sm:$0xff]  ;;  %v3923_v38 = vld [vmem:[%s7535_s9 + $0x2e8] sm:$0xff] }
 0x571   :  { %5375 = vmatprep.subr.bf16.mxu1 %v5567_v13  ;;  %5429 = vmatprep.subr.bf16.mxu0 %v5567_v13  ;;  %v5457_v39 = vpack.c.bf16 %v3923_v38, %v3922_v37 }
 0x572   :  { %4547 = vmatprep.mubr.msk.f32.mxu1 %vm5568_vm9, %v5566_v7  ;;  %4628 = vmatprep.mubr.msk.f32.mxu0 %vm5568_vm9, %v5566_v7 }
 0x574   :  { %5377 = vmatpush3.bf16.msra.mxu1 %v5376_v24  ;;  %5431 = vmatpush3.bf16.msra.mxu0 %v5430_v48 }
 0x575   :  { %5378 = vmatprep.subr.bf16.mxu1 %v5567_v13  ;;  %5432 = vmatprep.subr.bf16.mxu0 %v5567_v13 }
 0x578   :  { %5380 = vmatpush3.bf16.msra.mxu1 %v5379_v51  ;;  %5434 = vmatpush3.bf16.msra.mxu0 %v5433_v52 }
 0x579   :  { %5381 = vmatprep.subr.bf16.mxu1 %v5567_v13  ;;  %5435 = vmatprep.subr.bf16.mxu0 %v5567_v13 }
 0x57c   :  { %5383 = vmatpush3.bf16.msra.mxu1 %v5382_v59  ;;  %5437 = vmatpush3.bf16.msra.mxu0 %v5436_v36 }
 0x57d   :  { %5384 = vmatprep.subr.bf16.mxu1 %v5567_v13  ;;  %5438 = vmatprep.subr.bf16.mxu0 %v5567_v13 }
 0x580   :  { %5386 = vmatpush3.bf16.msra.mxu1 %v5385_v2  ;;  %5440 = vmatpush3.bf16.msra.mxu0 %v5439_v4  ;;  %v3927_v4 = vld [vmem:[%s7536_s10] ss:$0 sm:$0xff] }
 0x581   :  { %5387 = vmatprep.subr.bf16.mxu1 %v5567_v13  ;;  %5441 = vmatprep.subr.bf16.mxu0 %v5567_v13 }
 0x584   :  { %5389 = vmatpush3.bf16.msra.mxu1 %v5388_v32  ;;  %5443 = vmatpush3.bf16.msra.mxu0 %v5442_v61 }
 0x585   :  { %5408 = vmatprep.subr.bf16.mxu1 %v5567_v13 }
 0x587   :  { %4548 = vmatmul.mubr.msk.f32.vlgmr.msra.gmra.mrb[18].mxu1 %vm96_vm0, %v7248_v16  ;;  %4629 = vmatmul.mubr.msk.f32.vlgmr.msra.gmra.mrb[22].mxu0 %vm96_vm0, %v7253_v3  ;;  %v5415_v16 = vpack.c.bf16 %v3893_v42, %v3892_v44  ;;  %v3894_v3 = vld [vmem:[%s7535_s9 + $0x210] sm:$0xff] }
 0x588   :  { %5410 = vmatpush3.bf16.msra.mxu1 %v5409_v30  ;;  %4601 = vmatprep.mubr.msk.f32.mxu1 %vm5568_vm9, %v5566_v7  ;;  %v5418_v15 = vpack.c.bf16 %v3895_v14, %v3894_v3 }
 0x589   :  { %5411 = vmatprep.subr.bf16.mxu1 %v5567_v13 }
 0x58c   :  { %5413 = vmatpush3.bf16.msra.mxu1 %v5412_v19 }
 0x58d   :  { %5414 = vmatprep.subr.bf16.mxu1 %v5567_v13 }
 0x590   :  { %5416 = vmatpush3.bf16.msra.mxu1 %v5415_v16 }
 0x591   :  { %5417 = vmatprep.subr.bf16.mxu1 %v5567_v13 }
 0x594   :  { %5419 = vmatpush3.bf16.msra.mxu1 %v5418_v15 }
 0x595   :  { %5420 = vmatprep.subr.bf16.mxu1 %v5567_v13 }
 0x598   :  { %5422 = vmatpush3.bf16.msra.mxu1 %v5421_v43 }
 0x599   :  { %5423 = vmatprep.subr.bf16.mxu1 %v5567_v13 }
 0x59c   :  { %5425 = vmatpush3.bf16.msra.mxu1 %v5424_v23 }
 0x59d   :  { %5444 = vmatprep.subr.bf16.mxu1 %v5567_v13 }
 0x59f   :  { %4602 = vmatmul.mubr.msk.f32.vlgmr.msra.gmra.mrb[20].mxu1 %vm96_vm0, %v7270_v11  ;;  %v3920_v11 = vld [vmem:[%s7535_s9 + $0x2d0] sm:$0xff] }
 0x5a0   :  { %5446 = vmatpush3.bf16.msra.mxu1 %v5445_v27  ;;  %4655 = vmatprep.mubr.msk.f32.mxu1 %vm5568_vm9, %v5566_v7  ;;  %v3921_v7 = vld [vmem:[%s7535_s9 + $0x2d8] sm:$0xff] }
 0x5a1   :  { %5447 = vmatprep.subr.bf16.mxu1 %v5567_v13  ;;  %v5454_v35 = vpack.c.bf16 %v3921_v7, %v3920_v11 }
 0x5a4   :  { %5449 = vmatpush3.bf16.msra.mxu1 %v5448_v8 }
 0x5a5   :  { %5450 = vmatprep.subr.bf16.mxu1 %v5567_v13 }
 0x5a8   :  { %5452 = vmatpush3.bf16.msra.mxu1 %v5451_v63 }
 0x5a9   :  { %5453 = vmatprep.subr.bf16.mxu1 %v5567_v13 }
 0x5ac   :  { %5455 = vmatpush3.bf16.msra.mxu1 %v5454_v35 }
 0x5ad   :  { %5456 = vmatprep.subr.bf16.mxu1 %v5567_v13 }
 0x5b0   :  { %5458 = vmatpush3.bf16.msra.mxu1 %v5457_v39 }
 0x5b1   :  { %5459 = vmatprep.subr.bf16.mxu1 %v5567_v13 }
 0x5b4   :  { %5461 = vmatpush3.bf16.msra.mxu1 %v5460_v47 }
 0x5b7   :  { %4656 = vmatmul.mubr.msk.f32.vlgmr.msra.gmra.mrb[22].mxu1 %vm96_vm0, %v7273_v12 }
 0x62a   :  { %v2851_v24 = vpop.f32.mrb[14].mxu1  ;;  %v3013_v48 = vpop.f32.mrb[18].mxu0 }
 0x62b   :  { %v4468_v34 = vpop.f32.mrb[15].mxu1  ;;  %v4522_v49 = vpop.f32.mrb[19].mxu0 }
 0x642   :  { %v2925_v45 = vpop.f32.mrb[16].mxu1  ;;  %v3191_v50 = vpop.f32.mrb[20].mxu0 }
 0x643   :  { %v2926_v51 = vadd.f32 %v2925_v45, %v2851_v24  ;;  %v4495_v52 = vpop.f32.mrb[17].mxu1  ;;  %v4576_v53 = vpop.f32.mrb[21].mxu0 }
 0x645   :  { %v3017_v55 = vadd.f32 %v3013_v48, %v2926_v51 }
 0x65a   :  { %v3102_v56 = vpop.f32.mrb[18].mxu1  ;;  %v3369_v58 = vpop.f32.mrb[22].mxu0 }
 0x65b   :  { %v3106_v59 = vadd.f32 %v3102_v56, %v3017_v55  ;;  %v4549_v36 = vpop.f32.mrb[19].mxu1  ;;  %v4630_v60 = vpop.f32.mrb[23].mxu0 }
 0x65d   :  { %v3195_v13 = vadd.f32 %v3191_v50, %v3106_v59 }
 0x672   :  { %v3280_v62 = vpop.f32.mrb[20].mxu1 }
 0x673   :  { %v3284_v0 = vadd.f32 %v3280_v62, %v3195_v13  ;;  %v4603_v1 = vpop.f32.mrb[21].mxu1 }
 0x675   :  { %v3373_v12 = vadd.f32 %v3369_v58, %v3284_v0 }
 0x68a   :  { %v3458_v2 = vpop.f32.mrb[22].mxu1 }
 0x68b   :  { %v3462_v17 = vadd.f32 %v3458_v2, %v3373_v12  ;;  %v4657_v54 = vpop.f32.mrb[23].mxu1 }
 0x68d   :  { %v3470_v57 = vadd.f32 %v3927_v4, %v3462_v17 }
 0x68f   :  { %3471 = vst [vmem:[#allocation2] sm:$0x3] %v3470_v57 }
 0x690   :  { %5553 = shalt.err (!%p5550_p4)
}
 0x691   :  { %s5554_s3 = scalar_lea.hbm %s7537_s11, 32 }
 0x692   :  { %p5555_p5 = scmp.ne.s32.totalorder %s7537_s11, %s5554_s3  ;;  %p5558_p6 = scmp.lt.u32.totalorder %s5554_s3, %s7537_s11 }
 0x694   :  { %p5560_p7 = pnand %p5558_p6, %p5555_p5 }
 0x696   :  { %5563 = shalt.err (!%p5560_p7)
}
 0x697   :  { %3481 = dma.vmem_to_hbm [thread:$0]  %s3479_s0, 32, %s7537_s11, [#allocation3]  }
 0x698   :  { %5564 = dma.done.wait [#allocation3], 32  }
 0x699   :  { %5565 = vsyncadd [#allocation3], 4294967264 }
 0x69a   :  { %3485 = vsyncpa [#allocation3], 1 }

</bundles_post_ra>
